<compile_context>
chip_gen: v7x
topology: tpu7x:2x2x1
jax: 0.10.0
libtpu: 0.0.40
codegen_flags: <defaults>
</compile_context>

<pallas_src>
import functools
import math

import numpy as np
import jax
import jax.numpy as jnp
from jax import lax
from jax.experimental import pallas as pl
from jax.experimental.pallas import tpu as pltpu

_LN_EPS = 1e-5
_MASK_BIAS = -1e9

# Flipped off (once) if this jax build rejects pipeline_mode=pl.Buffered(1).
_SINGLE_BUFFERED_WEIGHTS = [True]


def _layernorm(x, gamma, beta, eps=_LN_EPS):
    mu = jnp.mean(x, axis=-1, keepdims=True)
    xc = x - mu
    var = jnp.mean(xc * xc, axis=-1, keepdims=True)
    return xc * lax.rsqrt(var + eps) * gamma + beta


# --------------------------------------------------------------------------
# Fused EncoderLayer kernel
# --------------------------------------------------------------------------
def _encoder_layer_kernel(xq_ref, xkv_ref, bias_ref,
                          wq_ref, bq_ref, wkv_ref, bkv_ref, wo_ref, bo_ref,
                          ln1g_ref, ln1b_ref,
                          w1_ref, b1_ref, w2_ref, b2_ref,
                          ln2g_ref, ln2b_ref,
                          out_ref,
                          kv_ref, q_ref, m_ref, l_ref, acc_ref,
                          *, n_heads, approx_recip):
    f32 = jnp.float32
    cd = wq_ref.dtype                       # matmul-input (compute) dtype

    q_idx = pl.program_id(1)
    k_idx = pl.program_id(2)
    n_kv = pl.num_programs(2)

    H = wq_ref.shape[0]
    d = H // n_heads
    tq = q_ref.shape[1]
    tk = xkv_ref.shape[1]

    # ---- K/V projection of this kv chunk: done once per batch (while q==0)
    #      and cached head-major in VMEM for reuse by every query tile. ------
    @pl.when(q_idx == 0)
    def _():
        xc = xkv_ref[0]                                            # (tk, H)
        kvc = jnp.dot(xc.astype(cd), wkv_ref[...],
                      preferred_element_type=f32) + bkv_ref[...]   # (tk, 2H)
        kvc = kvc.reshape(tk, n_heads, 2 * d).transpose(1, 0, 2)   # (nh, tk, 2d)
        kv_ref[k_idx] = kvc.astype(kv_ref.dtype)

    # ---- per-query-tile init (first kv chunk): Q projection + flash stats --
    @pl.when(k_idx == 0)
    def _():
        xq = xq_ref[0]                                             # (tq, H)
        q = jnp.dot(xq.astype(cd), wq_ref[...],
                    preferred_element_type=f32) + bq_ref[...]      # 1/sqrt(d) folded in
        q_ref[...] = q.reshape(tq, n_heads, d).transpose(1, 0, 2).astype(q_ref.dtype)
        m_ref[...] = jnp.full(m_ref.shape, -1e30, dtype=m_ref.dtype)
        l_ref[...] = jnp.zeros(l_ref.shape, dtype=l_ref.dtype)
        acc_ref[...] = jnp.zeros(acc_ref.shape, dtype=acc_ref.dtype)

    # ---- online-softmax accumulation over this kv chunk --------------------
    kv = kv_ref[k_idx]                                             # (nh, tk, 2d)
    kh = kv[:, :, :d]
    vh = kv[:, :, d:]

    s = jnp.einsum('hqd,hkd->hqk', q_ref[...], kh,
                   preferred_element_type=f32)                     # (nh, tq, tk)
    s = s + bias_ref[0].reshape(1, 1, tk)                          # additive key mask

    m_prev = m_ref[...]                                            # (nh, tq)
    m_new = jnp.maximum(m_prev, jnp.max(s, axis=-1))
    corr = jnp.exp(m_prev - m_new)                                 # (nh, tq)
    e = jnp.exp(s - m_new[:, :, None])                             # (nh, tq, tk)
    l_ref[...] = corr * l_ref[...] + jnp.sum(e, axis=-1)
    pv = jnp.einsum('hqk,hkd->hqd', e.astype(cd), vh,
                    preferred_element_type=f32)                    # (nh, tq, d)
    acc_ref[...] = corr[:, :, None] * acc_ref[...] + pv
    m_ref[...] = m_new

    # ---- last kv chunk: normalize, out-proj, residual+LN, FFN, residual+LN -
    @pl.when(k_idx == n_kv - 1)
    def _():
        inv_l = pl.reciprocal(l_ref[...], approx=approx_recip)     # (nh, tq)
        ctx = acc_ref[...] * inv_l[:, :, None]                     # (nh, tq, d)
        ctx = ctx.transpose(1, 0, 2).reshape(tq, H)                # merge heads
        attn_out = jnp.dot(ctx.astype(cd), wo_ref[...],
                           preferred_element_type=f32) + bo_ref[...]

        x_res = xq_ref[0].astype(f32)
        h = _layernorm(attn_out + x_res, ln1g_ref[...], ln1b_ref[...])

        f = jnp.dot(h.astype(cd), w1_ref[...],
                    preferred_element_type=f32) + b1_ref[...]
        f = jnp.maximum(f, 0.0)
        f = jnp.dot(f.astype(cd), w2_ref[...],
                    preferred_element_type=f32) + b2_ref[...]

        out = _layernorm(f + h, ln2g_ref[...], ln2b_ref[...])
        out_ref[0] = out.astype(out_ref.dtype)


# --------------------------------------------------------------------------
# Host-side helpers
# --------------------------------------------------------------------------
def _plan_seq(S, seq_tile=None):
    """Choose (S_pad, tq, tk).  Pads S so it divides evenly into tiles."""
    if seq_tile is None:
        if S <= 512:
            return S, S, S            # single tile; block == full dim is always legal
        seq_tile = 256                # 256 keeps v6e/v7x MXU shapes & VMEM happy
    S_pad = ((S + seq_tile - 1) // seq_tile) * seq_tile
    return S_pad, seq_tile, seq_tile


def _vmem_cap_bytes():
    try:
        cap = getattr(pltpu.get_tpu_info(), 'vmem_capacity_bytes', None)
        if cap:
            return int(cap)
    except Exception:
        pass
    return 64 * 1024 * 1024           # conservative (v7x-sized) fallback


def _layer_vmem_limit(lp, *, S_pad, tq, tk, n_heads, hidden_dtype):
    """Per-generation VMEM budget computed from the actual footprint."""
    f32b = 4
    cdb = np.dtype(lp['w_q'].dtype).itemsize
    hb = np.dtype(hidden_dtype).itemsize
    H = lp['w_q'].shape[0]
    d = H // n_heads
    lane = lambda n: max(n, 128)
    n_kv = S_pad // tk
    w_bytes = sum(int(v.size) * np.dtype(v.dtype).itemsize for v in lp.values())
    blocks = 2 * (tq * H * hb            # query tile
                  + tk * H * hb          # streamed K/V-source chunk
                  + tk * f32b            # bias chunk
                  + tq * H * hb)         # output tile
    scratch = (n_kv * n_heads * tk * lane(2 * d) * cdb        # K/V cache
               + n_heads * tq * lane(d) * (cdb + f32b)        # Q tile + acc
               + 2 * n_heads * lane(tq) * f32b)               # m, l
    live = 4 * n_heads * tq * lane(tk) * f32b                 # score/exp temporaries
    need = 2 * w_bytes + blocks + scratch + live + (4 << 20)
    return int(min(max(need, 32 << 20), int(_vmem_cap_bytes() * 0.9)))


def _default_compute_dtype():
    # bf16 matmul inputs on v5e (f32 matmuls run multi-pass on its MXU).
    try:
        kind = jax.devices()[0].device_kind.lower()
        if 'v5e' in kind or 'v5 lite' in kind or 'v5litepod' in kind:
            return jnp.bfloat16
    except Exception:
        pass
    return jnp.float32


def _pack_layer_params(p, n_heads, compute_dtype):
    """PyTorch-layout params -> kernel layout (pre-transposed, fused, scaled)."""
    H = p['wq'].shape[0]
    P = p['w1'].shape[0]
    d = H // n_heads
    s = 1.0 / math.sqrt(d)
    cd = compute_dtype
    f32 = jnp.float32
    # K and V output columns interleaved per head: [... head_h: k(0..d) v(0..d) ...]
    wk_t = p['wk'].T.reshape(H, n_heads, d)
    wv_t = p['wv'].T.reshape(H, n_heads, d)
    w_kv = jnp.concatenate([wk_t, wv_t], axis=-1).reshape(H, 2 * H)
    b_kv = jnp.concatenate([p['bk'].reshape(n_heads, d),
                            p['bv'].reshape(n_heads, d)], axis=-1).reshape(1, 2 * H)
    return dict(
        w_q=(p['wq'] * s).T.astype(cd),
        b_q=(p['bq'] * s).reshape(1, H).astype(f32),
        w_kv=w_kv.astype(cd),
        b_kv=b_kv.astype(f32),
        w_o=p['wo'].T.astype(cd),
        b_o=p['bo'].reshape(1, H).astype(f32),
        ln1_g=p['ln1_g'].reshape(1, H).astype(f32),
        ln1_b=p['ln1_b'].reshape(1, H).astype(f32),
        w1=p['w1'].T.astype(cd),
        b1=p['b1'].reshape(1, P).astype(f32),
        w2=p['w2'].T.astype(cd),
        b2=p['b2'].reshape(1, H).astype(f32),
        ln2_g=p['ln2_g'].reshape(1, H).astype(f32),
        ln2_b=p['ln2_b'].reshape(1, H).astype(f32),
    )


def pack_encoder_params(layer_params, *, n_heads, compute_dtype=None):
    """Pack all layer weights once (call at parameter-load time, reuse per fwd)."""
    if compute_dtype is None:
        compute_dtype = _default_compute_dtype()
    return [_pack_layer_params(p, n_heads, compute_dtype) for p in layer_params]


def _const_spec(shape, single_buffer):
    """Resident weight/bias block (constant index).  Single-buffer when possible."""
    index_map = lambda b, q, k: (0,) * len(shape)
    if single_buffer:
        try:
            return pl.BlockSpec(shape, index_map, pipeline_mode=pl.Buffered(1))
        except Exception:
            return pl.BlockSpec(shape, index_map)
    return pl.BlockSpec(shape, index_map)


def _build_layer_call(x, bias, lp, *, n_heads, tq, tk, vmem_limit, single_buffer):
    B, S, H = x.shape
    P = lp['w1'].shape[1]
    d = H // n_heads
    n_q = S // tq
    n_kv = S // tk
    cd = lp['w_q'].dtype

    const = functools.partial(_const_spec, single_buffer=single_buffer)

    in_specs = [
        # query tile: resident across the kv axis
        pl.BlockSpec((1, tq, H), lambda b, q, k: (b, q, 0)),
        # K/V source: streamed in kv chunks while q == 0, then pinned (no re-fetch)
        pl.BlockSpec((1, tk, H),
                     lambda b, q, k: (b, jnp.where(q == 0, k, n_kv - 1), 0)),
        # additive key-padding bias (0 / -1e9), chunked along the key axis
        pl.BlockSpec((1, tk, 1), lambda b, q, k: (b, k, 0)),
        const((H, H)), const((1, H)),            # Wq (scaled), bq
        const((H, 2 * H)), const((1, 2 * H)),    # Wkv (head-interleaved), bkv
        const((H, H)), const((1, H)),            # Wo, bo
        const((1, H)), const((1, H)),            # LN1 gamma/beta
        const((H, P)), const((1, P)),            # W1, b1
        const((P, H)), const((1, H)),            # W2, b2
        const((1, H)), const((1, H)),            # LN2 gamma/beta
    ]

    kernel = functools.partial(
        _encoder_layer_kernel, n_heads=n_heads,
        approx_recip=bool(cd == jnp.bfloat16))

    return pl.pallas_call(
        kernel,
        out_shape=jax.ShapeDtypeStruct((B, S, H), x.dtype),
        grid_spec=pltpu.PrefetchScalarGridSpec(
            num_scalar_prefetch=0,
            grid=(B, n_q, n_kv),
            in_specs=in_specs,
            out_specs=pl.BlockSpec((1, tq, H), lambda b, q, k: (b, q, 0)),
            scratch_shapes=[
                pltpu.VMEM((n_kv, n_heads, tk, 2 * d), cd),   # per-batch K/V cache
                pltpu.VMEM((n_heads, tq, d), cd),             # Q tile (head-major)
                pltpu.VMEM((n_heads, tq), jnp.float32),       # running max
                pltpu.VMEM((n_heads, tq), jnp.float32),       # running sum
                pltpu.VMEM((n_heads, tq, d), jnp.float32),    # running ctx accumulator
            ]),
        compiler_params=pltpu.CompilerParams(
            # batch stays parallel (megacore); q/kv are arbitrary because the
            # K/V cache and flash accumulators persist across them.
            dimension_semantics=("parallel", "arbitrary", "arbitrary"),
            vmem_limit_bytes=vmem_limit,
        ),
    )(x, x, bias,
      lp['w_q'], lp['b_q'], lp['w_kv'], lp['b_kv'], lp['w_o'], lp['b_o'],
      lp['ln1_g'], lp['ln1_b'],
      lp['w1'], lp['b1'], lp['w2'], lp['b2'],
      lp['ln2_g'], lp['ln2_b'])


def _encoder_layer_forward(x, bias, lp, *, n_heads, tq, tk, vmem_limit):
    if _SINGLE_BUFFERED_WEIGHTS[0]:
        try:
            return _build_layer_call(x, bias, lp, n_heads=n_heads, tq=tq, tk=tk,
                                     vmem_limit=vmem_limit, single_buffer=True)
        except Exception:
            _SINGLE_BUFFERED_WEIGHTS[0] = False
    return _build_layer_call(x, bias, lp, n_heads=n_heads, tq=tq, tk=tk,
                             vmem_limit=vmem_limit, single_buffer=False)


def encoder_forward(input_src, input_mask, packed_layers, *, n_heads, seq_tile=None):
    """Pallas forward of Encoder: a stack of fused EncoderLayer kernels.

    input_src:     (B, S, H) hidden states.
    input_mask:    (B, S) key-padding mask (1 = keep, 0 = mask) or None.
    packed_layers: output of pack_encoder_params (packed once, reused per call).
    """
    B, S, H = input_src.shape
    f32 = jnp.float32
    bf16_compute = bool(packed_layers[0]['w_q'].dtype == jnp.bfloat16)
    hidden_dtype = jnp.bfloat16 if bf16_compute else f32

    S_pad, tq, tk = _plan_seq(S, seq_tile)

    # Additive key-padding bias, laid out (B, S_pad, 1) so the key axis can be
    # chunked freely (lane-dim block constraint does not apply).
    if input_mask is None:
        bias = jnp.zeros((B, S, 1), f32)
    else:
        bias = jnp.where(input_mask.reshape(B, S, 1) == 0,
                         _MASK_BIAS, 0.0).astype(f32)

    x = input_src.astype(hidden_dtype)
    if S_pad != S:
        x = jnp.pad(x, ((0, 0), (0, S_pad - S), (0, 0)))
        bias = jnp.pad(bias, ((0, 0), (0, S_pad - S), (0, 0)),
                       constant_values=_MASK_BIAS)

    vmem_limit = max(
        _layer_vmem_limit(lp, S_pad=S_pad, tq=tq, tk=tk,
                          n_heads=n_heads, hidden_dtype=hidden_dtype)
        for lp in packed_layers)

    for lp in packed_layers:
        x = _encoder_layer_forward(x, bias, lp, n_heads=n_heads, tq=tq, tk=tk,
                                   vmem_limit=vmem_limit)
    if S_pad != S:
        x = x[:, :S, :]
    return x


# --------------------------------------------------------------------------
# Plain-JAX reference (mirrors the PyTorch Encoder forward, eval mode)
# --------------------------------------------------------------------------
def _reference_encoder(input_src, input_mask, layer_params, *, n_heads):
    B, S, H = input_src.shape
    d = H // n_heads

    def lin(v, w, b):
        return v @ w.T + b

    def ln(v, g, b):
        mu = jnp.mean(v, axis=-1, keepdims=True)
        var = jnp.mean((v - mu) ** 2, axis=-1, keepdims=True)
        return (v - mu) / jnp.sqrt(var + _LN_EPS) * g + b

    x = input_src
    for p in layer_params:
        Q = lin(x, p['wq'], p['bq']).reshape(B, S, n_heads, d).transpose(0, 2, 1, 3)
        K = lin(x, p['wk'], p['bk']).reshape(B, S, n_heads, d).transpose(0, 2, 1, 3)
        V = lin(x, p['wv'], p['bv']).reshape(B, S, n_heads, d).transpose(0, 2, 1, 3)
        scores = (Q / math.sqrt(d)) @ K.transpose(0, 1, 3, 2)
        if input_mask is not None:
            m = input_mask.reshape(B, 1, 1, S)
            scores = jnp.where(m == 0, -1e9, scores)
        attn = jax.nn.softmax(scores, axis=-1)
        ctx = (attn @ V).transpose(0, 2, 1, 3).reshape(B, S, H)
        x = ln(lin(ctx, p['wo'], p['bo']) + x, p['ln1_g'], p['ln1_b'])
        f = jnp.maximum(lin(x, p['w1'], p['b1']), 0.0)
        f = lin(f, p['w2'], p['b2'])
        x = ln(f + x, p['ln2_g'], p['ln2_b'])
    return x


if __name__ == "__main__":
    B, H, n_heads, P, n_layers = 2, 32, 4, 64, 2
    key = jax.random.PRNGKey(0)

    def mk_layer(k):
        ks = jax.random.split(k, 14)
        s = 1.0 / math.sqrt(H)
        u = lambda kk, shape: jax.random.uniform(kk, shape, jnp.float32, -s, s)
        return dict(
            wq=u(ks[0], (H, H)), bq=u(ks[1], (H,)),
            wk=u(ks[2], (H, H)), bk=u(ks[3], (H,)),
            wv=u(ks[4], (H, H)), bv=u(ks[5], (H,)),
            wo=u(ks[6], (H, H)), bo=u(ks[7], (H,)),
            ln1_g=1.0 + 0.05 * jax.random.normal(ks[8], (H,), jnp.float32),
            ln1_b=0.05 * jax.random.normal(ks[9], (H,), jnp.float32),
            w1=u(ks[10], (P, H)), b1=u(ks[11], (P,)),
            w2=u(ks[12], (H, P)), b2=u(ks[13], (H,)),
            ln2_g=jnp.ones((H,), jnp.float32),
            ln2_b=jnp.zeros((H,), jnp.float32),
        )

    key, *lkeys = jax.random.split(key, n_layers + 1)
    layer_params = [mk_layer(k) for k in lkeys]

    # Weights are packed ONCE (transposed / fused / scale folded), then reused.
    packed_f32 = pack_encoder_params(layer_params, n_heads=n_heads,
                                     compute_dtype=jnp.float32)
    packed_bf16 = pack_encoder_params(layer_params, n_heads=n_heads,
                                      compute_dtype=jnp.bfloat16)

    # ---- case 1: S = 8, single-tile path ----------------------------------
    S = 8
    key, k_src = jax.random.split(key)
    src = jax.random.normal(k_src, (B, S, H), jnp.float32)
    mask = jnp.array([[1, 1, 1, 1, 1, 1, 1, 1],
                      [1, 1, 1, 1, 1, 1, 0, 0]], dtype=jnp.float32)
    ref = _reference_encoder(src, mask, layer_params, n_heads=n_heads)

    out = jax.block_until_ready(
        encoder_forward(src, mask, packed_f32, n_heads=n_heads))
    assert out.shape == (B, S, H)
    diff = float(jnp.max(jnp.abs(out - ref)))
    assert diff < 2e-3, f"f32 output mismatch: max |diff| = {diff}"

    out_bf16 = jax.block_until_ready(
        encoder_forward(src, mask, packed_bf16, n_heads=n_heads))
    diff_bf16 = float(jnp.max(jnp.abs(out_bf16.astype(jnp.float32) - ref)))
    assert diff_bf16 < 0.15, f"bf16 output mismatch: max |diff| = {diff_bf16}"

    # ---- case 2: S = 21 with forced 8-wide tiles: exercises padding, the
    #      multi-(q,kv)-tile flash path and per-batch K/V cache reuse ---------
    S2 = 21
    key, k_src2, k_mask2 = jax.random.split(key, 3)
    src2 = jax.random.normal(k_src2, (B, S2, H), jnp.float32)
    mask2 = (jax.random.uniform(k_mask2, (B, S2)) > 0.25).astype(jnp.float32)
    mask2 = mask2.at[:, 0].set(1.0)          # keep >= 1 valid key per batch row
    ref2 = _reference_encoder(src2, mask2, layer_params, n_heads=n_heads)

    out2 = jax.block_until_ready(
        encoder_forward(src2, mask2, packed_f32, n_heads=n_heads, seq_tile=8))
    assert out2.shape == (B, S2, H)
    diff2 = float(jnp.max(jnp.abs(out2 - ref2)))
    assert diff2 < 2e-3, f"tiled f32 output mismatch: max |diff| = {diff2}"

    print("KERNEL_OK")
</pallas_src>

<mosaic_0001>
module attributes {stable_mosaic.version = 11 : i64} {
  func.func @_encoder_layer_kernel(%arg0: i32, %arg1: i32, %arg2: i32, %arg3: memref<1x8x32xf32, #tpu.memory_space<vmem>>, %arg4: memref<1x8x32xf32, #tpu.memory_space<vmem>>, %arg5: memref<1x8x1xf32, #tpu.memory_space<vmem>>, %arg6: memref<32x32xf32, #tpu.memory_space<vmem>>, %arg7: memref<1x32xf32, #tpu.memory_space<vmem>>, %arg8: memref<32x64xf32, #tpu.memory_space<vmem>>, %arg9: memref<1x64xf32, #tpu.memory_space<vmem>>, %arg10: memref<32x32xf32, #tpu.memory_space<vmem>>, %arg11: memref<1x32xf32, #tpu.memory_space<vmem>>, %arg12: memref<1x32xf32, #tpu.memory_space<vmem>>, %arg13: memref<1x32xf32, #tpu.memory_space<vmem>>, %arg14: memref<32x64xf32, #tpu.memory_space<vmem>>, %arg15: memref<1x64xf32, #tpu.memory_space<vmem>>, %arg16: memref<64x32xf32, #tpu.memory_space<vmem>>, %arg17: memref<1x32xf32, #tpu.memory_space<vmem>>, %arg18: memref<1x32xf32, #tpu.memory_space<vmem>>, %arg19: memref<1x32xf32, #tpu.memory_space<vmem>>, %arg20: memref<1x8x32xf32, #tpu.memory_space<vmem>>, %arg21: memref<1x4x8x16xf32, #tpu.memory_space<vmem>>, %arg22: memref<4x8x8xf32, #tpu.memory_space<vmem>>, %arg23: memref<4x8xf32, #tpu.memory_space<vmem>>, %arg24: memref<4x8xf32, #tpu.memory_space<vmem>>, %arg25: memref<4x8x8xf32, #tpu.memory_space<vmem>>) attributes {dimension_semantics = [#tpu.dimension_semantics<parallel>, #tpu.dimension_semantics<arbitrary>, #tpu.dimension_semantics<arbitrary>], iteration_bounds = array<i64: 2, 1, 1>, scalar_prefetch = 0 : i64, scratch_operands = 5 : i64, tpu.core_type = #tpu.core_type<tc>, window_params = [{transform_indices = @transform_0, window_bounds = array<i64: 1, 8, 32>}, {transform_indices = @transform_1, window_bounds = array<i64: 1, 8, 32>}, {transform_indices = @transform_2, window_bounds = array<i64: 1, 8, 1>}, {pipeline_mode = #tpu.pipeline_mode<synchronous>, transform_indices = @transform_3, window_bounds = array<i64: 32, 32>}, {pipeline_mode = #tpu.pipeline_mode<synchronous>, transform_indices = @transform_4, window_bounds = array<i64: 1, 32>}, {pipeline_mode = #tpu.pipeline_mode<synchronous>, transform_indices = @transform_5, window_bounds = array<i64: 32, 64>}, {pipeline_mode = #tpu.pipeline_mode<synchronous>, transform_indices = @transform_6, window_bounds = array<i64: 1, 64>}, {pipeline_mode = #tpu.pipeline_mode<synchronous>, transform_indices = @transform_7, window_bounds = array<i64: 32, 32>}, {pipeline_mode = #tpu.pipeline_mode<synchronous>, transform_indices = @transform_8, window_bounds = array<i64: 1, 32>}, {pipeline_mode = #tpu.pipeline_mode<synchronous>, transform_indices = @transform_9, window_bounds = array<i64: 1, 32>}, {pipeline_mode = #tpu.pipeline_mode<synchronous>, transform_indices = @transform_10, window_bounds = array<i64: 1, 32>}, {pipeline_mode = #tpu.pipeline_mode<synchronous>, transform_indices = @transform_11, window_bounds = array<i64: 32, 64>}, {pipeline_mode = #tpu.pipeline_mode<synchronous>, transform_indices = @transform_12, window_bounds = array<i64: 1, 64>}, {pipeline_mode = #tpu.pipeline_mode<synchronous>, transform_indices = @transform_13, window_bounds = array<i64: 64, 32>}, {pipeline_mode = #tpu.pipeline_mode<synchronous>, transform_indices = @transform_14, window_bounds = array<i64: 1, 32>}, {pipeline_mode = #tpu.pipeline_mode<synchronous>, transform_indices = @transform_15, window_bounds = array<i64: 1, 32>}, {pipeline_mode = #tpu.pipeline_mode<synchronous>, transform_indices = @transform_16, window_bounds = array<i64: 1, 32>}, {transform_indices = @transform_17, window_bounds = array<i64: 1, 8, 32>}]} {
    %c0_i32 = arith.constant 0 : i32
    %0 = arith.cmpi eq, %arg1, %c0_i32 : i32
    %1 = arith.extui %0 : i1 to i32
    %c0_i32_0 = arith.constant 0 : i32
    %2 = arith.cmpi ne, %1, %c0_i32_0 : i32
    scf.if %2 {
      %c0_30 = arith.constant 0 : index
      %c0_31 = arith.constant 0 : index
      %c0_32 = arith.constant 0 : index
      %43 = vector.load %arg4[%c0_30, %c0_31, %c0_32] : memref<1x8x32xf32, #tpu.memory_space<vmem>>, vector<1x8x32xf32>
      %44 = vector.shape_cast %43 : vector<1x8x32xf32> to vector<8x32xf32>
      %c0_33 = arith.constant 0 : index
      %c0_34 = arith.constant 0 : index
      %45 = vector.load %arg8[%c0_33, %c0_34] : memref<32x64xf32, #tpu.memory_space<vmem>>, vector<32x64xf32>
      %cst_35 = arith.constant dense<0.000000e+00> : vector<8x64xf32>
      %46 = tpu.matmul %44, %45, %cst_35 {dimension_numbers = #tpu.dot_dimension_numbers<[1], [0], [0], [1], [0, 0, 1, 1], [], []>} : vector<8x32xf32>, vector<32x64xf32>, vector<8x64xf32> -> vector<8x64xf32>
      %c0_36 = arith.constant 0 : index
      %c0_37 = arith.constant 0 : index
      %47 = vector.load %arg9[%c0_36, %c0_37] : memref<1x64xf32, #tpu.memory_space<vmem>>, vector<1x64xf32>
      %48 = vector.broadcast %47 : vector<1x64xf32> to vector<8x64xf32>
      %49 = arith.addf %46, %48 : vector<8x64xf32>
      %50 = vector.shape_cast %49 : vector<8x64xf32> to vector<8x4x16xf32>
      %51 = tpu.transpose %50, [1, 0, 2] : vector<8x4x16xf32> -> vector<4x8x16xf32>
      %52 = arith.index_cast %arg2 : i32 to index
      %c0_38 = arith.constant 0 : index
      %c0_39 = arith.constant 0 : index
      %c0_40 = arith.constant 0 : index
      %53 = vector.load %arg21[%52, %c0_38, %c0_39, %c0_40] : memref<1x4x8x16xf32, #tpu.memory_space<vmem>>, vector<1x4x8x16xf32>
      %54 = vector.shape_cast %53 : vector<1x4x8x16xf32> to vector<4x8x16xf32>
      %55 = vector.shape_cast %51 : vector<4x8x16xf32> to vector<1x4x8x16xf32>
      tpu.vector_store %arg21[%52, %c0_38, %c0_39, %c0_40], %55 {strides = array<i32>} : memref<1x4x8x16xf32, #tpu.memory_space<vmem>>, vector<1x4x8x16xf32>,
    } else {
    }
    %c0_i32_1 = arith.constant 0 : i32
    %3 = arith.cmpi eq, %arg2, %c0_i32_1 : i32
    %4 = arith.extui %3 : i1 to i32
    %c0_i32_2 = arith.constant 0 : i32
    %5 = arith.cmpi ne, %4, %c0_i32_2 : i32
    scf.if %5 {
      %c0_30 = arith.constant 0 : index
      %c0_31 = arith.constant 0 : index
      %c0_32 = arith.constant 0 : index
      %43 = vector.load %arg3[%c0_30, %c0_31, %c0_32] : memref<1x8x32xf32, #tpu.memory_space<vmem>>, vector<1x8x32xf32>
      %44 = vector.shape_cast %43 : vector<1x8x32xf32> to vector<8x32xf32>
      %c0_33 = arith.constant 0 : index
      %c0_34 = arith.constant 0 : index
      %45 = vector.load %arg6[%c0_33, %c0_34] : memref<32x32xf32, #tpu.memory_space<vmem>>, vector<32x32xf32>
      %cst_35 = arith.constant dense<0.000000e+00> : vector<8x32xf32>
      %46 = tpu.matmul %44, %45, %cst_35 {dimension_numbers = #tpu.dot_dimension_numbers<[1], [0], [0], [1], [0, 0, 1, 1], [], []>} : vector<8x32xf32>, vector<32x32xf32>, vector<8x32xf32> -> vector<8x32xf32>
      %c0_36 = arith.constant 0 : index
      %c0_37 = arith.constant 0 : index
      %47 = vector.load %arg7[%c0_36, %c0_37] : memref<1x32xf32, #tpu.memory_space<vmem>>, vector<1x32xf32>
      %48 = vector.broadcast %47 : vector<1x32xf32> to vector<8x32xf32>
      %49 = arith.addf %46, %48 : vector<8x32xf32>
      %50 = vector.shape_cast %49 : vector<8x32xf32> to vector<8x4x8xf32>
      %51 = tpu.transpose %50, [1, 0, 2] : vector<8x4x8xf32> -> vector<4x8x8xf32>
      %c0_38 = arith.constant 0 : index
      %c0_39 = arith.constant 0 : index
      %c0_40 = arith.constant 0 : index
      %52 = vector.load %arg22[%c0_38, %c0_39, %c0_40] : memref<4x8x8xf32, #tpu.memory_space<vmem>>, vector<4x8x8xf32>
      tpu.vector_store %arg22[%c0_38, %c0_39, %c0_40], %51 {strides = array<i32>} : memref<4x8x8xf32, #tpu.memory_space<vmem>>, vector<4x8x8xf32>,
      %cst_41 = arith.constant -1.000000e+30 : f32
      %53 = vector.broadcast %cst_41 : f32 to vector<4x8xf32>
      %c0_42 = arith.constant 0 : index
      %c0_43 = arith.constant 0 : index
      %54 = vector.load %arg23[%c0_42, %c0_43] : memref<4x8xf32, #tpu.memory_space<vmem>>, vector<4x8xf32>
      tpu.vector_store %arg23[%c0_42, %c0_43], %53 {strides = array<i32>} : memref<4x8xf32, #tpu.memory_space<vmem>>, vector<4x8xf32>,
      %cst_44 = arith.constant 0.000000e+00 : f32
      %55 = vector.broadcast %cst_44 : f32 to vector<4x8xf32>
      %c0_45 = arith.constant 0 : index
      %c0_46 = arith.constant 0 : index
      %56 = vector.load %arg24[%c0_45, %c0_46] : memref<4x8xf32, #tpu.memory_space<vmem>>, vector<4x8xf32>
      tpu.vector_store %arg24[%c0_45, %c0_46], %55 {strides = array<i32>} : memref<4x8xf32, #tpu.memory_space<vmem>>, vector<4x8xf32>,
      %cst_47 = arith.constant 0.000000e+00 : f32
      %57 = vector.broadcast %cst_47 : f32 to vector<4x8x8xf32>
      %c0_48 = arith.constant 0 : index
      %c0_49 = arith.constant 0 : index
      %c0_50 = arith.constant 0 : index
      %58 = vector.load %arg25[%c0_48, %c0_49, %c0_50] : memref<4x8x8xf32, #tpu.memory_space<vmem>>, vector<4x8x8xf32>
      tpu.vector_store %arg25[%c0_48, %c0_49, %c0_50], %57 {strides = array<i32>} : memref<4x8x8xf32, #tpu.memory_space<vmem>>, vector<4x8x8xf32>,
    } else {
    }
    %6 = arith.index_cast %arg2 : i32 to index
    %c0 = arith.constant 0 : index
    %c0_3 = arith.constant 0 : index
    %c0_4 = arith.constant 0 : index
    %7 = vector.load %arg21[%6, %c0, %c0_3, %c0_4] : memref<1x4x8x16xf32, #tpu.memory_space<vmem>>, vector<1x4x8x16xf32>
    %8 = vector.shape_cast %7 : vector<1x4x8x16xf32> to vector<4x8x16xf32>
    %9 = vector.extract_strided_slice %8 {offsets = [0, 0, 0], sizes = [4, 8, 8], strides = [1, 1, 1]} : vector<4x8x16xf32> to vector<4x8x8xf32>
    %10 = vector.extract_strided_slice %8 {offsets = [0, 0, 8], sizes = [4, 8, 8], strides = [1, 1, 1]} : vector<4x8x16xf32> to vector<4x8x8xf32>
    %c0_5 = arith.constant 0 : index
    %c0_6 = arith.constant 0 : index
    %c0_7 = arith.constant 0 : index
    %11 = vector.load %arg22[%c0_5, %c0_6, %c0_7] : memref<4x8x8xf32, #tpu.memory_space<vmem>>, vector<4x8x8xf32>
    "tpu.trace_start"() <{level = 10 : i32, message = "hqd,hkd->hqk"}> : () -> ()
    %cst = arith.constant dense<0.000000e+00> : vector<4x8x8xf32>
    %12 = tpu.matmul %11, %9, %cst {dimension_numbers = #tpu.dot_dimension_numbers<[2], [2], [1], [1], [0, 0, 0, 1, 1, 1], [0], [0]>} : vector<4x8x8xf32>, vector<4x8x8xf32>, vector<4x8x8xf32> -> vector<4x8x8xf32>
    "tpu.trace_stop"() : () -> ()
    %c0_8 = arith.constant 0 : index
    %c0_9 = arith.constant 0 : index
    %c0_10 = arith.constant 0 : index
    %13 = vector.load %arg5[%c0_8, %c0_9, %c0_10] : memref<1x8x1xf32, #tpu.memory_space<vmem>>, vector<1x8x1xf32>
    %14 = vector.shape_cast %13 : vector<1x8x1xf32> to vector<8x1xf32>
    %15 = vector.shape_cast %14 : vector<8x1xf32> to vector<1x1x8xf32>
    %16 = vector.broadcast %15 : vector<1x1x8xf32> to vector<4x8x8xf32>
    %17 = arith.addf %12, %16 : vector<4x8x8xf32>
    %c0_11 = arith.constant 0 : index
    %c0_12 = arith.constant 0 : index
    %18 = vector.load %arg23[%c0_11, %c0_12] : memref<4x8xf32, #tpu.memory_space<vmem>>, vector<4x8xf32>
    %cst_13 = arith.constant dense<0xFF800000> : vector<4x8xf32>
    %19 = vector.multi_reduction <maximumf>, %17, %cst_13 [2] : vector<4x8x8xf32> to vector<4x8xf32>
    %20 = arith.maximumf %18, %19 : vector<4x8xf32>
    %21 = arith.subf %18, %20 : vector<4x8xf32>
    %22 = math.exp %21 : vector<4x8xf32>
    %23 = vector.shape_cast %20 : vector<4x8xf32> to vector<4x8x1xf32>
    %24 = vector.broadcast %23 : vector<4x8x1xf32> to vector<4x8x8xf32>
    %25 = arith.subf %17, %24 : vector<4x8x8xf32>
    %26 = math.exp %25 : vector<4x8x8xf32>
    %c0_14 = arith.constant 0 : index
    %c0_15 = arith.constant 0 : index
    %27 = vector.load %arg24[%c0_14, %c0_15] : memref<4x8xf32, #tpu.memory_space<vmem>>, vector<4x8xf32>
    %28 = arith.mulf %22, %27 : vector<4x8xf32>
    %cst_16 = arith.constant dense<0.000000e+00> : vector<4x8xf32>
    %29 = vector.multi_reduction <add>, %26, %cst_16 [2] : vector<4x8x8xf32> to vector<4x8xf32>
    %30 = arith.addf %28, %29 : vector<4x8xf32>
    %c0_17 = arith.constant 0 : index
    %c0_18 = arith.constant 0 : index
    %31 = vector.load %arg24[%c0_17, %c0_18] : memref<4x8xf32, #tpu.memory_space<vmem>>, vector<4x8xf32>
    tpu.vector_store %arg24[%c0_17, %c0_18], %30 {strides = array<i32>} : memref<4x8xf32, #tpu.memory_space<vmem>>, vector<4x8xf32>,
    "tpu.trace_start"() <{level = 10 : i32, message = "hqk,hkd->hqd"}> : () -> ()
    %cst_19 = arith.constant dense<0.000000e+00> : vector<4x8x8xf32>
    %32 = tpu.matmul %26, %10, %cst_19 {dimension_numbers = #tpu.dot_dimension_numbers<[2], [1], [1], [2], [0, 0, 0, 1, 1, 2], [0], [0]>} : vector<4x8x8xf32>, vector<4x8x8xf32>, vector<4x8x8xf32> -> vector<4x8x8xf32>
    "tpu.trace_stop"() : () -> ()
    %33 = vector.shape_cast %22 : vector<4x8xf32> to vector<4x8x1xf32>
    %c0_20 = arith.constant 0 : index
    %c0_21 = arith.constant 0 : index
    %c0_22 = arith.constant 0 : index
    %34 = vector.load %arg25[%c0_20, %c0_21, %c0_22] : memref<4x8x8xf32, #tpu.memory_space<vmem>>, vector<4x8x8xf32>
    %35 = vector.broadcast %33 : vector<4x8x1xf32> to vector<4x8x8xf32>
    %36 = arith.mulf %35, %34 : vector<4x8x8xf32>
    %37 = arith.addf %36, %32 : vector<4x8x8xf32>
    %c0_23 = arith.constant 0 : index
    %c0_24 = arith.constant 0 : index
    %c0_25 = arith.constant 0 : index
    %38 = vector.load %arg25[%c0_23, %c0_24, %c0_25] : memref<4x8x8xf32, #tpu.memory_space<vmem>>, vector<4x8x8xf32>
    tpu.vector_store %arg25[%c0_23, %c0_24, %c0_25], %37 {strides = array<i32>} : memref<4x8x8xf32, #tpu.memory_space<vmem>>, vector<4x8x8xf32>,
    %c0_26 = arith.constant 0 : index
    %c0_27 = arith.constant 0 : index
    %39 = vector.load %arg23[%c0_26, %c0_27] : memref<4x8xf32, #tpu.memory_space<vmem>>, vector<4x8xf32>
    tpu.vector_store %arg23[%c0_26, %c0_27], %20 {strides = array<i32>} : memref<4x8xf32, #tpu.memory_space<vmem>>, vector<4x8xf32>,
    %c0_i32_28 = arith.constant 0 : i32
    %40 = arith.cmpi eq, %arg2, %c0_i32_28 : i32
    %41 = arith.extui %40 : i1 to i32
    %c0_i32_29 = arith.constant 0 : i32
    %42 = arith.cmpi ne, %41, %c0_i32_29 : i32
    scf.if %42 {
      %c0_30 = arith.constant 0 : index
      %c0_31 = arith.constant 0 : index
      %43 = vector.load %arg24[%c0_30, %c0_31] : memref<4x8xf32, #tpu.memory_space<vmem>>, vector<4x8xf32>
      %44 = tpu.reciprocal %43 : vector<4x8xf32> -> vector<4x8xf32>
      %c0_32 = arith.constant 0 : index
      %c0_33 = arith.constant 0 : index
      %c0_34 = arith.constant 0 : index
      %45 = vector.load %arg25[%c0_32, %c0_33, %c0_34] : memref<4x8x8xf32, #tpu.memory_space<vmem>>, vector<4x8x8xf32>
      %46 = vector.shape_cast %44 : vector<4x8xf32> to vector<4x8x1xf32>
      %47 = vector.broadcast %46 : vector<4x8x1xf32> to vector<4x8x8xf32>
      %48 = arith.mulf %45, %47 : vector<4x8x8xf32>
      %49 = tpu.transpose %48, [1, 0, 2] : vector<4x8x8xf32> -> vector<8x4x8xf32>
      %50 = vector.shape_cast %49 : vector<8x4x8xf32> to vector<8x32xf32>
      %c0_35 = arith.constant 0 : index
      %c0_36 = arith.constant 0 : index
      %51 = vector.load %arg10[%c0_35, %c0_36] : memref<32x32xf32, #tpu.memory_space<vmem>>, vector<32x32xf32>
      %cst_37 = arith.constant dense<0.000000e+00> : vector<8x32xf32>
      %52 = tpu.matmul %50, %51, %cst_37 {dimension_numbers = #tpu.dot_dimension_numbers<[1], [0], [0], [1], [0, 0, 1, 1], [], []>} : vector<8x32xf32>, vector<32x32xf32>, vector<8x32xf32> -> vector<8x32xf32>
      %c0_38 = arith.constant 0 : index
      %c0_39 = arith.constant 0 : index
      %53 = vector.load %arg11[%c0_38, %c0_39] : memref<1x32xf32, #tpu.memory_space<vmem>>, vector<1x32xf32>
      %54 = vector.broadcast %53 : vector<1x32xf32> to vector<8x32xf32>
      %55 = arith.addf %52, %54 : vector<8x32xf32>
      %c0_40 = arith.constant 0 : index
      %c0_41 = arith.constant 0 : index
      %c0_42 = arith.constant 0 : index
      %56 = vector.load %arg3[%c0_40, %c0_41, %c0_42] : memref<1x8x32xf32, #tpu.memory_space<vmem>>, vector<1x8x32xf32>
      %57 = vector.shape_cast %56 : vector<1x8x32xf32> to vector<8x32xf32>
      %58 = arith.addf %55, %57 : vector<8x32xf32>
      %c0_43 = arith.constant 0 : index
      %c0_44 = arith.constant 0 : index
      %59 = vector.load %arg12[%c0_43, %c0_44] : memref<1x32xf32, #tpu.memory_space<vmem>>, vector<1x32xf32>
      %c0_45 = arith.constant 0 : index
      %c0_46 = arith.constant 0 : index
      %60 = vector.load %arg13[%c0_45, %c0_46] : memref<1x32xf32, #tpu.memory_space<vmem>>, vector<1x32xf32>
      %cst_47 = arith.constant dense<0.000000e+00> : vector<8xf32>
      %61 = vector.multi_reduction <add>, %58, %cst_47 [1] : vector<8x32xf32> to vector<8xf32>
      %62 = vector.shape_cast %61 : vector<8xf32> to vector<8x1xf32>
      %cst_48 = arith.constant 3.200000e+01 : f32
      %63 = vector.broadcast %cst_48 : f32 to vector<8x1xf32>
      %64 = arith.divf %62, %63 : vector<8x1xf32>
      %65 = vector.broadcast %64 : vector<8x1xf32> to vector<8x32xf32>
      %66 = arith.subf %58, %65 : vector<8x32xf32>
      %67 = arith.mulf %66, %66 : vector<8x32xf32>
      %cst_49 = arith.constant dense<0.000000e+00> : vector<8xf32>
      %68 = vector.multi_reduction <add>, %67, %cst_49 [1] : vector<8x32xf32> to vector<8xf32>
      %69 = vector.shape_cast %68 : vector<8xf32> to vector<8x1xf32>
      %cst_50 = arith.constant 3.200000e+01 : f32
      %70 = vector.broadcast %cst_50 : f32 to vector<8x1xf32>
      %71 = arith.divf %69, %70 : vector<8x1xf32>
      %cst_51 = arith.constant 9.99999974E-6 : f32
      %72 = vector.broadcast %cst_51 : f32 to vector<8x1xf32>
      %73 = arith.addf %71, %72 : vector<8x1xf32>
      %74 = math.rsqrt %73 : vector<8x1xf32>
      %75 = vector.broadcast %74 : vector<8x1xf32> to vector<8x32xf32>
      %76 = arith.mulf %66, %75 : vector<8x32xf32>
      %77 = vector.broadcast %59 : vector<1x32xf32> to vector<8x32xf32>
      %78 = arith.mulf %76, %77 : vector<8x32xf32>
      %79 = vector.broadcast %60 : vector<1x32xf32> to vector<8x32xf32>
      %80 = arith.addf %78, %79 : vector<8x32xf32>
      %c0_52 = arith.constant 0 : index
      %c0_53 = arith.constant 0 : index
      %81 = vector.load %arg14[%c0_52, %c0_53] : memref<32x64xf32, #tpu.memory_space<vmem>>, vector<32x64xf32>
      %cst_54 = arith.constant dense<0.000000e+00> : vector<8x64xf32>
      %82 = tpu.matmul %80, %81, %cst_54 {dimension_numbers = #tpu.dot_dimension_numbers<[1], [0], [0], [1], [0, 0, 1, 1], [], []>} : vector<8x32xf32>, vector<32x64xf32>, vector<8x64xf32> -> vector<8x64xf32>
      %c0_55 = arith.constant 0 : index
      %c0_56 = arith.constant 0 : index
      %83 = vector.load %arg15[%c0_55, %c0_56] : memref<1x64xf32, #tpu.memory_space<vmem>>, vector<1x64xf32>
      %84 = vector.broadcast %83 : vector<1x64xf32> to vector<8x64xf32>
      %85 = arith.addf %82, %84 : vector<8x64xf32>
      %cst_57 = arith.constant 0.000000e+00 : f32
      %86 = vector.broadcast %cst_57 : f32 to vector<8x64xf32>
      %87 = arith.maximumf %85, %86 : vector<8x64xf32>
      %c0_58 = arith.constant 0 : index
      %c0_59 = arith.constant 0 : index
      %88 = vector.load %arg16[%c0_58, %c0_59] : memref<64x32xf32, #tpu.memory_space<vmem>>, vector<64x32xf32>
      %cst_60 = arith.constant dense<0.000000e+00> : vector<8x32xf32>
      %89 = tpu.matmul %87, %88, %cst_60 {dimension_numbers = #tpu.dot_dimension_numbers<[1], [0], [0], [1], [0, 0, 1, 1], [], []>} : vector<8x64xf32>, vector<64x32xf32>, vector<8x32xf32> -> vector<8x32xf32>
      %c0_61 = arith.constant 0 : index
      %c0_62 = arith.constant 0 : index
      %90 = vector.load %arg17[%c0_61, %c0_62] : memref<1x32xf32, #tpu.memory_space<vmem>>, vector<1x32xf32>
      %91 = vector.broadcast %90 : vector<1x32xf32> to vector<8x32xf32>
      %92 = arith.addf %89, %91 : vector<8x32xf32>
      %93 = arith.addf %92, %80 : vector<8x32xf32>
      %c0_63 = arith.constant 0 : index
      %c0_64 = arith.constant 0 : index
      %94 = vector.load %arg18[%c0_63, %c0_64] : memref<1x32xf32, #tpu.memory_space<vmem>>, vector<1x32xf32>
      %c0_65 = arith.constant 0 : index
      %c0_66 = arith.constant 0 : index
      %95 = vector.load %arg19[%c0_65, %c0_66] : memref<1x32xf32, #tpu.memory_space<vmem>>, vector<1x32xf32>
      %cst_67 = arith.constant dense<0.000000e+00> : vector<8xf32>
      %96 = vector.multi_reduction <add>, %93, %cst_67 [1] : vector<8x32xf32> to vector<8xf32>
      %97 = vector.shape_cast %96 : vector<8xf32> to vector<8x1xf32>
      %cst_68 = arith.constant 3.200000e+01 : f32
      %98 = vector.broadcast %cst_68 : f32 to vector<8x1xf32>
      %99 = arith.divf %97, %98 : vector<8x1xf32>
      %100 = vector.broadcast %99 : vector<8x1xf32> to vector<8x32xf32>
      %101 = arith.subf %93, %100 : vector<8x32xf32>
      %102 = arith.mulf %101, %101 : vector<8x32xf32>
      %cst_69 = arith.constant dense<0.000000e+00> : vector<8xf32>
      %103 = vector.multi_reduction <add>, %102, %cst_69 [1] : vector<8x32xf32> to vector<8xf32>
      %104 = vector.shape_cast %103 : vector<8xf32> to vector<8x1xf32>
      %cst_70 = arith.constant 3.200000e+01 : f32
      %105 = vector.broadcast %cst_70 : f32 to vector<8x1xf32>
      %106 = arith.divf %104, %105 : vector<8x1xf32>
      %cst_71 = arith.constant 9.99999974E-6 : f32
      %107 = vector.broadcast %cst_71 : f32 to vector<8x1xf32>
      %108 = arith.addf %106, %107 : vector<8x1xf32>
      %109 = math.rsqrt %108 : vector<8x1xf32>
      %110 = vector.broadcast %109 : vector<8x1xf32> to vector<8x32xf32>
      %111 = arith.mulf %101, %110 : vector<8x32xf32>
      %112 = vector.broadcast %94 : vector<1x32xf32> to vector<8x32xf32>
      %113 = arith.mulf %111, %112 : vector<8x32xf32>
      %114 = vector.broadcast %95 : vector<1x32xf32> to vector<8x32xf32>
      %115 = arith.addf %113, %114 : vector<8x32xf32>
      %c0_72 = arith.constant 0 : index
      %c0_73 = arith.constant 0 : index
      %c0_74 = arith.constant 0 : index
      %116 = vector.load %arg20[%c0_72, %c0_73, %c0_74] : memref<1x8x32xf32, #tpu.memory_space<vmem>>, vector<1x8x32xf32>
      %117 = vector.shape_cast %116 : vector<1x8x32xf32> to vector<8x32xf32>
      %118 = vector.shape_cast %115 : vector<8x32xf32> to vector<1x8x32xf32>
      tpu.vector_store %arg20[%c0_72, %c0_73, %c0_74], %118 {strides = array<i32>} : memref<1x8x32xf32, #tpu.memory_space<vmem>>, vector<1x8x32xf32>,
    } else {
    }
    return
  }
  func.func @transform_0(%arg0: i32, %arg1: i32, %arg2: i32) -> (i32, i32, i32) {
    %c0_i32 = arith.constant 0 : i32
    %c0_i32_0 = arith.constant 0 : i32
    return %arg0, %arg1, %c0_i32 : i32, i32, i32
  }
  func.func @transform_1(%arg0: i32, %arg1: i32, %arg2: i32) -> (i32, i32, i32) {
    %c0_i32 = arith.constant 0 : i32
    %0 = arith.cmpi eq, %arg1, %c0_i32 : i32
    %c0_i32_0 = arith.constant 0 : i32
    %1 = arith.select %0, %arg2, %c0_i32_0 : i32
    %c0_i32_1 = arith.constant 0 : i32
    %c0_i32_2 = arith.constant 0 : i32
    return %arg0, %1, %c0_i32_1 : i32, i32, i32
  }
  func.func @transform_2(%arg0: i32, %arg1: i32, %arg2: i32) -> (i32, i32, i32) {
    %c0_i32 = arith.constant 0 : i32
    %c0_i32_0 = arith.constant 0 : i32
    return %arg0, %arg2, %c0_i32 : i32, i32, i32
  }
  func.func @transform_3(%arg0: i32, %arg1: i32, %arg2: i32) -> (i32, i32) {
    %c0_i32 = arith.constant 0 : i32
    %c0_i32_0 = arith.constant 0 : i32
    %c0_i32_1 = arith.constant 0 : i32
    return %c0_i32, %c0_i32_0 : i32, i32
  }
  func.func @transform_4(%arg0: i32, %arg1: i32, %arg2: i32) -> (i32, i32) {
    %c0_i32 = arith.constant 0 : i32
    %c0_i32_0 = arith.constant 0 : i32
    %c0_i32_1 = arith.constant 0 : i32
    return %c0_i32, %c0_i32_0 : i32, i32
  }
  func.func @transform_5(%arg0: i32, %arg1: i32, %arg2: i32) -> (i32, i32) {
    %c0_i32 = arith.constant 0 : i32
    %c0_i32_0 = arith.constant 0 : i32
    %c0_i32_1 = arith.constant 0 : i32
    return %c0_i32, %c0_i32_0 : i32, i32
  }
  func.func @transform_6(%arg0: i32, %arg1: i32, %arg2: i32) -> (i32, i32) {
    %c0_i32 = arith.constant 0 : i32
    %c0_i32_0 = arith.constant 0 : i32
    %c0_i32_1 = arith.constant 0 : i32
    return %c0_i32, %c0_i32_0 : i32, i32
  }
  func.func @transform_7(%arg0: i32, %arg1: i32, %arg2: i32) -> (i32, i32) {
    %c0_i32 = arith.constant 0 : i32
    %c0_i32_0 = arith.constant 0 : i32
    %c0_i32_1 = arith.constant 0 : i32
    return %c0_i32, %c0_i32_0 : i32, i32
  }
  func.func @transform_8(%arg0: i32, %arg1: i32, %arg2: i32) -> (i32, i32) {
    %c0_i32 = arith.constant 0 : i32
    %c0_i32_0 = arith.constant 0 : i32
    %c0_i32_1 = arith.constant 0 : i32
    return %c0_i32, %c0_i32_0 : i32, i32
  }
  func.func @transform_9(%arg0: i32, %arg1: i32, %arg2: i32) -> (i32, i32) {
    %c0_i32 = arith.constant 0 : i32
    %c0_i32_0 = arith.constant 0 : i32
    %c0_i32_1 = arith.constant 0 : i32
    return %c0_i32, %c0_i32_0 : i32, i32
  }
  func.func @transform_10(%arg0: i32, %arg1: i32, %arg2: i32) -> (i32, i32) {
    %c0_i32 = arith.constant 0 : i32
    %c0_i32_0 = arith.constant 0 : i32
    %c0_i32_1 = arith.constant 0 : i32
    return %c0_i32, %c0_i32_0 : i32, i32
  }
  func.func @transform_11(%arg0: i32, %arg1: i32, %arg2: i32) -> (i32, i32) {
    %c0_i32 = arith.constant 0 : i32
    %c0_i32_0 = arith.constant 0 : i32
    %c0_i32_1 = arith.constant 0 : i32
    return %c0_i32, %c0_i32_0 : i32, i32
  }
  func.func @transform_12(%arg0: i32, %arg1: i32, %arg2: i32) -> (i32, i32) {
    %c0_i32 = arith.constant 0 : i32
    %c0_i32_0 = arith.constant 0 : i32
    %c0_i32_1 = arith.constant 0 : i32
    return %c0_i32, %c0_i32_0 : i32, i32
  }
  func.func @transform_13(%arg0: i32, %arg1: i32, %arg2: i32) -> (i32, i32) {
    %c0_i32 = arith.constant 0 : i32
    %c0_i32_0 = arith.constant 0 : i32
    %c0_i32_1 = arith.constant 0 : i32
    return %c0_i32, %c0_i32_0 : i32, i32
  }
  func.func @transform_14(%arg0: i32, %arg1: i32, %arg2: i32) -> (i32, i32) {
    %c0_i32 = arith.constant 0 : i32
    %c0_i32_0 = arith.constant 0 : i32
    %c0_i32_1 = arith.constant 0 : i32
    return %c0_i32, %c0_i32_0 : i32, i32
  }
  func.func @transform_15(%arg0: i32, %arg1: i32, %arg2: i32) -> (i32, i32) {
    %c0_i32 = arith.constant 0 : i32
    %c0_i32_0 = arith.constant 0 : i32
    %c0_i32_1 = arith.constant 0 : i32
    return %c0_i32, %c0_i32_0 : i32, i32
  }
  func.func @transform_16(%arg0: i32, %arg1: i32, %arg2: i32) -> (i32, i32) {
    %c0_i32 = arith.constant 0 : i32
    %c0_i32_0 = arith.constant 0 : i32
    %c0_i32_1 = arith.constant 0 : i32
    return %c0_i32, %c0_i32_0 : i32, i32
  }
  func.func @transform_17(%arg0: i32, %arg1: i32, %arg2: i32) -> (i32, i32, i32) {
    %c0_i32 = arith.constant 0 : i32
    %c0_i32_0 = arith.constant 0 : i32
    return %arg0, %arg1, %c0_i32 : i32, i32, i32
  }
}

module attributes {stable_mosaic.version = 11 : i64} {
  func.func @_encoder_layer_kernel(%arg0: i32, %arg1: i32, %arg2: i32, %arg3: memref<1x8x32xf32, #tpu.memory_space<vmem>>, %arg4: memref<1x8x32xf32, #tpu.memory_space<vmem>>, %arg5: memref<1x8x1xf32, #tpu.memory_space<vmem>>, %arg6: memref<32x32xf32, #tpu.memory_space<vmem>>, %arg7: memref<1x32xf32, #tpu.memory_space<vmem>>, %arg8: memref<32x64xf32, #tpu.memory_space<vmem>>, %arg9: memref<1x64xf32, #tpu.memory_space<vmem>>, %arg10: memref<32x32xf32, #tpu.memory_space<vmem>>, %arg11: memref<1x32xf32, #tpu.memory_space<vmem>>, %arg12: memref<1x32xf32, #tpu.memory_space<vmem>>, %arg13: memref<1x32xf32, #tpu.memory_space<vmem>>, %arg14: memref<32x64xf32, #tpu.memory_space<vmem>>, %arg15: memref<1x64xf32, #tpu.memory_space<vmem>>, %arg16: memref<64x32xf32, #tpu.memory_space<vmem>>, %arg17: memref<1x32xf32, #tpu.memory_space<vmem>>, %arg18: memref<1x32xf32, #tpu.memory_space<vmem>>, %arg19: memref<1x32xf32, #tpu.memory_space<vmem>>, %arg20: memref<1x8x32xf32, #tpu.memory_space<vmem>>, %arg21: memref<1x4x8x16xf32, #tpu.memory_space<vmem>>, %arg22: memref<4x8x8xf32, #tpu.memory_space<vmem>>, %arg23: memref<4x8xf32, #tpu.memory_space<vmem>>, %arg24: memref<4x8xf32, #tpu.memory_space<vmem>>, %arg25: memref<4x8x8xf32, #tpu.memory_space<vmem>>) attributes {dimension_semantics = [#tpu.dimension_semantics<parallel>, #tpu.dimension_semantics<arbitrary>, #tpu.dimension_semantics<arbitrary>], iteration_bounds = array<i64: 2, 1, 1>, scalar_prefetch = 0 : i64, scratch_operands = 5 : i64, tpu.core_type = #tpu.core_type<tc>, window_params = [{transform_indices = @transform_0, window_bounds = array<i64: 1, 8, 32>}, {transform_indices = @transform_1, window_bounds = array<i64: 1, 8, 32>}, {transform_indices = @transform_2, window_bounds = array<i64: 1, 8, 1>}, {pipeline_mode = #tpu.pipeline_mode<synchronous>, transform_indices = @transform_3, window_bounds = array<i64: 32, 32>}, {pipeline_mode = #tpu.pipeline_mode<synchronous>, transform_indices = @transform_4, window_bounds = array<i64: 1, 32>}, {pipeline_mode = #tpu.pipeline_mode<synchronous>, transform_indices = @transform_5, window_bounds = array<i64: 32, 64>}, {pipeline_mode = #tpu.pipeline_mode<synchronous>, transform_indices = @transform_6, window_bounds = array<i64: 1, 64>}, {pipeline_mode = #tpu.pipeline_mode<synchronous>, transform_indices = @transform_7, window_bounds = array<i64: 32, 32>}, {pipeline_mode = #tpu.pipeline_mode<synchronous>, transform_indices = @transform_8, window_bounds = array<i64: 1, 32>}, {pipeline_mode = #tpu.pipeline_mode<synchronous>, transform_indices = @transform_9, window_bounds = array<i64: 1, 32>}, {pipeline_mode = #tpu.pipeline_mode<synchronous>, transform_indices = @transform_10, window_bounds = array<i64: 1, 32>}, {pipeline_mode = #tpu.pipeline_mode<synchronous>, transform_indices = @transform_11, window_bounds = array<i64: 32, 64>}, {pipeline_mode = #tpu.pipeline_mode<synchronous>, transform_indices = @transform_12, window_bounds = array<i64: 1, 64>}, {pipeline_mode = #tpu.pipeline_mode<synchronous>, transform_indices = @transform_13, window_bounds = array<i64: 64, 32>}, {pipeline_mode = #tpu.pipeline_mode<synchronous>, transform_indices = @transform_14, window_bounds = array<i64: 1, 32>}, {pipeline_mode = #tpu.pipeline_mode<synchronous>, transform_indices = @transform_15, window_bounds = array<i64: 1, 32>}, {pipeline_mode = #tpu.pipeline_mode<synchronous>, transform_indices = @transform_16, window_bounds = array<i64: 1, 32>}, {transform_indices = @transform_17, window_bounds = array<i64: 1, 8, 32>}]} {
    %c0_i32 = arith.constant 0 : i32
    %0 = arith.cmpi eq, %arg1, %c0_i32 : i32
    %1 = arith.extui %0 : i1 to i32
    %c0_i32_0 = arith.constant 0 : i32
    %2 = arith.cmpi ne, %1, %c0_i32_0 : i32
    scf.if %2 {
      %c0_30 = arith.constant 0 : index
      %c0_31 = arith.constant 0 : index
      %c0_32 = arith.constant 0 : index
      %43 = vector.load %arg4[%c0_30, %c0_31, %c0_32] : memref<1x8x32xf32, #tpu.memory_space<vmem>>, vector<1x8x32xf32>
      %44 = vector.shape_cast %43 : vector<1x8x32xf32> to vector<8x32xf32>
      %c0_33 = arith.constant 0 : index
      %c0_34 = arith.constant 0 : index
      %45 = vector.load %arg8[%c0_33, %c0_34] : memref<32x64xf32, #tpu.memory_space<vmem>>, vector<32x64xf32>
      %cst_35 = arith.constant dense<0.000000e+00> : vector<8x64xf32>
      %46 = tpu.matmul %44, %45, %cst_35 {dimension_numbers = #tpu.dot_dimension_numbers<[1], [0], [0], [1], [0, 0, 1, 1], [], []>} : vector<8x32xf32>, vector<32x64xf32>, vector<8x64xf32> -> vector<8x64xf32>
      %c0_36 = arith.constant 0 : index
      %c0_37 = arith.constant 0 : index
      %47 = vector.load %arg9[%c0_36, %c0_37] : memref<1x64xf32, #tpu.memory_space<vmem>>, vector<1x64xf32>
      %48 = vector.broadcast %47 : vector<1x64xf32> to vector<8x64xf32>
      %49 = arith.addf %46, %48 : vector<8x64xf32>
      %50 = vector.shape_cast %49 : vector<8x64xf32> to vector<8x4x16xf32>
      %51 = tpu.transpose %50, [1, 0, 2] : vector<8x4x16xf32> -> vector<4x8x16xf32>
      %52 = arith.index_cast %arg2 : i32 to index
      %c0_38 = arith.constant 0 : index
      %c0_39 = arith.constant 0 : index
      %c0_40 = arith.constant 0 : index
      %53 = vector.load %arg21[%52, %c0_38, %c0_39, %c0_40] : memref<1x4x8x16xf32, #tpu.memory_space<vmem>>, vector<1x4x8x16xf32>
      %54 = vector.shape_cast %53 : vector<1x4x8x16xf32> to vector<4x8x16xf32>
      %55 = vector.shape_cast %51 : vector<4x8x16xf32> to vector<1x4x8x16xf32>
      tpu.vector_store %arg21[%52, %c0_38, %c0_39, %c0_40], %55 {strides = array<i32>} : memref<1x4x8x16xf32, #tpu.memory_space<vmem>>, vector<1x4x8x16xf32>,
    } else {
    }
    %c0_i32_1 = arith.constant 0 : i32
    %3 = arith.cmpi eq, %arg2, %c0_i32_1 : i32
    %4 = arith.extui %3 : i1 to i32
    %c0_i32_2 = arith.constant 0 : i32
    %5 = arith.cmpi ne, %4, %c0_i32_2 : i32
    scf.if %5 {
      %c0_30 = arith.constant 0 : index
      %c0_31 = arith.constant 0 : index
      %c0_32 = arith.constant 0 : index
      %43 = vector.load %arg3[%c0_30, %c0_31, %c0_32] : memref<1x8x32xf32, #tpu.memory_space<vmem>>, vector<1x8x32xf32>
      %44 = vector.shape_cast %43 : vector<1x8x32xf32> to vector<8x32xf32>
      %c0_33 = arith.constant 0 : index
      %c0_34 = arith.constant 0 : index
      %45 = vector.load %arg6[%c0_33, %c0_34] : memref<32x32xf32, #tpu.memory_space<vmem>>, vector<32x32xf32>
      %cst_35 = arith.constant dense<0.000000e+00> : vector<8x32xf32>
      %46 = tpu.matmul %44, %45, %cst_35 {dimension_numbers = #tpu.dot_dimension_numbers<[1], [0], [0], [1], [0, 0, 1, 1], [], []>} : vector<8x32xf32>, vector<32x32xf32>, vector<8x32xf32> -> vector<8x32xf32>
      %c0_36 = arith.constant 0 : index
      %c0_37 = arith.constant 0 : index
      %47 = vector.load %arg7[%c0_36, %c0_37] : memref<1x32xf32, #tpu.memory_space<vmem>>, vector<1x32xf32>
      %48 = vector.broadcast %47 : vector<1x32xf32> to vector<8x32xf32>
      %49 = arith.addf %46, %48 : vector<8x32xf32>
      %50 = vector.shape_cast %49 : vector<8x32xf32> to vector<8x4x8xf32>
      %51 = tpu.transpose %50, [1, 0, 2] : vector<8x4x8xf32> -> vector<4x8x8xf32>
      %c0_38 = arith.constant 0 : index
      %c0_39 = arith.constant 0 : index
      %c0_40 = arith.constant 0 : index
      %52 = vector.load %arg22[%c0_38, %c0_39, %c0_40] : memref<4x8x8xf32, #tpu.memory_space<vmem>>, vector<4x8x8xf32>
      tpu.vector_store %arg22[%c0_38, %c0_39, %c0_40], %51 {strides = array<i32>} : memref<4x8x8xf32, #tpu.memory_space<vmem>>, vector<4x8x8xf32>,
      %cst_41 = arith.constant -1.000000e+30 : f32
      %53 = vector.broadcast %cst_41 : f32 to vector<4x8xf32>
      %c0_42 = arith.constant 0 : index
      %c0_43 = arith.constant 0 : index
      %54 = vector.load %arg23[%c0_42, %c0_43] : memref<4x8xf32, #tpu.memory_space<vmem>>, vector<4x8xf32>
      tpu.vector_store %arg23[%c0_42, %c0_43], %53 {strides = array<i32>} : memref<4x8xf32, #tpu.memory_space<vmem>>, vector<4x8xf32>,
      %cst_44 = arith.constant 0.000000e+00 : f32
      %55 = vector.broadcast %cst_44 : f32 to vector<4x8xf32>
      %c0_45 = arith.constant 0 : index
      %c0_46 = arith.constant 0 : index
      %56 = vector.load %arg24[%c0_45, %c0_46] : memref<4x8xf32, #tpu.memory_space<vmem>>, vector<4x8xf32>
      tpu.vector_store %arg24[%c0_45, %c0_46], %55 {strides = array<i32>} : memref<4x8xf32, #tpu.memory_space<vmem>>, vector<4x8xf32>,
      %cst_47 = arith.constant 0.000000e+00 : f32
      %57 = vector.broadcast %cst_47 : f32 to vector<4x8x8xf32>
      %c0_48 = arith.constant 0 : index
      %c0_49 = arith.constant 0 : index
      %c0_50 = arith.constant 0 : index
      %58 = vector.load %arg25[%c0_48, %c0_49, %c0_50] : memref<4x8x8xf32, #tpu.memory_space<vmem>>, vector<4x8x8xf32>
      tpu.vector_store %arg25[%c0_48, %c0_49, %c0_50], %57 {strides = array<i32>} : memref<4x8x8xf32, #tpu.memory_space<vmem>>, vector<4x8x8xf32>,
    } else {
    }
    %6 = arith.index_cast %arg2 : i32 to index
    %c0 = arith.constant 0 : index
    %c0_3 = arith.constant 0 : index
    %c0_4 = arith.constant 0 : index
    %7 = vector.load %arg21[%6, %c0, %c0_3, %c0_4] : memref<1x4x8x16xf32, #tpu.memory_space<vmem>>, vector<1x4x8x16xf32>
    %8 = vector.shape_cast %7 : vector<1x4x8x16xf32> to vector<4x8x16xf32>
    %9 = vector.extract_strided_slice %8 {offsets = [0, 0, 0], sizes = [4, 8, 8], strides = [1, 1, 1]} : vector<4x8x16xf32> to vector<4x8x8xf32>
    %10 = vector.extract_strided_slice %8 {offsets = [0, 0, 8], sizes = [4, 8, 8], strides = [1, 1, 1]} : vector<4x8x16xf32> to vector<4x8x8xf32>
    %c0_5 = arith.constant 0 : index
    %c0_6 = arith.constant 0 : index
    %c0_7 = arith.constant 0 : index
    %11 = vector.load %arg22[%c0_5, %c0_6, %c0_7] : memref<4x8x8xf32, #tpu.memory_space<vmem>>, vector<4x8x8xf32>
    "tpu.trace_start"() <{level = 10 : i32, message = "hqd,hkd->hqk"}> : () -> ()
    %cst = arith.constant dense<0.000000e+00> : vector<4x8x8xf32>
    %12 = tpu.matmul %11, %9, %cst {dimension_numbers = #tpu.dot_dimension_numbers<[2], [2], [1], [1], [0, 0, 0, 1, 1, 1], [0], [0]>} : vector<4x8x8xf32>, vector<4x8x8xf32>, vector<4x8x8xf32> -> vector<4x8x8xf32>
    "tpu.trace_stop"() : () -> ()
    %c0_8 = arith.constant 0 : index
    %c0_9 = arith.constant 0 : index
    %c0_10 = arith.constant 0 : index
    %13 = vector.load %arg5[%c0_8, %c0_9, %c0_10] : memref<1x8x1xf32, #tpu.memory_space<vmem>>, vector<1x8x1xf32>
    %14 = vector.shape_cast %13 : vector<1x8x1xf32> to vector<8x1xf32>
    %15 = vector.shape_cast %14 : vector<8x1xf32> to vector<1x1x8xf32>
    %16 = vector.broadcast %15 : vector<1x1x8xf32> to vector<4x8x8xf32>
    %17 = arith.addf %12, %16 : vector<4x8x8xf32>
    %c0_11 = arith.constant 0 : index
    %c0_12 = arith.constant 0 : index
    %18 = vector.load %arg23[%c0_11, %c0_12] : memref<4x8xf32, #tpu.memory_space<vmem>>, vector<4x8xf32>
    %cst_13 = arith.constant dense<0xFF800000> : vector<4x8xf32>
    %19 = vector.multi_reduction <maximumf>, %17, %cst_13 [2] : vector<4x8x8xf32> to vector<4x8xf32>
    %20 = arith.maximumf %18, %19 : vector<4x8xf32>
    %21 = arith.subf %18, %20 : vector<4x8xf32>
    %22 = math.exp %21 : vector<4x8xf32>
    %23 = vector.shape_cast %20 : vector<4x8xf32> to vector<4x8x1xf32>
    %24 = vector.broadcast %23 : vector<4x8x1xf32> to vector<4x8x8xf32>
    %25 = arith.subf %17, %24 : vector<4x8x8xf32>
    %26 = math.exp %25 : vector<4x8x8xf32>
    %c0_14 = arith.constant 0 : index
    %c0_15 = arith.constant 0 : index
    %27 = vector.load %arg24[%c0_14, %c0_15] : memref<4x8xf32, #tpu.memory_space<vmem>>, vector<4x8xf32>
    %28 = arith.mulf %22, %27 : vector<4x8xf32>
    %cst_16 = arith.constant dense<0.000000e+00> : vector<4x8xf32>
    %29 = vector.multi_reduction <add>, %26, %cst_16 [2] : vector<4x8x8xf32> to vector<4x8xf32>
    %30 = arith.addf %28, %29 : vector<4x8xf32>
    %c0_17 = arith.constant 0 : index
    %c0_18 = arith.constant 0 : index
    %31 = vector.load %arg24[%c0_17, %c0_18] : memref<4x8xf32, #tpu.memory_space<vmem>>, vector<4x8xf32>
    tpu.vector_store %arg24[%c0_17, %c0_18], %30 {strides = array<i32>} : memref<4x8xf32, #tpu.memory_space<vmem>>, vector<4x8xf32>,
    "tpu.trace_start"() <{level = 10 : i32, message = "hqk,hkd->hqd"}> : () -> ()
    %cst_19 = arith.constant dense<0.000000e+00> : vector<4x8x8xf32>
    %32 = tpu.matmul %26, %10, %cst_19 {dimension_numbers = #tpu.dot_dimension_numbers<[2], [1], [1], [2], [0, 0, 0, 1, 1, 2], [0], [0]>} : vector<4x8x8xf32>, vector<4x8x8xf32>, vector<4x8x8xf32> -> vector<4x8x8xf32>
    "tpu.trace_stop"() : () -> ()
    %33 = vector.shape_cast %22 : vector<4x8xf32> to vector<4x8x1xf32>
    %c0_20 = arith.constant 0 : index
    %c0_21 = arith.constant 0 : index
    %c0_22 = arith.constant 0 : index
    %34 = vector.load %arg25[%c0_20, %c0_21, %c0_22] : memref<4x8x8xf32, #tpu.memory_space<vmem>>, vector<4x8x8xf32>
    %35 = vector.broadcast %33 : vector<4x8x1xf32> to vector<4x8x8xf32>
    %36 = arith.mulf %35, %34 : vector<4x8x8xf32>
    %37 = arith.addf %36, %32 : vector<4x8x8xf32>
    %c0_23 = arith.constant 0 : index
    %c0_24 = arith.constant 0 : index
    %c0_25 = arith.constant 0 : index
    %38 = vector.load %arg25[%c0_23, %c0_24, %c0_25] : memref<4x8x8xf32, #tpu.memory_space<vmem>>, vector<4x8x8xf32>
    tpu.vector_store %arg25[%c0_23, %c0_24, %c0_25], %37 {strides = array<i32>} : memref<4x8x8xf32, #tpu.memory_space<vmem>>, vector<4x8x8xf32>,
    %c0_26 = arith.constant 0 : index
    %c0_27 = arith.constant 0 : index
    %39 = vector.load %arg23[%c0_26, %c0_27] : memref<4x8xf32, #tpu.memory_space<vmem>>, vector<4x8xf32>
    tpu.vector_store %arg23[%c0_26, %c0_27], %20 {strides = array<i32>} : memref<4x8xf32, #tpu.memory_space<vmem>>, vector<4x8xf32>,
    %c0_i32_28 = arith.constant 0 : i32
    %40 = arith.cmpi eq, %arg2, %c0_i32_28 : i32
    %41 = arith.extui %40 : i1 to i32
    %c0_i32_29 = arith.constant 0 : i32
    %42 = arith.cmpi ne, %41, %c0_i32_29 : i32
    scf.if %42 {
      %c0_30 = arith.constant 0 : index
      %c0_31 = arith.constant 0 : index
      %43 = vector.load %arg24[%c0_30, %c0_31] : memref<4x8xf32, #tpu.memory_space<vmem>>, vector<4x8xf32>
      %44 = tpu.reciprocal %43 : vector<4x8xf32> -> vector<4x8xf32>
      %c0_32 = arith.constant 0 : index
      %c0_33 = arith.constant 0 : index
      %c0_34 = arith.constant 0 : index
      %45 = vector.load %arg25[%c0_32, %c0_33, %c0_34] : memref<4x8x8xf32, #tpu.memory_space<vmem>>, vector<4x8x8xf32>
      %46 = vector.shape_cast %44 : vector<4x8xf32> to vector<4x8x1xf32>
      %47 = vector.broadcast %46 : vector<4x8x1xf32> to vector<4x8x8xf32>
      %48 = arith.mulf %45, %47 : vector<4x8x8xf32>
      %49 = tpu.transpose %48, [1, 0, 2] : vector<4x8x8xf32> -> vector<8x4x8xf32>
      %50 = vector.shape_cast %49 : vector<8x4x8xf32> to vector<8x32xf32>
      %c0_35 = arith.constant 0 : index
      %c0_36 = arith.constant 0 : index
      %51 = vector.load %arg10[%c0_35, %c0_36] : memref<32x32xf32, #tpu.memory_space<vmem>>, vector<32x32xf32>
      %cst_37 = arith.constant dense<0.000000e+00> : vector<8x32xf32>
      %52 = tpu.matmul %50, %51, %cst_37 {dimension_numbers = #tpu.dot_dimension_numbers<[1], [0], [0], [1], [0, 0, 1, 1], [], []>} : vector<8x32xf32>, vector<32x32xf32>, vector<8x32xf32> -> vector<8x32xf32>
      %c0_38 = arith.constant 0 : index
      %c0_39 = arith.constant 0 : index
      %53 = vector.load %arg11[%c0_38, %c0_39] : memref<1x32xf32, #tpu.memory_space<vmem>>, vector<1x32xf32>
      %54 = vector.broadcast %53 : vector<1x32xf32> to vector<8x32xf32>
      %55 = arith.addf %52, %54 : vector<8x32xf32>
      %c0_40 = arith.constant 0 : index
      %c0_41 = arith.constant 0 : index
      %c0_42 = arith.constant 0 : index
      %56 = vector.load %arg3[%c0_40, %c0_41, %c0_42] : memref<1x8x32xf32, #tpu.memory_space<vmem>>, vector<1x8x32xf32>
      %57 = vector.shape_cast %56 : vector<1x8x32xf32> to vector<8x32xf32>
      %58 = arith.addf %55, %57 : vector<8x32xf32>
      %c0_43 = arith.constant 0 : index
      %c0_44 = arith.constant 0 : index
      %59 = vector.load %arg12[%c0_43, %c0_44] : memref<1x32xf32, #tpu.memory_space<vmem>>, vector<1x32xf32>
      %c0_45 = arith.constant 0 : index
      %c0_46 = arith.constant 0 : index
      %60 = vector.load %arg13[%c0_45, %c0_46] : memref<1x32xf32, #tpu.memory_space<vmem>>, vector<1x32xf32>
      %cst_47 = arith.constant dense<0.000000e+00> : vector<8xf32>
      %61 = vector.multi_reduction <add>, %58, %cst_47 [1] : vector<8x32xf32> to vector<8xf32>
      %62 = vector.shape_cast %61 : vector<8xf32> to vector<8x1xf32>
      %cst_48 = arith.constant 3.200000e+01 : f32
      %63 = vector.broadcast %cst_48 : f32 to vector<8x1xf32>
      %64 = arith.divf %62, %63 : vector<8x1xf32>
      %65 = vector.broadcast %64 : vector<8x1xf32> to vector<8x32xf32>
      %66 = arith.subf %58, %65 : vector<8x32xf32>
      %67 = arith.mulf %66, %66 : vector<8x32xf32>
      %cst_49 = arith.constant dense<0.000000e+00> : vector<8xf32>
      %68 = vector.multi_reduction <add>, %67, %cst_49 [1] : vector<8x32xf32> to vector<8xf32>
      %69 = vector.shape_cast %68 : vector<8xf32> to vector<8x1xf32>
      %cst_50 = arith.constant 3.200000e+01 : f32
      %70 = vector.broadcast %cst_50 : f32 to vector<8x1xf32>
      %71 = arith.divf %69, %70 : vector<8x1xf32>
      %cst_51 = arith.constant 9.99999974E-6 : f32
      %72 = vector.broadcast %cst_51 : f32 to vector<8x1xf32>
      %73 = arith.addf %71, %72 : vector<8x1xf32>
      %74 = math.rsqrt %73 : vector<8x1xf32>
      %75 = vector.broadcast %74 : vector<8x1xf32> to vector<8x32xf32>
      %76 = arith.mulf %66, %75 : vector<8x32xf32>
      %77 = vector.broadcast %59 : vector<1x32xf32> to vector<8x32xf32>
      %78 = arith.mulf %76, %77 : vector<8x32xf32>
      %79 = vector.broadcast %60 : vector<1x32xf32> to vector<8x32xf32>
      %80 = arith.addf %78, %79 : vector<8x32xf32>
      %c0_52 = arith.constant 0 : index
      %c0_53 = arith.constant 0 : index
      %81 = vector.load %arg14[%c0_52, %c0_53] : memref<32x64xf32, #tpu.memory_space<vmem>>, vector<32x64xf32>
      %cst_54 = arith.constant dense<0.000000e+00> : vector<8x64xf32>
      %82 = tpu.matmul %80, %81, %cst_54 {dimension_numbers = #tpu.dot_dimension_numbers<[1], [0], [0], [1], [0, 0, 1, 1], [], []>} : vector<8x32xf32>, vector<32x64xf32>, vector<8x64xf32> -> vector<8x64xf32>
      %c0_55 = arith.constant 0 : index
      %c0_56 = arith.constant 0 : index
      %83 = vector.load %arg15[%c0_55, %c0_56] : memref<1x64xf32, #tpu.memory_space<vmem>>, vector<1x64xf32>
      %84 = vector.broadcast %83 : vector<1x64xf32> to vector<8x64xf32>
      %85 = arith.addf %82, %84 : vector<8x64xf32>
      %cst_57 = arith.constant 0.000000e+00 : f32
      %86 = vector.broadcast %cst_57 : f32 to vector<8x64xf32>
      %87 = arith.maximumf %85, %86 : vector<8x64xf32>
      %c0_58 = arith.constant 0 : index
      %c0_59 = arith.constant 0 : index
      %88 = vector.load %arg16[%c0_58, %c0_59] : memref<64x32xf32, #tpu.memory_space<vmem>>, vector<64x32xf32>
      %cst_60 = arith.constant dense<0.000000e+00> : vector<8x32xf32>
      %89 = tpu.matmul %87, %88, %cst_60 {dimension_numbers = #tpu.dot_dimension_numbers<[1], [0], [0], [1], [0, 0, 1, 1], [], []>} : vector<8x64xf32>, vector<64x32xf32>, vector<8x32xf32> -> vector<8x32xf32>
      %c0_61 = arith.constant 0 : index
      %c0_62 = arith.constant 0 : index
      %90 = vector.load %arg17[%c0_61, %c0_62] : memref<1x32xf32, #tpu.memory_space<vmem>>, vector<1x32xf32>
      %91 = vector.broadcast %90 : vector<1x32xf32> to vector<8x32xf32>
      %92 = arith.addf %89, %91 : vector<8x32xf32>
      %93 = arith.addf %92, %80 : vector<8x32xf32>
      %c0_63 = arith.constant 0 : index
      %c0_64 = arith.constant 0 : index
      %94 = vector.load %arg18[%c0_63, %c0_64] : memref<1x32xf32, #tpu.memory_space<vmem>>, vector<1x32xf32>
      %c0_65 = arith.constant 0 : index
      %c0_66 = arith.constant 0 : index
      %95 = vector.load %arg19[%c0_65, %c0_66] : memref<1x32xf32, #tpu.memory_space<vmem>>, vector<1x32xf32>
      %cst_67 = arith.constant dense<0.000000e+00> : vector<8xf32>
      %96 = vector.multi_reduction <add>, %93, %cst_67 [1] : vector<8x32xf32> to vector<8xf32>
      %97 = vector.shape_cast %96 : vector<8xf32> to vector<8x1xf32>
      %cst_68 = arith.constant 3.200000e+01 : f32
      %98 = vector.broadcast %cst_68 : f32 to vector<8x1xf32>
      %99 = arith.divf %97, %98 : vector<8x1xf32>
      %100 = vector.broadcast %99 : vector<8x1xf32> to vector<8x32xf32>
      %101 = arith.subf %93, %100 : vector<8x32xf32>
      %102 = arith.mulf %101, %101 : vector<8x32xf32>
      %cst_69 = arith.constant dense<0.000000e+00> : vector<8xf32>
      %103 = vector.multi_reduction <add>, %102, %cst_69 [1] : vector<8x32xf32> to vector<8xf32>
      %104 = vector.shape_cast %103 : vector<8xf32> to vector<8x1xf32>
      %cst_70 = arith.constant 3.200000e+01 : f32
      %105 = vector.broadcast %cst_70 : f32 to vector<8x1xf32>
      %106 = arith.divf %104, %105 : vector<8x1xf32>
      %cst_71 = arith.constant 9.99999974E-6 : f32
      %107 = vector.broadcast %cst_71 : f32 to vector<8x1xf32>
      %108 = arith.addf %106, %107 : vector<8x1xf32>
      %109 = math.rsqrt %108 : vector<8x1xf32>
      %110 = vector.broadcast %109 : vector<8x1xf32> to vector<8x32xf32>
      %111 = arith.mulf %101, %110 : vector<8x32xf32>
      %112 = vector.broadcast %94 : vector<1x32xf32> to vector<8x32xf32>
      %113 = arith.mulf %111, %112 : vector<8x32xf32>
      %114 = vector.broadcast %95 : vector<1x32xf32> to vector<8x32xf32>
      %115 = arith.addf %113, %114 : vector<8x32xf32>
      %c0_72 = arith.constant 0 : index
      %c0_73 = arith.constant 0 : index
      %c0_74 = arith.constant 0 : index
      %116 = vector.load %arg20[%c0_72, %c0_73, %c0_74] : memref<1x8x32xf32, #tpu.memory_space<vmem>>, vector<1x8x32xf32>
      %117 = vector.shape_cast %116 : vector<1x8x32xf32> to vector<8x32xf32>
      %118 = vector.shape_cast %115 : vector<8x32xf32> to vector<1x8x32xf32>
      tpu.vector_store %arg20[%c0_72, %c0_73, %c0_74], %118 {strides = array<i32>} : memref<1x8x32xf32, #tpu.memory_space<vmem>>, vector<1x8x32xf32>,
    } else {
    }
    return
  }
  func.func @transform_0(%arg0: i32, %arg1: i32, %arg2: i32) -> (i32, i32, i32) {
    %c0_i32 = arith.constant 0 : i32
    %c0_i32_0 = arith.constant 0 : i32
    return %arg0, %arg1, %c0_i32 : i32, i32, i32
  }
  func.func @transform_1(%arg0: i32, %arg1: i32, %arg2: i32) -> (i32, i32, i32) {
    %c0_i32 = arith.constant 0 : i32
    %0 = arith.cmpi eq, %arg1, %c0_i32 : i32
    %c0_i32_0 = arith.constant 0 : i32
    %1 = arith.select %0, %arg2, %c0_i32_0 : i32
    %c0_i32_1 = arith.constant 0 : i32
    %c0_i32_2 = arith.constant 0 : i32
    return %arg0, %1, %c0_i32_1 : i32, i32, i32
  }
  func.func @transform_2(%arg0: i32, %arg1: i32, %arg2: i32) -> (i32, i32, i32) {
    %c0_i32 = arith.constant 0 : i32
    %c0_i32_0 = arith.constant 0 : i32
    return %arg0, %arg2, %c0_i32 : i32, i32, i32
  }
  func.func @transform_3(%arg0: i32, %arg1: i32, %arg2: i32) -> (i32, i32) {
    %c0_i32 = arith.constant 0 : i32
    %c0_i32_0 = arith.constant 0 : i32
    %c0_i32_1 = arith.constant 0 : i32
    return %c0_i32, %c0_i32_0 : i32, i32
  }
  func.func @transform_4(%arg0: i32, %arg1: i32, %arg2: i32) -> (i32, i32) {
    %c0_i32 = arith.constant 0 : i32
    %c0_i32_0 = arith.constant 0 : i32
    %c0_i32_1 = arith.constant 0 : i32
    return %c0_i32, %c0_i32_0 : i32, i32
  }
  func.func @transform_5(%arg0: i32, %arg1: i32, %arg2: i32) -> (i32, i32) {
    %c0_i32 = arith.constant 0 : i32
    %c0_i32_0 = arith.constant 0 : i32
    %c0_i32_1 = arith.constant 0 : i32
    return %c0_i32, %c0_i32_0 : i32, i32
  }
  func.func @transform_6(%arg0: i32, %arg1: i32, %arg2: i32) -> (i32, i32) {
    %c0_i32 = arith.constant 0 : i32
    %c0_i32_0 = arith.constant 0 : i32
    %c0_i32_1 = arith.constant 0 : i32
    return %c0_i32, %c0_i32_0 : i32, i32
  }
  func.func @transform_7(%arg0: i32, %arg1: i32, %arg2: i32) -> (i32, i32) {
    %c0_i32 = arith.constant 0 : i32
    %c0_i32_0 = arith.constant 0 : i32
    %c0_i32_1 = arith.constant 0 : i32
    return %c0_i32, %c0_i32_0 : i32, i32
  }
  func.func @transform_8(%arg0: i32, %arg1: i32, %arg2: i32) -> (i32, i32) {
    %c0_i32 = arith.constant 0 : i32
    %c0_i32_0 = arith.constant 0 : i32
    %c0_i32_1 = arith.constant 0 : i32
    return %c0_i32, %c0_i32_0 : i32, i32
  }
  func.func @transform_9(%arg0: i32, %arg1: i32, %arg2: i32) -> (i32, i32) {
    %c0_i32 = arith.constant 0 : i32
    %c0_i32_0 = arith.constant 0 : i32
    %c0_i32_1 = arith.constant 0 : i32
    return %c0_i32, %c0_i32_0 : i32, i32
  }
  func.func @transform_10(%arg0: i32, %arg1: i32, %arg2: i32) -> (i32, i32) {
    %c0_i32 = arith.constant 0 : i32
    %c0_i32_0 = arith.constant 0 : i32
    %c0_i32_1 = arith.constant 0 : i32
    return %c0_i32, %c0_i32_0 : i32, i32
  }
  func.func @transform_11(%arg0: i32, %arg1: i32, %arg2: i32) -> (i32, i32) {
    %c0_i32 = arith.constant 0 : i32
    %c0_i32_0 = arith.constant 0 : i32
    %c0_i32_1 = arith.constant 0 : i32
    return %c0_i32, %c0_i32_0 : i32, i32
  }
  func.func @transform_12(%arg0: i32, %arg1: i32, %arg2: i32) -> (i32, i32) {
    %c0_i32 = arith.constant 0 : i32
    %c0_i32_0 = arith.constant 0 : i32
    %c0_i32_1 = arith.constant 0 : i32
    return %c0_i32, %c0_i32_0 : i32, i32
  }
  func.func @transform_13(%arg0: i32, %arg1: i32, %arg2: i32) -> (i32, i32) {
    %c0_i32 = arith.constant 0 : i32
    %c0_i32_0 = arith.constant 0 : i32
    %c0_i32_1 = arith.constant 0 : i32
    return %c0_i32, %c0_i32_0 : i32, i32
  }
  func.func @transform_14(%arg0: i32, %arg1: i32, %arg2: i32) -> (i32, i32) {
    %c0_i32 = arith.constant 0 : i32
    %c0_i32_0 = arith.constant 0 : i32
    %c0_i32_1 = arith.constant 0 : i32
    return %c0_i32, %c0_i32_0 : i32, i32
  }
  func.func @transform_15(%arg0: i32, %arg1: i32, %arg2: i32) -> (i32, i32) {
    %c0_i32 = arith.constant 0 : i32
    %c0_i32_0 = arith.constant 0 : i32
    %c0_i32_1 = arith.constant 0 : i32
    return %c0_i32, %c0_i32_0 : i32, i32
  }
  func.func @transform_16(%arg0: i32, %arg1: i32, %arg2: i32) -> (i32, i32) {
    %c0_i32 = arith.constant 0 : i32
    %c0_i32_0 = arith.constant 0 : i32
    %c0_i32_1 = arith.constant 0 : i32
    return %c0_i32, %c0_i32_0 : i32, i32
  }
  func.func @transform_17(%arg0: i32, %arg1: i32, %arg2: i32) -> (i32, i32, i32) {
    %c0_i32 = arith.constant 0 : i32
    %c0_i32_0 = arith.constant 0 : i32
    return %arg0, %arg1, %c0_i32 : i32, i32, i32
  }
}

</mosaic_0001>

<bundles_post_ra>
// kernel: tpu_custom_call.1
= control target key start
LH: loop header
LB: loop body
LE: loop exit
PB: predicated region body
PF: predicated region fallthrough
CT: control target
= control target key end

     0   :  { %s3777_s0 = inlined_call_operand.vmem [shape: f32[2,8,32], index: 0, kind: input, shape index: {}]   ;;  %s3778_s1 = inlined_call_operand.hbm [shape: f32[2,8,32], index: 1, kind: input, shape index: {}]   ;;  %s3779_s2 = inlined_call_operand.vmem [shape: f32[2,8,1], index: 2, kind: input, shape index: {}]   ;;  %s3780_s3 = inlined_call_operand.vmem [shape: f32[32,32], index: 3, kind: input, shape index: {}]   ;;  %s3781_s4 = inlined_call_operand.vmem [shape: f32[1,32], index: 4, kind: input, shape index: {}]   ;;  %s3782_s5 = inlined_call_operand.vmem [shape: f32[32,64], index: 5, kind: input, shape index: {}]   ;;  %s3783_s6 = inlined_call_operand.vmem [shape: f32[1,64], index: 6, kind: input, shape index: {}]   ;;  %s3784_s7 = inlined_call_operand.vmem [shape: f32[32,32], index: 7, kind: input, shape index: {}]   ;;  %s3785_s8 = inlined_call_operand.vmem [shape: f32[1,32], index: 8, kind: input, shape index: {}]   ;;  %s3786_s9 = inlined_call_operand.vmem [shape: f32[1,32], index: 9, kind: input, shape index: {}]   ;;  %s3787_s10 = inlined_call_operand.vmem [shape: f32[1,32], index: 10, kind: input, shape index: {}]   ;;  %s3788_s11 = inlined_call_operand.hbm [shape: f32[32,64], index: 11, kind: input, shape index: {}]   ;;  %s3789_s12 = inlined_call_operand.vmem [shape: f32[1,64], index: 12, kind: input, shape index: {}]   ;;  %s3790_s13 = inlined_call_operand.vmem [shape: f32[64,32], index: 13, kind: input, shape index: {}]   ;;  %s3791_s14 = inlined_call_operand.vmem [shape: f32[1,32], index: 14, kind: input, shape index: {}]   ;;  %s3792_s15 = inlined_call_operand.vmem [shape: f32[1,32], index: 15, kind: input, shape index: {}]   ;;  %s3793_s16 = inlined_call_operand.vmem [shape: f32[1,32], index: 16, kind: input, shape index: {}]   ;;  %s3794_s17 = inlined_call_operand.hbm [shape: f32[2,8,32], index: 17, kind: output, shape index: {}]  }
   0x1   :  { %3804 = sst [smem:[#allocation19_spill]] %s3777_s0 }
   0x2   :  { %3805 = sst [smem:[#allocation20_spill]] %s3778_s1 }
   0x3   :  { %3806 = sst [smem:[#allocation21_spill]] %s3786_s9 }
   0x4   :  { %3807 = sst [smem:[#allocation22_spill]] %s3787_s10 }
   0x5   :  { %3808 = sst [smem:[#allocation23_spill]] %s3788_s11 }
   0x6   :  { %3809 = sst [smem:[#allocation24_spill]] %s3789_s12 }
   0x7   :  { %3810 = sst [smem:[#allocation25_spill]] %s3791_s14 }
   0x8   :  { %3811 = sst [smem:[#allocation26_spill]] %s3792_s15 }
   0x9   :  { %3812 = sst [smem:[#allocation27_spill]] %s3793_s16 }
   0xa   :  { %3813 = sst [smem:[#allocation28_spill]] %s3794_s17 }
   0xb   :  { %22 = vsyncpa [#allocation8], 0 }
   0xc   :  { %24 = vsyncpa [#allocation8 + $0x1], 0 }
   0xd   :  { %25 = vsyncpa [#allocation11], 0 }
   0xe   :  { %26 = vsyncpa [#allocation9], 0 }
   0xf   :  { %28 = vsyncpa [#allocation9 + $0x1], 0  ;;  %s3223_s24 = smov 0   ;;  %s3225_s25 = smov 0  }
  0x10   :  { %s3227_s26 = smov 0   ;;  %s3229_s27 = smov 0  }
  0x11   :  { %s3231_s28 = smov 0   ;;  %s3233_s29 = smov 0  }
  0x12 LB: > { %3814 = sst [smem:[#allocation16_spill]] %s3091_s24  ;;  %s2627_s0 = sadd.s32 4294967295, %s3111_s29   ;;  %s3111_s29 = sphi %s3233_s29, %s34_s29   ;;  %s3107_s28 = sphi %s3231_s28, %s3849_s28   ;;  %s3103_s27 = sphi %s3229_s27, %s3848_s27   ;;  %s3099_s26 = sphi %s3227_s26, %s3847_s26   ;;  %s3095_s25 = sphi %s3225_s25, %s3846_s25   ;;  %s3091_s24 = sphi %s3223_s24, %s3845_s24  }
  0x13   : > { %s2628_s30 = sadd.s32 4294967294, %s3111_s29   ;;  %p107_p0 = scmp.ne.s32.totalorder %s3095_s25, %s3091_s24 }
  0x14   : > { %p3257_p1 = scmp.eq.s32.totalorder %s2627_s0, 0  ;;  %p3261_p2 = scmp.eq.s32.totalorder %s2627_s0, 1 }
  0x15   : > { %p461_p3 = scmp.eq.s32.totalorder %s2628_s30, 1  ;;  %p2629_p5 = scmp.ge.s32.totalorder %s3111_s29, 1 }
  0x16   : > { %s3815_s18 = scalar_select %p3257_p1, 1, 0 }
  0x17   : > { %s3816_s19 = scalar_select %p3261_p2, 1, 0 }
  0x18   : > { %p3267_p4 = por %p3257_p1, %p107_p0  ;;  %p3272_p6 = por %p461_p3, %p107_p0 }
  0x19   : > { %p468_p7 = scmp.lt.s32.totalorder %s3111_s29, 3  ;;  %s3113_s22 = smov [#allocation10]  }
  0x1a   : > { %s3817_s1 = scalar_select %p3267_p4, 1, 0 }
  0x1b   : > { %s3818_s20 = scalar_select %p3272_p6, 1, 0 }
  0x1c   : > { %p3277_p8 = pnand %p2629_p5, %p468_p7  ;;  %s504_s23 = sshll.u32 %s3113_s22, 4  ;;  %s505_s23 = int_to_ptr.vmem [resolvable:$true] %s504_s23 }
  0x1d   : > { %3819 = sst [smem:[#allocation17_spill]] %s3818_s20  ;;  %s53_s30 = sadd.s32 1, %s3107_s28 }
  0x1e   : > { %s3820_s21 = scalar_select %p3277_p8, 1, 0 }
  0x1f   : > { %p2868_p9 = pneg %p3277_p8  ;;  %s3822_s11 = sld [smem:[#allocation23_spill]] }
  0x21   : > { %p3286_p11 = pnand %p2868_p9, %p3257_p1 }
  0x23   : > { %p2969_p13 = pneg %p3286_p11 }
  0x25   : > { %s2967_s17 = scalar_lea.hbm %s3822_s11, 512 }
  0x26   : > { %p2968_p12 = scmp.ne.s32.totalorder %s3822_s11, %s2967_s17  ;;  %p2974_p5 = scmp.lt.u32.totalorder %s2967_s17, %s3822_s11 }
  0x28   : > { %p2970_p0 = pnand %p2969_p13, %p2968_p12 }
  0x2a   : > { %p2971_p3 = pneg %p2970_p0 }
  0x2c   : > { %p2976_p7 = pnand %p2974_p5, %p2971_p3 }
  0x2e   : > { %2979 = shalt.err (!%p2976_p7)
}
  0x2f   : > { %s2980_s12 = scalar_lea.vmem %s505_s23, 512  ;;  %p2988_p1 = scmp.lt.s32.totalorder %s505_s23, %s505_s23 }
  0x30   : > { %p2981_p9 = scmp.ne.s32.totalorder %s505_s23, %s2980_s12  ;;  %p2989_p4 = scmp.lt.s32.totalorder %s2980_s12, %s2980_s12 }
  0x32   : > { %p2983_p10 = pnand %p2981_p9, %p2969_p13  ;;  %p2990_p8 = por %p2989_p4, %p2988_p1 }
  0x34   : > { %p2984_p6 = pneg %p2983_p10 }
  0x36   : > { %p2991_p2 = pnand %p2990_p8, %p2984_p6 }
  0x38   : > { %2994 = shalt.err (!%p2991_p2)
}
  0x39   : > { %s3114_s15 = smov 128   ;;  %s3115_s14 = smov 8  }
  0x3a   : > { %2871 = dma.hbm_to_vmem [thread:$0]  (!%p3286_p11), %s3822_s11, 512, %s505_s23, [#allocation11], %s3114_s15, %s3114_s15, %s3115_s14  }
  0x3b   : > { %p55_p1 = scmp.ge.s32.totalorder %s53_s30, 2  ;;  %s94_s12 = sadd.s32 1, %s3099_s26 }
  0x3c   : > { %p101_p2 = scmp.ne.s32.totalorder %s3099_s26, %s3095_s25  ;;  %p102_p4 = scmp.eq.s32.totalorder %s3111_s29, 0 }
  0x3d   : > { %s3851_s30 = smov (%p55_p1, %s53_s30), 0  ;;  %p3825_p8 = scmp.ne.s32.totalorder %s3816_s19, 0 }
  0x3e   : > { %3823 = sst [smem:[#allocation18_spill]] %s3851_s30  ;;  %p3313_p6 = por %p102_p4, %p101_p2 }
  0x3f   : > { %p3319_p10 = por %p3825_p8, %p101_p2  ;;  %s89_s0 = ssub.s32 %s3107_s28, %s3851_s30 }
  0x40   : > { %p2881_p12 = scmp.lt.s32.totalorder %s3111_s29, 2  ;;  %p92_p11 = scmp.eq.s32.totalorder %s89_s0, 0 }
  0x41   : > { %s543_s23 = sand.u32 1, %s3099_s26   ;;  %s2633_s14 = sshll.u32 %s3107_s28, 7 }
  0x42   : > { %s2632_s22 = sshll.u32 %s543_s23, 3  ;;  %s3827_s11 = sld [smem:[#allocation20_spill]] }
  0x43   : > { %s3328_s15 = scalar_select %p92_p11, %s3099_s26, %s94_s12  }
  0x44   : > { %s547_s19 = scalar_lea.vmem [#allocation7], %s2632_s22  ;;  %p3340_p13 = pnand %p2881_p12, %p3313_p6 }
  0x45   : > { %s557_s9 = sshll.u32 %s547_s19, 4  ;;  %s544_s12 = scalar_lea.sflag [#allocation8], %s543_s23  ;;  %s3336_s9 = int_to_ptr.vmem [resolvable:$true] %s557_s9 }
  0x46   : > { %p2997_p3 = pneg %p3340_p13 }
  0x48   : > { %s3334_s10 = scalar_lea.hbm %s3827_s11, %s2633_s14  ;;  %s3000_s16 = scalar_lea.hbm %s3827_s11, 256 }
  0x49   : > { %s2995_s30 = scalar_lea.hbm %s3334_s10, 128  ;;  %p3001_p9 = scmp.lt.u32.totalorder %s3334_s10, %s3827_s11 }
  0x4a   : > { %p2996_p0 = scmp.ne.s32.totalorder %s3334_s10, %s2995_s30  ;;  %p3002_p1 = scmp.lt.u32.totalorder %s3000_s16, %s2995_s30 }
  0x4b   : > { %p3004_p4 = scmp.lt.u32.totalorder %s2995_s30, %s3334_s10 }
  0x4c   : > { %p2998_p5 = pnand %p2997_p3, %p2996_p0  ;;  %p3003_p2 = por %p3002_p1, %p3001_p9 }
  0x4e   : > { %p2999_p7 = pneg %p2998_p5  ;;  %p3005_p6 = por %p3004_p4, %p3003_p2 }
  0x50   : > { %p3006_p8 = pnand %p3005_p6, %p2999_p7 }
  0x52   : > { %3009 = shalt.err (!%p3006_p8)
}
  0x53   : > { %s3010_s23 = scalar_lea.vmem %s3336_s9, 128  ;;  %s3116_s19 = smov [#allocation7]  }
  0x54   : > { %p3011_p12 = scmp.ne.s32.totalorder %s3336_s9, %s3010_s23  ;;  %s3015_s22 = sshll.u32 %s3116_s19, 4  ;;  %s3016_s22 = int_to_ptr.vmem [resolvable:$false] %s3015_s22 }
  0x55   : > { %s3017_s14 = scalar_lea.vmem %s3016_s22, 256  ;;  %p3018_p5 = scmp.lt.s32.totalorder %s3336_s9, %s3016_s22 }
  0x56   : > { %p3013_p11 = pnand %p3011_p12, %p2997_p3  ;;  %p3019_p9 = scmp.lt.s32.totalorder %s3017_s14, %s3010_s23 }
  0x58   : > { %p3014_p0 = pneg %p3013_p11  ;;  %p3020_p1 = por %p3019_p9, %p3018_p5 }
  0x5a   : > { %p3021_p2 = pnand %p3020_p1, %p3014_p0 }
  0x5c   : > { %3024 = shalt.err (!%p3021_p2)
}
  0x5d   : > { %2875 = dma.hbm_to_vmem [thread:$0]  (!%p3340_p13), %s3334_s10, 128, %s3336_s9, %s544_s12  }
  0x5e   : > { %p3829_p7 = scmp.ne.s32.totalorder %s3820_s21, 0 }
  0x5f   : > { %s3372_s30 = sand.u32 (!%p3829_p7), 1, %s3095_s25   ;;  %p3830_p3 = scmp.ne.s32.totalorder (!%p3829_p7), %s3817_s1, 0 }
  0x60   : > { %576 = sbr.rel (%p3829_p7) target bundleno = 2711 (0xa97), region = 88  ;;  %s2635_s16 = sshll.u32 (!%p3829_p7), %s3372_s30, 3 }
  0x61   : > { %s579_s24 = scalar_lea.sflag (!%p3829_p7), [#allocation8], %s3372_s30  ;;  %s582_s17 = scalar_lea.vmem (!%p3829_p7), [#allocation7], %s2635_s16 }
  0x67   : > { %3078 = dma.done.wait (%p3830_p3), %s579_s24, 128  }
  0x68   : > { %3080 = vsyncadd (%p3830_p3), %s579_s24, 4294967168  ;;  %p3831_p13 = scmp.ne.s32.totalorder %s3815_s18, 0 }
  0x6a   : > { %3082 = dma.done.wait (%p3831_p13), [#allocation11], 512  }
  0x6b   : > { %3084 = vsyncadd (%p3831_p13), [#allocation11], 4294966784  ;;  %v3117_v0 = vmov 0.0|0.0   ;;  %vm3118_vm0 = vmmov 0   ;;  %v3119_v1 = vmov 0.0   ;;  %v672_v2 = vld [vmem:[%s3782_s5] sm:$0xff]  ;;  %v772_v28 = vlaneseq }
  0x6c   : > { %2824 = vmatprep.subr.bf16.mxu1 %v3117_v0  ;;  %2729 = vmatprep.mubr.msk.f32.mxu1 %vm3118_vm0, %v3119_v1  ;;  %v673_v3 = vld [vmem:[%s3782_s5 + $0x8] sm:$0xff]  ;;  %v674_v4 = vld [vmem:[%s3782_s5 + $0x10] sm:$0xff]  ;;  %v675_v6 = vld [vmem:[%s3782_s5 + $0x18] sm:$0xff]  ;;  %p651_p4 = scmp.lt.s32.totalorder %s3103_s27, 1  ;;  %vm683_vm1 = vcmask 261120   ;;  %s3832_s23 = sld [smem:[#allocation19_spill]] }
  0x6d   : > { %2743 = vmatprep.subr.mxu0 %v3119_v1  ;;  %2745 = vmatprep.mubr.msk.f32.mxu0 %vm3118_vm0, %v3119_v1  ;;  %v2825_v5 = vpack.c.bf16 %v673_v3, %v672_v2  ;;  %v2828_v7 = vpack.c.bf16 %v675_v6, %v674_v4  ;;  %v915_v8 = vld [vmem:[%s3780_s3] sm:$0xff]  ;;  %v916_v9 = vld [vmem:[%s3780_s3 + $0x8] sm:$0xff]  ;;  %v917_v12 = vld [vmem:[%s3780_s3 + $0x10] sm:$0xff]  ;;  %s3120_s24 = smov 112   ;;  %s3121_s10 = smov 80   ;;  %vm1146_vm2 = vcmask 64512  }
  0x6e   : > { %s3413_s9 = scalar_select %p651_p4, %s3103_s27, 1  ;;  %v671_v10 = vld [vmem:[%s582_s17] sm:$0xff]  ;;  %v2831_v11 = vpack.c.bf16 %v916_v9, %v915_v8  ;;  %v918_v13 = vld [vmem:[%s3780_s3 + $0x18] sm:$0xff]  ;;  %v2640_v16 = vld [vmem:[%s3783_s6] ss:$0 sm:$0xff]  ;;  %1154 = vst.msk [vmem:[#allocation6] sm:$0xff] %vm1146_vm2, %v3119_v1 }
  0x6f   : > { %2826 = vmatpush3.bf16.msra.mxu1 %v2825_v5  ;;  %v2834_v14 = vpack.c.bf16 %v918_v13, %v917_v12  ;;  %v2644_v20 = vld [vmem:[%s3781_s4] ss:$0 sm:$0xff]  ;;  %s3122_s21 = smov 96   ;;  %s3123_s17 = smov 120   ;;  %1155 = vst.msk [vmem:[#allocation6 + $0x8] sm:$0xff] %vm1146_vm2, %v3119_v1  ;;  %1156 = vst.msk [vmem:[#allocation6 + $0x10] sm:$0xff] %vm1146_vm2, %v3119_v1 }
  0x70   : > { %2827 = vmatprep.subr.bf16.mxu1 %v3117_v0  ;;  %s2638_s0 = sshll.u32 %s3413_s9, 3  ;;  %1157 = vst.msk [vmem:[#allocation6 + $0x18] sm:$0xff] %vm1146_vm2, %v3119_v1  ;;  %s3124_s12 = smov 104   ;;  %v3125_v24 = vmov 0   ;;  %v3126_v26 = vmov 1983009808  }
  0x71   : > { %s666_s22 = scalar_lea.vmem %s3779_s2, %s2638_s0  ;;  %2950 = vset.pattern.permute.xlu0 %v3125_v24  ;;  %v770_v27 = vunpack.c.l.s4 %v3126_v26  ;;  %v3127_v29 = vmov 1934713408   ;;  %v3465_v32 = vshrl.u32 %v772_v28, 7  ;;  %vm905_vm3 = vcmask 130048   ;;  %s3839_s9 = sld [smem:[#allocation28_spill]] }
  0x72   : > { %s657_s19 = scalar_lea.vmem %s3832_s23, %s2638_s0  ;;  %v1168_v25 = vld [vmem:[%s666_s22] sm:$0xff]  ;;  %v802_v30 = vunpack.c.l.s4 %v3127_v29  ;;  %vm1151_vm4 = vcmask 60416   ;;  %vm1179_vm5 = vcmask 1041409   ;;  %vm1180_vm6 = vcmask 1042434   ;;  %s3131_s23 = smov 24  }
  0x73   : > { %2829 = vmatpush3.bf16.msra.mxu1 %v2828_v7  ;;  %v3432_v15 = vld [vmem:[%s657_s19] sm:$0xff]  ;;  %v771_v31 = vunpack.c.0.s8 %v770_v27  ;;  %1153 = vst.msk [vmem:[#allocation5] sm:$0xf] %vm1151_vm4, %v3119_v1  ;;  %vm1182_vm7 = vcmask 1043459   ;;  %vm2161_vm8 = vcmask 195584   ;;  %s3833_s0 = sld [smem:[#allocation21_spill]] }
  0x74   : > { %2830 = vmatprep.subr.bf16.mxu1 %v3117_v0  ;;  %v803_v35 = vunpack.c.0.s8 %v802_v30  ;;  %s3835_s19 = sld [smem:[#allocation24_spill]]  ;;  %vm2380_vm9 = vcmask 523264   ;;  %s2486_s14 = scalar_lea.sflag [#allocation9], %s3372_s30 }
  0x75   : > { %v3468_v36 = vsub.s32 %v771_v31, %v3465_v32 }
  0x76   : > { %2730 = vmatmul.mubr.msk.f32.vlgmr.msra.gmra.mrb[0].mxu1 %vm683_vm1, %v671_v10  ;;  %v3471_v42 = vsub.s32 %v803_v35, %v3465_v32 }
  0x77   : > { %2832 = vmatpush3.bf16.msra.mxu1 %v2831_v11  ;;  %2740 = vmatprep.mubr.msk.f32.mxu1 %vm3118_vm0, %v3119_v1 }
  0x78   : > { %2833 = vmatprep.subr.bf16.mxu1 %v3117_v0 }
  0x7b   : > { %2835 = vmatpush3.bf16.msra.mxu1 %v2834_v14 }
  0x7c   : > { %2748 = vmatprep.subr.mxu1 %v3119_v1 }
  0x7e   : > { %2741 = vmatmul.mubr.msk.f32.vlgmr.msra.gmra.mrb[2].mxu1 %vm683_vm1, %v3432_v15 }
  0x7f   : > { %2750 = vmatprep.mubr.msk.f32.mxu1 %vm3118_vm0, %v3119_v1 }
 0x149   : > { %v753_v17 = vpop.f32.mrb[0].mxu1 }
 0x14a   : > { %v754_v18 = vadd.f32 %v2640_v16, %v753_v17  ;;  %v2731_v19 = vpop.f32.mrb[1].mxu1 }
 0x14c   : > { %758 = vrot.lane.b32.xlu0 %v754_v18, %s3120_s24  ;;  %764 = vrot.lane.b32.xlu1 %v754_v18, %s3121_s10  ;;  %s3834_s10 = sld [smem:[#allocation22_spill]] }
 0x150   : > { %761 = vrot.lane.b32.xlu0 %v754_v18, %s3122_s21  ;;  %s3838_s21 = sld [smem:[#allocation27_spill]] }
 0x151   : > { %v996_v21 = vpop.f32.mrb[2].mxu1 }
 0x152   : > { %v3445_v22 = vadd.f32 %v2644_v20, %v996_v21  ;;  %v2742_v23 = vpop.f32.mrb[3].mxu1 }
 0x154   : > { %1004 = vrot.lane.b32.xlu0 %v3445_v22, %s3120_s24  ;;  %1001 = vrot.lane.b32.xlu1 %v3445_v22, %s3123_s17 }
 0x158   : > { %1007 = vrot.lane.b32.xlu1 %v3445_v22, %s3124_s12  ;;  %1171 = vperm.xlu0 %2950, %v1168_v25   ;;  %s3130_s12 = smov 8  }
 0x1be   : > { %v759_v33 = vpop.permute.xlu0 %758  ;;  %v765_v34 = vpop.permute.xlu1 %764 }
 0x1bf   : > { %v783_v37 = vcombine.low %v759_v33, %v765_v34  ;;  %v784_v38 = vcombine.high %v759_v33, %v765_v34 }
 0x1c1   : > { %v791_v43 = vrot.slane %v783_v37, %v3468_v36  ;;  %v798_v44 = vrot.slane %v784_v38, %v3468_v36 }
 0x1c2   : > { %v762_v39 = vpop.permute.xlu0 %761 }
 0x1c3   : > { %v767_v40 = vcombine.low %v754_v18, %v762_v39  ;;  %v768_v41 = vcombine.high %v754_v18, %v762_v39 }
 0x1c5   : > { %v775_v45 = vrot.slane %v767_v40, %v3468_v36  ;;  %v782_v46 = vrot.slane %v768_v41, %v3468_v36 }
 0x1c6   : > { %v1002_v47 = vpop.permute.xlu1 %1001  ;;  %v1005_v52 = vpop.permute.xlu0 %1004 }
 0x1c7   : > { %v799_v48 = vcombine.low %v775_v45, %v791_v43  ;;  %v800_v49 = vcombine.high %v775_v45, %v791_v43  ;;  %v815_v50 = vcombine.low %v782_v46, %v798_v44  ;;  %v816_v51 = vcombine.high %v782_v46, %v798_v44 }
 0x1c8   : > { %v1010_v57 = vcombine.low %v3445_v22, %v1005_v52  ;;  %v1011_v58 = vcombine.high %v3445_v22, %v1005_v52 }
 0x1c9   : > { %v807_v53 = vrot.slane %v799_v48, %v3471_v42  ;;  %v814_v54 = vrot.slane %v800_v49, %v3471_v42  ;;  %v823_v55 = vrot.slane %v815_v50, %v3471_v42  ;;  %v830_v56 = vrot.slane %v816_v51, %v3471_v42 }
 0x1ca   : > { %v1008_v59 = vpop.permute.xlu1 %1007  ;;  %v1018_v8 = vrot.slane %v1010_v57, %v3468_v36  ;;  %v1025_v9 = vrot.slane %v1011_v58, %v3468_v36 }
 0x1cb   : > { %v835_v60 = vcombine.low %v807_v53, %v814_v54  ;;  %v2642_v61 = vcombine.high %v807_v53, %v814_v54  ;;  %v851_v62 = vcombine.low %v823_v55, %v830_v56  ;;  %v2643_v63 = vcombine.high %v823_v55, %v830_v56 }
 0x1cc   : > { %v1026_v2 = vcombine.low %v1002_v47, %v1008_v59  ;;  %v1027_v3 = vcombine.high %v1002_v47, %v1008_v59 }
 0x1cd   : > { %v842_v4 = vrot.slane %v835_v60, %v3468_v36  ;;  %v850_v5 = vrot.slane %v2642_v61, %v3468_v36  ;;  %v858_v6 = vrot.slane %v851_v62, %v3468_v36  ;;  %v866_v7 = vrot.slane %v2643_v63, %v3468_v36 }
 0x1ce   : > { %v1034_v10 = vrot.slane %v1026_v2, %v3468_v36  ;;  %v1041_v11 = vrot.slane %v1027_v3, %v3468_v36  ;;  %v1174_v3 = vand.u32 127, %v772_v28 }
 0x1cf   : > { %v867_v12 = vcombine.low %v842_v4, %v850_v5  ;;  %v868_v13 = vcombine.high %v842_v4, %v850_v5  ;;  %v883_v14 = vcombine.low %v858_v6, %v866_v7  ;;  %v884_v16 = vcombine.high %v858_v6, %v866_v7 }
 0x1d0   : > { %v1042_v17 = vcombine.low %v1018_v8, %v1034_v10  ;;  %v1043_v18 = vcombine.high %v1018_v8, %v1034_v10  ;;  %v1058_v19 = vcombine.low %v1025_v9, %v1041_v11  ;;  %v1059_v20 = vcombine.high %v1025_v9, %v1041_v11 }
 0x1d1   : > { %v875_v21 = vrot.slane %v867_v12, %v3471_v42  ;;  %v882_v22 = vrot.slane %v868_v13, %v3471_v42  ;;  %v891_v23 = vrot.slane %v883_v14, %v3471_v42  ;;  %v898_v24 = vrot.slane %v884_v16, %v3471_v42 }
 0x1d2   : > { %v1050_v25 = vrot.slane %v1042_v17, %v3471_v42  ;;  %v1057_v26 = vrot.slane %v1043_v18, %v3471_v42  ;;  %v1066_v27 = vrot.slane %v1058_v19, %v3471_v42  ;;  %v1073_v29 = vrot.slane %v1059_v20, %v3471_v42 }
 0x1d3   : > { %v899_v30 = vcombine.low %v875_v21, %v891_v23  ;;  %v900_v31 = vcombine.high %v875_v21, %v891_v23  ;;  %v901_v33 = vcombine.low %v882_v22, %v898_v24  ;;  %v902_v34 = vcombine.high %v882_v22, %v898_v24 }
 0x1d4   : > { %v1078_v35 = vcombine.low %v1050_v25, %v1057_v26  ;;  %v2646_v37 = vcombine.high %v1050_v25, %v1057_v26  ;;  %v1094_v38 = vcombine.low %v1066_v27, %v1073_v29  ;;  %v2647_v39 = vcombine.high %v1066_v27, %v1073_v29 }
 0x1d5   : > { %906 = vst.msk [vmem:[#allocation2] sm:$0xff] %vm905_vm3, %v899_v30  ;;  %907 = vst.msk [vmem:[#allocation2 + $0x8] sm:$0xff] %vm905_vm3, %v900_v31  ;;  %v3549_v4 = vsub.s32 %v1174_v3, %v3465_v32  ;;  %v3128_v23 = vmov -1e+30  }
 0x1d6   : > { %908 = vst.msk [vmem:[#allocation2 + $0x10] sm:$0xff] %vm905_vm3, %v901_v33  ;;  %909 = vst.msk [vmem:[#allocation2 + $0x18] sm:$0xff] %vm905_vm3, %v902_v34  ;;  %v1085_v40 = vrot.slane %v1078_v35, %v3468_v36  ;;  %v1093_v41 = vrot.slane %v2646_v37, %v3468_v36  ;;  %v1101_v43 = vrot.slane %v1094_v38, %v3468_v36  ;;  %v3566_v38 = vsub.s32 1, %v3465_v32 }
 0x1d7   : > { %v1109_v44 = vrot.slane %v2647_v39, %v3468_v36  ;;  %v1172_v5 = vpop.permute.xlu0 %1171  ;;  %1152 = vst.msk [vmem:[#allocation4] sm:$0xf] %vm1151_vm4, %v3128_v23  ;;  %v3569_v39 = vsub.s32 0, %v3465_v32 }
 0x1d8   : > { %v1110_v45 = vcombine.low %v1085_v40, %v1093_v41  ;;  %v1111_v46 = vcombine.high %v1085_v40, %v1093_v41  ;;  %v1178_v6 = vrot.slane %v1172_v5, %v3549_v4 }
 0x1d9   : > { %v1126_v47 = vcombine.low %v1101_v43, %v1109_v44  ;;  %v1127_v48 = vcombine.high %v1101_v43, %v1109_v44 }
 0x1da   : > { %v1118_v49 = vrot.slane %v1110_v45, %v3471_v42  ;;  %v1125_v50 = vrot.slane %v1111_v46, %v3471_v42  ;;  %v3576_v46 = vsub.s32 2, %v3465_v32 }
 0x1db   : > { %v1134_v51 = vrot.slane %v1126_v47, %v3471_v42  ;;  %v1141_v52 = vrot.slane %v1127_v48, %v3471_v42  ;;  %v3580_v48 = vsub.s32 3, %v3465_v32 }
 0x1dc   : > { %v3511_v57 = vld [vmem:[#allocation2] sm:$0xff]  ;;  %v3513_v58 = vld [vmem:[#allocation2 + $0x8] sm:$0xff] }
 0x1dd   : > { %v1142_v53 = vcombine.low %v1118_v49, %v1134_v51  ;;  %v1143_v54 = vcombine.high %v1118_v49, %v1134_v51  ;;  %v1144_v55 = vcombine.low %v1125_v50, %v1141_v52  ;;  %v1145_v56 = vcombine.high %v1125_v50, %v1141_v52  ;;  %2744 = vmatpush3.xpose.msk.msra.mxu0 %vm1146_vm2, %v3511_v57  ;;  %v3527_v61 = vld [vmem:[#allocation2 + $0x10] sm:$0xff]  ;;  %v3529_v62 = vld [vmem:[#allocation2 + $0x18] sm:$0xff] }
 0x1de   : > { %2749 = vmatpush3.xpose.msk.msra.mxu1 %vm1146_vm2, %v3513_v58  ;;  %2753 = vmatprep.subr.mxu0 %v3119_v1  ;;  %v1498_v35 = vld [vmem:[#allocation4] sm:$0xf] }
 0x1df   : > { %1147 = vst.msk [vmem:[#allocation3] sm:$0xff] %vm1146_vm2, %v1142_v53  ;;  %1148 = vst.msk [vmem:[#allocation3 + $0x8] sm:$0xff] %vm1146_vm2, %v1143_v54  ;;  %2758 = vmatprep.subr.mxu1 %v3119_v1 }
 0x1e0   : > { %1149 = vst.msk [vmem:[#allocation3 + $0x10] sm:$0xff] %vm1146_vm2, %v1144_v55  ;;  %1150 = vst.msk [vmem:[#allocation3 + $0x18] sm:$0xff] %vm1146_vm2, %v1145_v56 }
 0x1e6   : > { %v1164_v59 = vld [vmem:[#allocation3] sm:$0xff]  ;;  %v1165_v60 = vld [vmem:[#allocation3 + $0x8] sm:$0xff] }
 0x1e7   : > { %2746 = vmatmul.mubr.msk.f32.vlgmr.msra.gmra.mrb[0].mxu0 %vm1146_vm2, %v1164_v59  ;;  %2751 = vmatmul.mubr.msk.f32.vlgmr.msra.gmra.mrb[4].mxu1 %vm1146_vm2, %v1165_v60  ;;  %v1166_v63 = vld [vmem:[#allocation3 + $0x10] sm:$0xff]  ;;  %v1167_v2 = vld [vmem:[#allocation3 + $0x18] sm:$0xff] }
 0x1e8   : > { %2754 = vmatpush3.xpose.msk.msra.mxu0 %vm1146_vm2, %v3527_v61  ;;  %2759 = vmatpush3.xpose.msk.msra.mxu1 %vm1146_vm2, %v3529_v62 }
 0x1e9   : > { %2755 = vmatprep.mubr.msk.f32.mxu0 %vm3118_vm0, %v3119_v1  ;;  %2760 = vmatprep.mubr.msk.f32.mxu1 %vm3118_vm0, %v3119_v1 }
 0x1ea   : > { %2763 = vmatprep.subr.mxu0 %v3119_v1  ;;  %2768 = vmatprep.subr.mxu1 %v3119_v1 }
 0x1eb   : > { %2756 = vmatmul.mubr.msk.f32.vlgmr.msra.gmra.mrb[2].mxu0 %vm1146_vm2, %v1166_v63  ;;  %2761 = vmatmul.mubr.msk.f32.vlgmr.msra.gmra.mrb[6].mxu1 %vm1146_vm2, %v1167_v2 }
 0x1ec   : > { %2765 = vmatprep.mubr.msk.f32.mxu0 %vm3118_vm0, %v3119_v1  ;;  %2770 = vmatprep.mubr.msk.f32.mxu1 %vm3118_vm0, %v3119_v1 }
 0x2ba   : > { %v1266_v7 = vpop.f32.mrb[0].mxu0  ;;  %v1342_v8 = vpop.f32.mrb[4].mxu1 }
 0x2bb   : > { %v1267_v9 = vadd.f32 %v1266_v7, %v1178_v6  ;;  %v1343_v10 = vadd.f32 %v1342_v8, %v1178_v6  ;;  %v2747_v11 = vpop.f32.mrb[1].mxu0  ;;  %v2752_v12 = vpop.f32.mrb[5].mxu1 }
 0x2bd   : > { %v1499_v13 = vsel %vm1146_vm2, %v1267_v9, -inf  ;;  %v1502_v14 = vsel %vm1146_vm2, %v1343_v10, -inf }
 0x2be   : > { %1500 = vmax.xlane.f32.xlu1 %v1499_v13  ;;  %v1418_v16 = vpop.f32.mrb[2].mxu0  ;;  %1503 = vmax.xlane.f32.xlu0 %v1502_v14  ;;  %v1494_v28 = vpop.f32.mrb[6].mxu1 }
 0x2bf   : > { %v1419_v17 = vadd.f32 %v1418_v16, %v1178_v6  ;;  %v1495_v18 = vadd.f32 %v1494_v28, %v1178_v6  ;;  %v2757_v19 = vpop.f32.mrb[3].mxu0  ;;  %v2762_v20 = vpop.f32.mrb[7].mxu1 }
 0x2c1   : > { %v1505_v21 = vsel %vm1146_vm2, %v1419_v17, -inf  ;;  %v1508_v22 = vsel %vm1146_vm2, %v1495_v18, -inf }
 0x2c2   : > { %1506 = vmax.xlane.f32.xlu1 %v1505_v21  ;;  %1509 = vmax.xlane.f32.xlu0 %v1508_v22 }
 0x34b   : > { %v1501_v24 = vpop.xlane.xlu1 %1500  ;;  %v1504_v25 = vpop.xlane.xlu0 %1503 }
 0x34c   : > { %v1518_v26 = vrot.slane %v1501_v24, %v3549_v4  ;;  %v1522_v27 = vrot.slane %v1504_v25, %v3549_v4  ;;  %v1579_v24 = vld [vmem:[#allocation5] sm:$0xf] }
 0x34e   : > { %v1531_v34 = vsel %vm1179_vm5, %v1522_v27, %v1518_v26 }
 0x34f   : > { %v1507_v29 = vpop.xlane.xlu1 %1506  ;;  %v1510_v30 = vpop.xlane.xlu0 %1509 }
 0x350   : > { %v1526_v31 = vrot.slane %v1507_v29, %v3549_v4  ;;  %v1530_v33 = vrot.slane %v1510_v30, %v3549_v4 }
 0x352   : > { %v1532_v37 = vsel %vm1180_vm6, %v1526_v31, %v1531_v34 }
 0x353   : > { %v1533_v40 = vsel %vm1182_vm7, %v1530_v33, %v1532_v37 }
 0x354   : > { %v1535_v41 = vmax.f32 %v1498_v35, %v1533_v40 }
 0x356   : > { %v1536_v43 = vsub.f32 %v1498_v35, %v1535_v41  ;;  %1968 = vst.msk [vmem:[#allocation4] sm:$0xf] %vm1151_vm4, %v1535_v41  ;;  %v1549_v44 = vrot.slane %v1535_v41, %v3566_v38  ;;  %v1542_v45 = vrot.slane %v1535_v41, %v3569_v39  ;;  %v1556_v47 = vrot.slane %v1535_v41, %v3576_v46 }
 0x357   : > { %v1563_v49 = vrot.slane %v1535_v41, %v3580_v48 }
 0x358   : > { %1551 = vbcast.lane.b32.xlu0 %v1549_v44, 256  ;;  %1544 = vbcast.lane.b32.xlu1 %v1542_v45, 256  ;;  %v1537_v2 = vmul.f32 1.442695, %v1536_v43  ;;  %v2163_v43 = vld [vmem:[%s3784_s7] sm:$0xff]  ;;  %v2164_v44 = vld [vmem:[%s3784_s7 + $0x8] sm:$0xff] }
 0x359   : > { %v2837_v45 = vpack.c.bf16 %v2164_v44, %v2163_v43 }
 0x35c   : > { %1620 = vrot.lane.b32.xlu0 %v3511_v57, %s3123_s17  ;;  %1558 = vbcast.lane.b32.xlu1 %v1556_v47, 256 }
 0x360   : > { %1772 = vrot.lane.b32.xlu0 %v3527_v61, %s3123_s17  ;;  %1565 = vbcast.lane.b32.xlu1 %v1563_v49, 256 }
 0x364   : > { %1696 = vrot.lane.b32.xlu1 %v3513_v58, %s3123_s17 }
 0x368   : > { %1848 = vrot.lane.b32.xlu1 %v3529_v62, %s3123_s17  ;;  %s3129_s17 = smov 16  }
 0x3ca   : > { %v1552_v50 = vpop.permute.xlu0 %1551  ;;  %v1545_v51 = vpop.permute.xlu1 %1544 }
 0x3cb   : > { %v1568_v32 = vsub.f32 %v1343_v10, %v1552_v50  ;;  %v1567_v52 = vsub.f32 %v1267_v9, %v1545_v51 }
 0x3cd   : > { %v1573_v53 = vmul.f32 1.442695, %v1568_v32  ;;  %v1571_v54 = vmul.f32 1.442695, %v1567_v52  ;;  %v1954_v32 = vld [vmem:[#allocation6 + $0x10] sm:$0xff] }
 0x3ce   : > { %v1621_v55 = vpop.permute.xlu0 %1620  ;;  %v1559_v56 = vpop.permute.xlu1 %1558 }
 0x3cf   : > { %2951 = vpow2.f32 %v1573_v53  ;;  %v1569_v57 = vsub.f32 %v1419_v17, %v1559_v56  ;;  %2764 = vmatpush3.msra.mxu0 %v1621_v55 }
 0x3d0   : > { %2953 = vpow2.f32 %v1571_v54  ;;  %2773 = vmatprep.subr.mxu0 %v3119_v1 }
 0x3d1   : > { %v1575_v59 = vmul.f32 1.442695, %v1569_v57 }
 0x3d2   : > { %v1566_v60 = vpop.permute.xlu1 %1565  ;;  %v1773_v7 = vpop.permute.xlu0 %1772 }
 0x3d3   : > { %2955 = vpow2.f32 %v1575_v59  ;;  %v1570_v58 = vsub.f32 %v1495_v18, %v1566_v60  ;;  %v1955_v59 = vld [vmem:[#allocation6 + $0x18] sm:$0xff] }
 0x3d5   : > { %v1577_v61 = vmul.f32 1.442695, %v1570_v58 }
 0x3d6   : > { %v1697_v62 = vpop.permute.xlu1 %1696 }
 0x3d7   : > { %2957 = vpow2.f32 %v1577_v61  ;;  %2769 = vmatpush3.msra.mxu1 %v1697_v62 }
 0x3d8   : > { %2778 = vmatprep.subr.mxu1 %v3119_v1  ;;  %2959 = vpow2.f32 %v1537_v2 }
 0x3d9   : > { %v2952_v63 = vpop.eup %2951 }
 0x3da   : > { %v2954_v3 = vpop.eup %2953  ;;  %2771 = vmatmul.mubr.msk.f32.vlgmr.msra.gmra.mrb[8].mxu1 %vm1146_vm2, %v2952_v63  ;;  %v1849_v5 = vpop.permute.xlu1 %1848  ;;  %v1584_v6 = vsel %vm1146_vm2, %v2952_v63, 0.0 }
 0x3db   : > { %2766 = vmatmul.mubr.msk.f32.vlgmr.msra.gmra.mrb[4].mxu0 %vm1146_vm2, %v2954_v3  ;;  %1585 = vadd.xlane.f32.xlu1 %v1584_v6  ;;  %v1581_v8 = vsel %vm1146_vm2, %v2954_v3, 0.0 }
 0x3dc   : > { %2774 = vmatpush3.msra.mxu0 %v1773_v7  ;;  %1582 = vadd.xlane.f32.xlu0 %v1581_v8 }
 0x3dd   : > { %v2956_v9 = vpop.eup %2955  ;;  %2779 = vmatpush3.msra.mxu1 %v1849_v5  ;;  %2775 = vmatprep.mubr.msk.f32.mxu0 %vm3118_vm0, %v3119_v1 }
 0x3de   : > { %v1587_v10 = vsel %vm1146_vm2, %v2956_v9, 0.0  ;;  %2780 = vmatprep.mubr.msk.f32.mxu1 %vm3118_vm0, %v3119_v1  ;;  %2836 = vmatprep.subr.bf16.mxu0 %v3117_v0 }
 0x3df   : > { %2776 = vmatmul.mubr.msk.f32.vlgmr.msra.gmra.mrb[6].mxu0 %vm1146_vm2, %v2956_v9  ;;  %2842 = vmatprep.subr.bf16.mxu1 %v3117_v0 }
 0x3e0   : > { %1588 = vadd.xlane.f32.xlu0 %v1587_v10  ;;  %2791 = vmatprep.mubr.msk.f32.mxu0 %vm3118_vm0, %v3119_v1 }
 0x3e1   : > { %v2958_v11 = vpop.eup %2957  ;;  %2838 = vmatpush3.bf16.msra.mxu0 %v2837_v45 }
 0x3e2   : > { %2781 = vmatmul.mubr.msk.f32.vlgmr.msra.gmra.mrb[10].mxu1 %vm1146_vm2, %v2958_v11  ;;  %v1590_v12 = vsel %vm1146_vm2, %v2958_v11, 0.0  ;;  %v2960_v13 = vpop.eup %2959  ;;  %2839 = vmatprep.subr.bf16.mxu0 %v3117_v0 }
 0x3e3   : > { %2802 = vmatprep.mubr.msk.f32.mxu1 %vm3118_vm0, %v3119_v1  ;;  %v1927_v14 = vrot.slane %v2960_v13, %v3569_v39  ;;  %v1941_v16 = vrot.slane %v2960_v13, %v3576_v46  ;;  %v1948_v28 = vrot.slane %v2960_v13, %v3580_v48  ;;  %v1934_v17 = vrot.slane %v2960_v13, %v3566_v38 }
 0x3e4   : > { %1591 = vadd.xlane.f32.xlu0 %v1590_v12  ;;  %v1580_v30 = vmul.f32 %v2960_v13, %v1579_v24 }
 0x3ec   : > { %1929 = vbcast.lane.b32.xlu1 %v1927_v14, 256 }
 0x3f0   : > { %1943 = vbcast.lane.b32.xlu1 %v1941_v16, 256 }
 0x3f4   : > { %1950 = vbcast.lane.b32.xlu1 %v1948_v28, 256 }
 0x3fa   : > { %1936 = vbcast.lane.b32.xlu0 %v1934_v17, 256 }
 0x468   : > { %v1586_v19 = vpop.xlane.xlu1 %1585 }
 0x469   : > { %v1583_v18 = vpop.xlane.xlu0 %1582  ;;  %v1604_v22 = vrot.slane %v1586_v19, %v3549_v4 }
 0x46a   : > { %v1600_v21 = vrot.slane %v1583_v18, %v3549_v4 }
 0x46c   : > { %v1613_v26 = vsel %vm1179_vm5, %v1604_v22, %v1600_v21 }
 0x46d   : > { %v1589_v20 = vpop.xlane.xlu0 %1588 }
 0x46e   : > { %v1608_v23 = vrot.slane %v1589_v20, %v3549_v4 }
 0x470   : > { %v1614_v29 = vsel %vm1180_vm6, %v1608_v23, %v1613_v26 }
 0x471   : > { %v1592_v25 = vpop.xlane.xlu0 %1591 }
 0x472   : > { %v1612_v27 = vrot.slane %v1592_v25, %v3549_v4 }
 0x474   : > { %v1615_v31 = vsel %vm1182_vm7, %v1612_v27, %v1614_v29 }
 0x475   : > { %v1617_v33 = vadd.f32 %v1615_v31, %v1580_v30  ;;  %v1937_v47 = vpop.permute.xlu0 %1936  ;;  %v2165_v31 = vld [vmem:[%s3784_s7 + $0x10] sm:$0xff] }
 0x477   : > { %1619 = vst.msk [vmem:[#allocation5] sm:$0xf] %vm1151_vm4, %v1617_v33  ;;  %v2166_v33 = vld [vmem:[%s3784_s7 + $0x18] sm:$0xff] }
 0x47e   : > { %v1972_v34 = vld [vmem:[#allocation5] sm:$0xf] }
 0x47f   : > { %2961 = vrcp.f32 %v1972_v34 }
 0x489   : > { %v2962_v35 = vpop.eup %2961 }
 0x48a   : > { %v1988_v37 = vrot.slane %v2962_v35, %v3566_v38  ;;  %v1981_v40 = vrot.slane %v2962_v35, %v3569_v39  ;;  %v2002_v41 = vrot.slane %v2962_v35, %v3580_v48  ;;  %v1995_v4 = vrot.slane %v2962_v35, %v3576_v46  ;;  %v1930_v38 = vpop.permute.xlu1 %1929  ;;  %v1953_v39 = vld [vmem:[#allocation6 + $0x8] sm:$0xff]  ;;  %v1952_v48 = vld [vmem:[#allocation6] sm:$0xff] }
 0x48b   : > { %v1957_v46 = vmul.f32 %v1953_v39, %v1937_v47  ;;  %v1956_v50 = vmul.f32 %v1952_v48, %v1930_v38 }
 0x48c   : > { %1990 = vbcast.lane.b32.xlu1 %v1988_v37, 256  ;;  %1983 = vbcast.lane.b32.xlu0 %v1981_v40, 256 }
 0x48e   : > { %v1944_v49 = vpop.permute.xlu1 %1943 }
 0x48f   : > { %v1958_v57 = vmul.f32 %v1954_v32, %v1944_v49 }
 0x490   : > { %2004 = vbcast.lane.b32.xlu1 %v2002_v41, 256  ;;  %1997 = vbcast.lane.b32.xlu0 %v1995_v4, 256  ;;  %v2840_v41 = vpack.c.bf16 %v2166_v33, %v2165_v31  ;;  %v2664_v31 = vld [vmem:[%s3833_s0] ss:$0 sm:$0xff]  ;;  %s3836_s0 = sld [smem:[#allocation25_spill]] }
 0x492   : > { %v1951_v60 = vpop.permute.xlu1 %1950  ;;  %2841 = vmatpush3.bf16.msra.mxu0 %v2840_v41 }
 0x493   : > { %v1959_v63 = vmul.f32 %v1955_v59, %v1951_v60  ;;  %2848 = vmatprep.subr.bf16.mxu0 %v3117_v0 }
 0x4ad   : > { %v1768_v51 = vpop.f32.mrb[8].mxu1 }
 0x4ae   : > { %v1692_v52 = vpop.f32.mrb[4].mxu0  ;;  %v1961_v53 = vadd.f32 %v1957_v46, %v1768_v51  ;;  %v2772_v54 = vpop.f32.mrb[9].mxu1 }
 0x4af   : > { %v1960_v55 = vadd.f32 %v1956_v50, %v1692_v52  ;;  %v2767_v56 = vpop.f32.mrb[5].mxu0 }
 0x4b0   : > { %1965 = vst.msk [vmem:[#allocation6 + $0x8] sm:$0xff] %vm1146_vm2, %v1961_v53 }
 0x4b1   : > { %1964 = vst.msk [vmem:[#allocation6] sm:$0xff] %vm1146_vm2, %v1960_v55 }
 0x4b2   : > { %v1844_v58 = vpop.f32.mrb[6].mxu0 }
 0x4b3   : > { %v1962_v61 = vadd.f32 %v1958_v57, %v1844_v58  ;;  %v2777_v62 = vpop.f32.mrb[7].mxu0 }
 0x4b5   : > { %1966 = vst.msk [vmem:[#allocation6 + $0x10] sm:$0xff] %vm1146_vm2, %v1962_v61  ;;  %v1920_v2 = vpop.f32.mrb[10].mxu1 }
 0x4b6   : > { %v1963_v3 = vadd.f32 %v1959_v63, %v1920_v2  ;;  %v2782_v5 = vpop.f32.mrb[11].mxu1 }
 0x4b7   : > { %v1975_v8 = vld [vmem:[#allocation6 + $0x8] sm:$0xff] }
 0x4b8   : > { %1967 = vst.msk [vmem:[#allocation6 + $0x18] sm:$0xff] %vm1146_vm2, %v1963_v3  ;;  %v1974_v9 = vld [vmem:[#allocation6] sm:$0xff] }
 0x4bc   : > { %v1976_v12 = vld [vmem:[#allocation6 + $0x10] sm:$0xff] }
 0x4bf   : > { %v1977_v11 = vld [vmem:[#allocation6 + $0x18] sm:$0xff] }
 0x4fe   : > { %v1991_v6 = vpop.permute.xlu1 %1990  ;;  %v1984_v7 = vpop.permute.xlu0 %1983 }
 0x4ff   : > { %v2007_v14 = vmul.f32 %v1991_v6, %v1975_v8  ;;  %v2006_v16 = vmul.f32 %v1984_v7, %v1974_v9 }
 0x502   : > { %v2005_v10 = vpop.permute.xlu1 %2004  ;;  %v1998_v13 = vpop.permute.xlu0 %1997 }
 0x503   : > { %v2009_v28 = vmul.f32 %v2005_v10, %v1977_v11  ;;  %v2008_v17 = vmul.f32 %v1998_v13, %v1976_v12  ;;  %v2281_v13 = vld [vmem:[#allocation10 + $0x8] sm:$0xff] }
 0x505   : > { %v2026_v18 = vcombine.low %v2007_v14, %v2009_v28  ;;  %v2027_v19 = vcombine.high %v2007_v14, %v2009_v28  ;;  %v2010_v20 = vcombine.low %v2006_v16, %v2008_v17  ;;  %v2011_v21 = vcombine.high %v2006_v16, %v2008_v17  ;;  %v2282_v16 = vld [vmem:[#allocation10 + $0x10] sm:$0xff]  ;;  %v2283_v28 = vld [vmem:[#allocation10 + $0x18] sm:$0xff] }
 0x506   : > { %v2846_v17 = vpack.c.bf16 %v2283_v28, %v2282_v16 }
 0x507   : > { %v2034_v22 = vrot.slane %v2026_v18, %v3468_v36  ;;  %v2041_v23 = vrot.slane %v2027_v19, %v3468_v36  ;;  %v2018_v24 = vrot.slane %v2010_v20, %v3468_v36  ;;  %v2025_v25 = vrot.slane %v2011_v21, %v3468_v36  ;;  %v2366_v18 = vld [vmem:[%s3790_s13 + $0x8] sm:$0xff]  ;;  %v2367_v19 = vld [vmem:[%s3790_s13 + $0x10] sm:$0xff]  ;;  %v2368_v21 = vld [vmem:[%s3790_s13 + $0x18] sm:$0xff] }
 0x509   : > { %v2042_v26 = vcombine.low %v2018_v24, %v2034_v22  ;;  %v2043_v27 = vcombine.high %v2018_v24, %v2034_v22  ;;  %v2058_v29 = vcombine.low %v2025_v25, %v2041_v23  ;;  %v2059_v30 = vcombine.high %v2025_v25, %v2041_v23  ;;  %v2369_v23 = vld [vmem:[%s3790_s13 + $0x20] sm:$0xff]  ;;  %v2370_v24 = vld [vmem:[%s3790_s13 + $0x28] sm:$0xff] }
 0x50a   : > { %v2852_v22 = vpack.c.bf16 %v2368_v21, %v2367_v19  ;;  %v2855_v25 = vpack.c.bf16 %v2370_v24, %v2369_v23 }
 0x50b   : > { %v2050_v34 = vrot.slane %v2042_v26, %v3471_v42  ;;  %v2057_v35 = vrot.slane %v2043_v27, %v3471_v42  ;;  %v2066_v37 = vrot.slane %v2058_v29, %v3471_v42  ;;  %v2073_v40 = vrot.slane %v2059_v30, %v3471_v42 }
 0x50d   : > { %v2078_v4 = vcombine.low %v2050_v34, %v2057_v35  ;;  %v2660_v43 = vcombine.high %v2050_v34, %v2057_v35  ;;  %v2094_v44 = vcombine.low %v2066_v37, %v2073_v40  ;;  %v2661_v45 = vcombine.high %v2066_v37, %v2073_v40  ;;  %v2665_v34 = vld [vmem:[%s3834_s10] ss:$0 sm:$0xff]  ;;  %v2372_v40 = vld [vmem:[%s3790_s13 + $0x38] sm:$0xff]  ;;  %s3837_s10 = sld [smem:[#allocation26_spill]] }
 0x50f   : > { %v2085_v38 = vrot.slane %v2078_v4, %v3468_v36  ;;  %v2093_v39 = vrot.slane %v2660_v43, %v3468_v36  ;;  %v2101_v47 = vrot.slane %v2094_v44, %v3468_v36  ;;  %v2109_v48 = vrot.slane %v2661_v45, %v3468_v36  ;;  %v2666_v4 = vld [vmem:[%s3835_s19] ss:$0 sm:$0xff] }
 0x511   : > { %v2111_v49 = vcombine.high %v2085_v38, %v2093_v39  ;;  %v2127_v46 = vcombine.high %v2101_v47, %v2109_v48  ;;  %v2110_v50 = vcombine.low %v2085_v38, %v2093_v39  ;;  %v2126_v51 = vcombine.low %v2101_v47, %v2109_v48  ;;  %v2668_v39 = vld [vmem:[%s3836_s0] ss:$0 sm:$0xff] }
 0x513   : > { %v2125_v32 = vrot.slane %v2111_v49, %v3471_v42  ;;  %v2141_v52 = vrot.slane %v2127_v46, %v3471_v42  ;;  %v2118_v53 = vrot.slane %v2110_v50, %v3471_v42  ;;  %v2134_v54 = vrot.slane %v2126_v51, %v3471_v42  ;;  %v2662_v42 = vld [vmem:[%s3785_s8] ss:$0 sm:$0xff] }
 0x515   : > { %v2144_v55 = vcombine.low %v2125_v32, %v2141_v52  ;;  %v2143_v56 = vcombine.high %v2118_v53, %v2134_v54  ;;  %v2142_v57 = vcombine.low %v2118_v53, %v2134_v54  ;;  %v2145_v36 = vcombine.high %v2125_v32, %v2141_v52 }
 0x517   : > { %2151 = vrot.lane.b32.xlu1 %v2144_v55, %s3129_s17  ;;  %2147 = vrot.lane.b32.xlu0 %v2143_v56, %s3130_s12  ;;  %s2673_s17 = sshll.u32 %s3103_s27, 7  ;;  %s650_s12 = scalar_lea.vmem [#allocation12], %s2635_s16 }
 0x518   : > { %s3727_s0 = scalar_lea.hbm %s3839_s9, %s2673_s17  ;;  %s3132_s27 = smov [#allocation12]  }
 0x519   : > { %s3029_s16 = sshll.u32 %s3132_s27, 4  ;;  %s3030_s16 = int_to_ptr.vmem [resolvable:$false] %s3029_s16 }
 0x51b   : > { %2155 = vrot.lane.b32.xlu0 %v2145_v36, %s3131_s23  ;;  %s2500_s23 = sshll.u32 %s650_s12, 4  ;;  %s3729_s23 = int_to_ptr.vmem [resolvable:$true] %s2500_s23 }
 0x51c   : > { %s3025_s24 = scalar_lea.vmem %s3729_s23, 128  ;;  %p3032_p11 = scmp.lt.s32.totalorder %s3729_s23, %s3030_s16 }
 0x51d   : > { %p3026_p6 = scmp.ne.s32.totalorder %s3729_s23, %s3025_s24 }
 0x51f   : > { %p3027_p8 = pnand %p3026_p6, %p3319_p10 }
 0x521   : > { %p3028_p12 = pneg %p3027_p8 }
 0x589   : > { %v2148_v59 = vpop.permute.xlu0 %2147  ;;  %v2152_v60 = vpop.permute.xlu1 %2151 }
 0x58a   : > { %v2158_v58 = vsel %vm1146_vm2, %v2142_v57, %v2148_v59  ;;  %v2670_v59 = vld [vmem:[%s3837_s10] ss:$0 sm:$0xff]  ;;  %s3031_s10 = scalar_lea.vmem %s3030_s16, 256 }
 0x58b   : > { %v2160_v62 = vsel %vm905_vm3, %v2158_v58, %v2152_v60  ;;  %v2671_v58 = vld [vmem:[%s3838_s21] ss:$0 sm:$0xff]  ;;  %p3033_p0 = scmp.lt.s32.totalorder %s3031_s10, %s3025_s24 }
 0x58d   : > { %v2156_v61 = vpop.permute.xlu0 %2155  ;;  %p3034_p5 = por %p3033_p0, %p3032_p11 }
 0x58e   : > { %v2162_v63 = vsel %vm2161_vm8, %v2160_v62, %v2156_v61 }
 0x58f   : > { %2792 = vmatmul.mubr.msk.f32.vlgmr.msra.gmra.mrb[8].mxu0 %vm683_vm1, %v2162_v63  ;;  %p3035_p9 = pnand %p3034_p5, %p3028_p12 }
 0x590   : > { %2821 = vmatprep.mubr.msk.f32.mxu0 %vm3118_vm0, %v3119_v1  ;;  %v2280_v1 = vld [vmem:[#allocation10] sm:$0xff] }
 0x591   : > { %v2843_v14 = vpack.c.bf16 %v2281_v13, %v2280_v1 }
 0x593   : > { %2844 = vmatpush3.bf16.msra.mxu1 %v2843_v14 }
 0x594   : > { %2845 = vmatprep.subr.bf16.mxu1 %v3117_v0 }
 0x597   : > { %2847 = vmatpush3.bf16.msra.mxu1 %v2846_v17 }
 0x662   : > { %v2244_v2 = vpop.f32.mrb[8].mxu0 }
 0x663   : > { %v2245_v3 = vadd.f32 %v2662_v42, %v2244_v2  ;;  %v2793_v5 = vpop.f32.mrb[9].mxu0 }
 0x665   : > { %v2249_v6 = vadd.f32 %v2245_v3, %v3432_v15  ;;  %v2365_v15 = vld [vmem:[%s3790_s13] sm:$0xff] }
 0x666   : > { %v2849_v20 = vpack.c.bf16 %v2366_v18, %v2365_v15 }
 0x667   : > { %v2252_v7 = vsel %vm683_vm1, %v2249_v6, 0.0 }
 0x668   : > { %2253 = vadd.xlane.f32.xlu1 %v2252_v7  ;;  %2850 = vmatpush3.bf16.msra.mxu0 %v2849_v20 }
 0x669   : > { %2851 = vmatprep.subr.bf16.mxu0 %v3117_v0 }
 0x66c   : > { %2853 = vmatpush3.bf16.msra.mxu0 %v2852_v22 }
 0x66d   : > { %2854 = vmatprep.subr.bf16.mxu0 %v3117_v0 }
 0x670   : > { %2856 = vmatpush3.bf16.msra.mxu0 %v2855_v25 }
 0x671   : > { %2857 = vmatprep.subr.bf16.mxu0 %v3117_v0  ;;  %v2371_v0 = vld [vmem:[%s3790_s13 + $0x30] sm:$0xff] }
 0x672   : > { %v2858_v41 = vpack.c.bf16 %v2372_v40, %v2371_v0 }
 0x674   : > { %2859 = vmatpush3.bf16.msra.mxu0 %v2858_v41 }
 0x6f5   : > { %v2254_v8 = vpop.xlane.xlu1 %2253 }
 0x6f6   : > { %v2256_v9 = vmul.f32 0.03125, %v2254_v8 }
 0x6f8   : > { %v2257_v10 = vsub.f32 %v2249_v6, %v2256_v9 }
 0x6fa   : > { %v2258_v11 = vmul.f32 %v2257_v10, %v2257_v10 }
 0x6fc   : > { %v2259_v12 = vsel %vm683_vm1, %v2258_v11, 0.0 }
 0x6fd   : > { %2260 = vadd.xlane.f32.xlu0 %v2259_v12 }
 0x78a   : > { %v2261_v26 = vpop.xlane.xlu0 %2260 }
 0x78b   : > { %v2262_v27 = vmul.f32 0.03125, %v2261_v26 }
 0x78d   : > { %v2263_v29 = vadd.f32 1e-05, %v2262_v27 }
 0x78f   : > { %2963 = vrsqrt.f32 %v2263_v29 }
 0x799   : > { %v2964_v30 = vpop.eup %2963 }
 0x79a   : > { %v2265_v33 = vmul.f32 %v2964_v30, %v2257_v10 }
 0x79c   : > { %v2272_v35 = vmul.f32 %v2664_v31, %v2265_v33 }
 0x79e   : > { %v2279_v37 = vadd.f32 %v2665_v34, %v2272_v35 }
 0x7a0   : > { %2803 = vmatmul.mubr.msk.f32.vlgmr.msra.gmra.mrb[12].mxu1 %vm683_vm1, %v2279_v37 }
 0x873   : > { %v2360_v43 = vpop.f32.mrb[12].mxu1 }
 0x874   : > { %v2361_v44 = vadd.f32 %v2666_v4, %v2360_v43  ;;  %v2804_v45 = vpop.f32.mrb[13].mxu1 }
 0x876   : > { %v2364_v38 = vmax.f32 %v2361_v44, 0.0 }
 0x878   : > { %2822 = vmatmul.mubr.msk.f32.vlgmr.msra.gmra.mrb[10].mxu0 %vm2380_vm9, %v2364_v38 }
 0x94b   : > { %v2450_v47 = vpop.f32.mrb[10].mxu0 }
 0x94c   : > { %v2451_v48 = vadd.f32 %v2668_v39, %v2450_v47  ;;  %v2823_v49 = vpop.f32.mrb[11].mxu0 }
 0x94e   : > { %v2454_v46 = vadd.f32 %v2451_v48, %v2279_v37 }
 0x950   : > { %v2457_v50 = vsel %vm683_vm1, %v2454_v46, 0.0 }
 0x951   : > { %2458 = vadd.xlane.f32.xlu0 %v2457_v50 }
 0x9de   : > { %v2459_v51 = vpop.xlane.xlu0 %2458 }
 0x9df   : > { %v2460_v32 = vmul.f32 0.03125, %v2459_v51 }
 0x9e1   : > { %v2461_v52 = vsub.f32 %v2454_v46, %v2460_v32 }
 0x9e3   : > { %v2462_v53 = vmul.f32 %v2461_v52, %v2461_v52 }
 0x9e5   : > { %v2463_v54 = vsel %vm683_vm1, %v2462_v53, 0.0 }
 0x9e6   : > { %2464 = vadd.xlane.f32.xlu1 %v2463_v54 }
 0xa73   : > { %v2465_v55 = vpop.xlane.xlu1 %2464 }
 0xa74   : > { %v2466_v56 = vmul.f32 0.03125, %v2465_v55 }
 0xa76   : > { %v2467_v57 = vadd.f32 1e-05, %v2466_v56 }
 0xa78   : > { %2965 = vrsqrt.f32 %v2467_v57 }
 0xa82   : > { %v2966_v36 = vpop.eup %2965 }
 0xa83   : > { %v2469_v60 = vmul.f32 %v2966_v36, %v2461_v52 }
 0xa85   : > { %v2476_v61 = vmul.f32 %v2670_v59, %v2469_v60 }
 0xa87   : > { %v2483_v62 = vadd.f32 %v2671_v58, %v2476_v61 }
 0xa89   : > { %2484 = vst.msk [vmem:[%s650_s12] sm:$0xff] %vm683_vm1, %v2483_v62 }
 0xa8a   : > { %3038 = shalt.err (!%p3035_p9)
}
 0xa8b   : > { %s3039_s30 = scalar_lea.hbm %s3727_s0, 128  ;;  %s3043_s21 = scalar_lea.hbm %s3839_s9, 256 }
 0xa8c   : > { %p3040_p1 = scmp.ne.s32.totalorder %s3727_s0, %s3039_s30  ;;  %p3044_p3 = scmp.lt.u32.totalorder %s3727_s0, %s3839_s9 }
 0xa8d   : > { %p3045_p13 = scmp.lt.u32.totalorder %s3043_s21, %s3039_s30  ;;  %p3047_p6 = scmp.lt.u32.totalorder %s3039_s30, %s3727_s0 }
 0xa8e   : > { %p3041_p2 = pnand %p3040_p1, %p3319_p10 }
 0xa8f   : > { %p3046_p4 = por %p3045_p13, %p3044_p3 }
 0xa90   : > { %p3042_p7 = pneg %p3041_p2 }
 0xa91   : > { %p3048_p8 = por %p3047_p6, %p3046_p4 }
 0xa93   : > { %p3049_p12 = pnand %p3048_p8, %p3042_p7 }
 0xa95   : > { %3052 = shalt.err (!%p3049_p12)
}
 0xa96   : > { %2866 = dma.vmem_to_hbm [thread:$0]  (%p3319_p10), %s3729_s23, 128, %s3727_s0, %s2486_s14  }
 0xa97 PF: > { %s3840_s19 = sld [smem:[#allocation16_spill]]  ;;  %s3841_s22 = sld [smem:[#allocation17_spill]] }
 0xa98   : > { %p3843_p0 = scmp.ge.s32.totalorder %s3111_s29, 2 }
 0xa9d   : > { %s2512_s24 = sand.u32 1, %s3840_s19   ;;  %p3842_p11 = scmp.ne.s32.totalorder %s3841_s22, 0 }
 0xa9e   : > { %s2513_s27 = scalar_lea.sflag [#allocation9], %s2512_s24 }
 0xa9f   : > { %p2877_p5 = pnand %p3843_p0, %p3842_p11 }
 0xaa1   : > { %3086 = dma.done.wait (!%p2877_p5), %s2513_s27, 128  }
 0xaa2   : > { %3088 = vsyncadd (!%p2877_p5), %s2513_s27, 4294967168  ;;  %s34_s29 = sadd.s32 1, %s3111_s29   ;;  %s3844_s20 = sld [smem:[#allocation18_spill]] }
 0xaa3   : > { %p31_p9 = scmp.ge.s32.totalorder %s34_s29, 4   ;;  %s3845_s24 = smov %s3095_s25 }
 0xaa4   : > { %s3846_s25 = smov %s3099_s26  ;;  %s3847_s26 = smov %s3328_s15 }
 0xaa5   : > { %s3848_s27 = smov %s3107_s28  ;;  %33 = sbr.rel (!%p31_p9) target bundleno = 18 (0x12), region = 157 }
 0xaa8   : > { %s3849_s28 = smov %s3844_s20 }
 0xaac   :  { %2518 = vsyncpa [#allocation8], 1 }
 0xaad   :  { %2520 = vsyncpa [#allocation8 + $0x1], 1 }
 0xaae   :  { %2521 = vsyncpa [#allocation11], 1 }
 0xaaf   :  { %2522 = vsyncpa [#allocation9], 1 }
 0xab0   :  { %2524 = vsyncpa [#allocation9 + $0x1], 1 }

// kernel: tpu_custom_call.1
= control target key start
LH: loop header
LB: loop body
LE: loop exit
PB: predicated region body
PF: predicated region fallthrough
CT: control target
= control target key end

     0   :  { %s3777_s0 = inlined_call_operand.vmem [shape: f32[2,8,32], index: 0, kind: input, shape index: {}]   ;;  %s3778_s1 = inlined_call_operand.hbm [shape: f32[2,8,32], index: 1, kind: input, shape index: {}]   ;;  %s3779_s2 = inlined_call_operand.vmem [shape: f32[2,8,1], index: 2, kind: input, shape index: {}]   ;;  %s3780_s3 = inlined_call_operand.vmem [shape: f32[32,32], index: 3, kind: input, shape index: {}]   ;;  %s3781_s4 = inlined_call_operand.vmem [shape: f32[1,32], index: 4, kind: input, shape index: {}]   ;;  %s3782_s5 = inlined_call_operand.vmem [shape: f32[32,64], index: 5, kind: input, shape index: {}]   ;;  %s3783_s6 = inlined_call_operand.vmem [shape: f32[1,64], index: 6, kind: input, shape index: {}]   ;;  %s3784_s7 = inlined_call_operand.vmem [shape: f32[32,32], index: 7, kind: input, shape index: {}]   ;;  %s3785_s8 = inlined_call_operand.vmem [shape: f32[1,32], index: 8, kind: input, shape index: {}]   ;;  %s3786_s9 = inlined_call_operand.vmem [shape: f32[1,32], index: 9, kind: input, shape index: {}]   ;;  %s3787_s10 = inlined_call_operand.vmem [shape: f32[1,32], index: 10, kind: input, shape index: {}]   ;;  %s3788_s11 = inlined_call_operand.hbm [shape: f32[32,64], index: 11, kind: input, shape index: {}]   ;;  %s3789_s12 = inlined_call_operand.vmem [shape: f32[1,64], index: 12, kind: input, shape index: {}]   ;;  %s3790_s13 = inlined_call_operand.vmem [shape: f32[64,32], index: 13, kind: input, shape index: {}]   ;;  %s3791_s14 = inlined_call_operand.vmem [shape: f32[1,32], index: 14, kind: input, shape index: {}]   ;;  %s3792_s15 = inlined_call_operand.vmem [shape: f32[1,32], index: 15, kind: input, shape index: {}]   ;;  %s3793_s16 = inlined_call_operand.vmem [shape: f32[1,32], index: 16, kind: input, shape index: {}]   ;;  %s3794_s17 = inlined_call_operand.hbm [shape: f32[2,8,32], index: 17, kind: output, shape index: {}]  }
   0x1   :  { %3804 = sst [smem:[#allocation19_spill]] %s3777_s0 }
   0x2   :  { %3805 = sst [smem:[#allocation20_spill]] %s3778_s1 }
   0x3   :  { %3806 = sst [smem:[#allocation21_spill]] %s3786_s9 }
   0x4   :  { %3807 = sst [smem:[#allocation22_spill]] %s3787_s10 }
   0x5   :  { %3808 = sst [smem:[#allocation23_spill]] %s3788_s11 }
   0x6   :  { %3809 = sst [smem:[#allocation24_spill]] %s3789_s12 }
   0x7   :  { %3810 = sst [smem:[#allocation25_spill]] %s3791_s14 }
   0x8   :  { %3811 = sst [smem:[#allocation26_spill]] %s3792_s15 }
   0x9   :  { %3812 = sst [smem:[#allocation27_spill]] %s3793_s16 }
   0xa   :  { %3813 = sst [smem:[#allocation28_spill]] %s3794_s17 }
   0xb   :  { %22 = vsyncpa [#allocation8], 0 }
   0xc   :  { %24 = vsyncpa [#allocation8 + $0x1], 0 }
   0xd   :  { %25 = vsyncpa [#allocation11], 0 }
   0xe   :  { %26 = vsyncpa [#allocation9], 0 }
   0xf   :  { %28 = vsyncpa [#allocation9 + $0x1], 0  ;;  %s3223_s24 = smov 0   ;;  %s3225_s25 = smov 0  }
  0x10   :  { %s3227_s26 = smov 0   ;;  %s3229_s27 = smov 0  }
  0x11   :  { %s3231_s28 = smov 0   ;;  %s3233_s29 = smov 0  }
  0x12 LB: > { %3814 = sst [smem:[#allocation16_spill]] %s3091_s24  ;;  %s2627_s0 = sadd.s32 4294967295, %s3111_s29   ;;  %s3111_s29 = sphi %s3233_s29, %s34_s29   ;;  %s3107_s28 = sphi %s3231_s28, %s3849_s28   ;;  %s3103_s27 = sphi %s3229_s27, %s3848_s27   ;;  %s3099_s26 = sphi %s3227_s26, %s3847_s26   ;;  %s3095_s25 = sphi %s3225_s25, %s3846_s25   ;;  %s3091_s24 = sphi %s3223_s24, %s3845_s24  }
  0x13   : > { %s2628_s30 = sadd.s32 4294967294, %s3111_s29   ;;  %p107_p0 = scmp.ne.s32.totalorder %s3095_s25, %s3091_s24 }
  0x14   : > { %p3257_p1 = scmp.eq.s32.totalorder %s2627_s0, 0  ;;  %p3261_p2 = scmp.eq.s32.totalorder %s2627_s0, 1 }
  0x15   : > { %p461_p3 = scmp.eq.s32.totalorder %s2628_s30, 1  ;;  %p2629_p5 = scmp.ge.s32.totalorder %s3111_s29, 1 }
  0x16   : > { %s3815_s18 = scalar_select %p3257_p1, 1, 0 }
  0x17   : > { %s3816_s19 = scalar_select %p3261_p2, 1, 0 }
  0x18   : > { %p3267_p4 = por %p3257_p1, %p107_p0  ;;  %p3272_p6 = por %p461_p3, %p107_p0 }
  0x19   : > { %p468_p7 = scmp.lt.s32.totalorder %s3111_s29, 3  ;;  %s3113_s22 = smov [#allocation10]  }
  0x1a   : > { %s3817_s1 = scalar_select %p3267_p4, 1, 0 }
  0x1b   : > { %s3818_s20 = scalar_select %p3272_p6, 1, 0 }
  0x1c   : > { %p3277_p8 = pnand %p2629_p5, %p468_p7  ;;  %s504_s23 = sshll.u32 %s3113_s22, 4  ;;  %s505_s23 = int_to_ptr.vmem [resolvable:$true] %s504_s23 }
  0x1d   : > { %3819 = sst [smem:[#allocation17_spill]] %s3818_s20  ;;  %s53_s30 = sadd.s32 1, %s3107_s28 }
  0x1e   : > { %s3820_s21 = scalar_select %p3277_p8, 1, 0 }
  0x1f   : > { %p2868_p9 = pneg %p3277_p8  ;;  %s3822_s11 = sld [smem:[#allocation23_spill]] }
  0x21   : > { %p3286_p11 = pnand %p2868_p9, %p3257_p1 }
  0x23   : > { %p2969_p13 = pneg %p3286_p11 }
  0x25   : > { %s2967_s17 = scalar_lea.hbm %s3822_s11, 512 }
  0x26   : > { %p2968_p12 = scmp.ne.s32.totalorder %s3822_s11, %s2967_s17  ;;  %p2974_p5 = scmp.lt.u32.totalorder %s2967_s17, %s3822_s11 }
  0x28   : > { %p2970_p0 = pnand %p2969_p13, %p2968_p12 }
  0x2a   : > { %p2971_p3 = pneg %p2970_p0 }
  0x2c   : > { %p2976_p7 = pnand %p2974_p5, %p2971_p3 }
  0x2e   : > { %2979 = shalt.err (!%p2976_p7)
}
  0x2f   : > { %s2980_s12 = scalar_lea.vmem %s505_s23, 512  ;;  %p2988_p1 = scmp.lt.s32.totalorder %s505_s23, %s505_s23 }
  0x30   : > { %p2981_p9 = scmp.ne.s32.totalorder %s505_s23, %s2980_s12  ;;  %p2989_p4 = scmp.lt.s32.totalorder %s2980_s12, %s2980_s12 }
  0x32   : > { %p2983_p10 = pnand %p2981_p9, %p2969_p13  ;;  %p2990_p8 = por %p2989_p4, %p2988_p1 }
  0x34   : > { %p2984_p6 = pneg %p2983_p10 }
  0x36   : > { %p2991_p2 = pnand %p2990_p8, %p2984_p6 }
  0x38   : > { %2994 = shalt.err (!%p2991_p2)
}
  0x39   : > { %s3114_s15 = smov 128   ;;  %s3115_s14 = smov 8  }
  0x3a   : > { %2871 = dma.hbm_to_vmem [thread:$0]  (!%p3286_p11), %s3822_s11, 512, %s505_s23, [#allocation11], %s3114_s15, %s3114_s15, %s3115_s14  }
  0x3b   : > { %p55_p1 = scmp.ge.s32.totalorder %s53_s30, 2  ;;  %s94_s12 = sadd.s32 1, %s3099_s26 }
  0x3c   : > { %p101_p2 = scmp.ne.s32.totalorder %s3099_s26, %s3095_s25  ;;  %p102_p4 = scmp.eq.s32.totalorder %s3111_s29, 0 }
  0x3d   : > { %s3851_s30 = smov (%p55_p1, %s53_s30), 0  ;;  %p3825_p8 = scmp.ne.s32.totalorder %s3816_s19, 0 }
  0x3e   : > { %3823 = sst [smem:[#allocation18_spill]] %s3851_s30  ;;  %p3313_p6 = por %p102_p4, %p101_p2 }
  0x3f   : > { %p3319_p10 = por %p3825_p8, %p101_p2  ;;  %s89_s0 = ssub.s32 %s3107_s28, %s3851_s30 }
  0x40   : > { %p2881_p12 = scmp.lt.s32.totalorder %s3111_s29, 2  ;;  %p92_p11 = scmp.eq.s32.totalorder %s89_s0, 0 }
  0x41   : > { %s543_s23 = sand.u32 1, %s3099_s26   ;;  %s2633_s14 = sshll.u32 %s3107_s28, 7 }
  0x42   : > { %s2632_s22 = sshll.u32 %s543_s23, 3  ;;  %s3827_s11 = sld [smem:[#allocation20_spill]] }
  0x43   : > { %s3328_s15 = scalar_select %p92_p11, %s3099_s26, %s94_s12  }
  0x44   : > { %s547_s19 = scalar_lea.vmem [#allocation7], %s2632_s22  ;;  %p3340_p13 = pnand %p2881_p12, %p3313_p6 }
  0x45   : > { %s557_s9 = sshll.u32 %s547_s19, 4  ;;  %s544_s12 = scalar_lea.sflag [#allocation8], %s543_s23  ;;  %s3336_s9 = int_to_ptr.vmem [resolvable:$true] %s557_s9 }
  0x46   : > { %p2997_p3 = pneg %p3340_p13 }
  0x48   : > { %s3334_s10 = scalar_lea.hbm %s3827_s11, %s2633_s14  ;;  %s3000_s16 = scalar_lea.hbm %s3827_s11, 256 }
  0x49   : > { %s2995_s30 = scalar_lea.hbm %s3334_s10, 128  ;;  %p3001_p9 = scmp.lt.u32.totalorder %s3334_s10, %s3827_s11 }
  0x4a   : > { %p2996_p0 = scmp.ne.s32.totalorder %s3334_s10, %s2995_s30  ;;  %p3002_p1 = scmp.lt.u32.totalorder %s3000_s16, %s2995_s30 }
  0x4b   : > { %p3004_p4 = scmp.lt.u32.totalorder %s2995_s30, %s3334_s10 }
  0x4c   : > { %p2998_p5 = pnand %p2997_p3, %p2996_p0  ;;  %p3003_p2 = por %p3002_p1, %p3001_p9 }
  0x4e   : > { %p2999_p7 = pneg %p2998_p5  ;;  %p3005_p6 = por %p3004_p4, %p3003_p2 }
  0x50   : > { %p3006_p8 = pnand %p3005_p6, %p2999_p7 }
  0x52   : > { %3009 = shalt.err (!%p3006_p8)
}
  0x53   : > { %s3010_s23 = scalar_lea.vmem %s3336_s9, 128  ;;  %s3116_s19 = smov [#allocation7]  }
  0x54   : > { %p3011_p12 = scmp.ne.s32.totalorder %s3336_s9, %s3010_s23  ;;  %s3015_s22 = sshll.u32 %s3116_s19, 4  ;;  %s3016_s22 = int_to_ptr.vmem [resolvable:$false] %s3015_s22 }
  0x55   : > { %s3017_s14 = scalar_lea.vmem %s3016_s22, 256  ;;  %p3018_p5 = scmp.lt.s32.totalorder %s3336_s9, %s3016_s22 }
  0x56   : > { %p3013_p11 = pnand %p3011_p12, %p2997_p3  ;;  %p3019_p9 = scmp.lt.s32.totalorder %s3017_s14, %s3010_s23 }
  0x58   : > { %p3014_p0 = pneg %p3013_p11  ;;  %p3020_p1 = por %p3019_p9, %p3018_p5 }
  0x5a   : > { %p3021_p2 = pnand %p3020_p1, %p3014_p0 }
  0x5c   : > { %3024 = shalt.err (!%p3021_p2)
}
  0x5d   : > { %2875 = dma.hbm_to_vmem [thread:$0]  (!%p3340_p13), %s3334_s10, 128, %s3336_s9, %s544_s12  }
  0x5e   : > { %p3829_p7 = scmp.ne.s32.totalorder %s3820_s21, 0 }
  0x5f   : > { %s3372_s30 = sand.u32 (!%p3829_p7), 1, %s3095_s25   ;;  %p3830_p3 = scmp.ne.s32.totalorder (!%p3829_p7), %s3817_s1, 0 }
  0x60   : > { %576 = sbr.rel (%p3829_p7) target bundleno = 2711 (0xa97), region = 88  ;;  %s2635_s16 = sshll.u32 (!%p3829_p7), %s3372_s30, 3 }
  0x61   : > { %s579_s24 = scalar_lea.sflag (!%p3829_p7), [#allocation8], %s3372_s30  ;;  %s582_s17 = scalar_lea.vmem (!%p3829_p7), [#allocation7], %s2635_s16 }
  0x67   : > { %3078 = dma.done.wait (%p3830_p3), %s579_s24, 128  }
  0x68   : > { %3080 = vsyncadd (%p3830_p3), %s579_s24, 4294967168  ;;  %p3831_p13 = scmp.ne.s32.totalorder %s3815_s18, 0 }
  0x6a   : > { %3082 = dma.done.wait (%p3831_p13), [#allocation11], 512  }
  0x6b   : > { %3084 = vsyncadd (%p3831_p13), [#allocation11], 4294966784  ;;  %v3117_v0 = vmov 0.0|0.0   ;;  %vm3118_vm0 = vmmov 0   ;;  %v3119_v1 = vmov 0.0   ;;  %v672_v2 = vld [vmem:[%s3782_s5] sm:$0xff]  ;;  %v772_v28 = vlaneseq }
  0x6c   : > { %2824 = vmatprep.subr.bf16.mxu1 %v3117_v0  ;;  %2729 = vmatprep.mubr.msk.f32.mxu1 %vm3118_vm0, %v3119_v1  ;;  %v673_v3 = vld [vmem:[%s3782_s5 + $0x8] sm:$0xff]  ;;  %v674_v4 = vld [vmem:[%s3782_s5 + $0x10] sm:$0xff]  ;;  %v675_v6 = vld [vmem:[%s3782_s5 + $0x18] sm:$0xff]  ;;  %p651_p4 = scmp.lt.s32.totalorder %s3103_s27, 1  ;;  %vm683_vm1 = vcmask 261120   ;;  %s3832_s23 = sld [smem:[#allocation19_spill]] }
  0x6d   : > { %2743 = vmatprep.subr.mxu0 %v3119_v1  ;;  %2745 = vmatprep.mubr.msk.f32.mxu0 %vm3118_vm0, %v3119_v1  ;;  %v2825_v5 = vpack.c.bf16 %v673_v3, %v672_v2  ;;  %v2828_v7 = vpack.c.bf16 %v675_v6, %v674_v4  ;;  %v915_v8 = vld [vmem:[%s3780_s3] sm:$0xff]  ;;  %v916_v9 = vld [vmem:[%s3780_s3 + $0x8] sm:$0xff]  ;;  %v917_v12 = vld [vmem:[%s3780_s3 + $0x10] sm:$0xff]  ;;  %s3120_s24 = smov 112   ;;  %s3121_s10 = smov 80   ;;  %vm1146_vm2 = vcmask 64512  }
  0x6e   : > { %s3413_s9 = scalar_select %p651_p4, %s3103_s27, 1  ;;  %v671_v10 = vld [vmem:[%s582_s17] sm:$0xff]  ;;  %v2831_v11 = vpack.c.bf16 %v916_v9, %v915_v8  ;;  %v918_v13 = vld [vmem:[%s3780_s3 + $0x18] sm:$0xff]  ;;  %v2640_v16 = vld [vmem:[%s3783_s6] ss:$0 sm:$0xff]  ;;  %1154 = vst.msk [vmem:[#allocation6] sm:$0xff] %vm1146_vm2, %v3119_v1 }
  0x6f   : > { %2826 = vmatpush3.bf16.msra.mxu1 %v2825_v5  ;;  %v2834_v14 = vpack.c.bf16 %v918_v13, %v917_v12  ;;  %v2644_v20 = vld [vmem:[%s3781_s4] ss:$0 sm:$0xff]  ;;  %s3122_s21 = smov 96   ;;  %s3123_s17 = smov 120   ;;  %1155 = vst.msk [vmem:[#allocation6 + $0x8] sm:$0xff] %vm1146_vm2, %v3119_v1  ;;  %1156 = vst.msk [vmem:[#allocation6 + $0x10] sm:$0xff] %vm1146_vm2, %v3119_v1 }
  0x70   : > { %2827 = vmatprep.subr.bf16.mxu1 %v3117_v0  ;;  %s2638_s0 = sshll.u32 %s3413_s9, 3  ;;  %1157 = vst.msk [vmem:[#allocation6 + $0x18] sm:$0xff] %vm1146_vm2, %v3119_v1  ;;  %s3124_s12 = smov 104   ;;  %v3125_v24 = vmov 0   ;;  %v3126_v26 = vmov 1983009808  }
  0x71   : > { %s666_s22 = scalar_lea.vmem %s3779_s2, %s2638_s0  ;;  %2950 = vset.pattern.permute.xlu0 %v3125_v24  ;;  %v770_v27 = vunpack.c.l.s4 %v3126_v26  ;;  %v3127_v29 = vmov 1934713408   ;;  %v3465_v32 = vshrl.u32 %v772_v28, 7  ;;  %vm905_vm3 = vcmask 130048   ;;  %s3839_s9 = sld [smem:[#allocation28_spill]] }
  0x72   : > { %s657_s19 = scalar_lea.vmem %s3832_s23, %s2638_s0  ;;  %v1168_v25 = vld [vmem:[%s666_s22] sm:$0xff]  ;;  %v802_v30 = vunpack.c.l.s4 %v3127_v29  ;;  %vm1151_vm4 = vcmask 60416   ;;  %vm1179_vm5 = vcmask 1041409   ;;  %vm1180_vm6 = vcmask 1042434   ;;  %s3131_s23 = smov 24  }
  0x73   : > { %2829 = vmatpush3.bf16.msra.mxu1 %v2828_v7  ;;  %v3432_v15 = vld [vmem:[%s657_s19] sm:$0xff]  ;;  %v771_v31 = vunpack.c.0.s8 %v770_v27  ;;  %1153 = vst.msk [vmem:[#allocation5] sm:$0xf] %vm1151_vm4, %v3119_v1  ;;  %vm1182_vm7 = vcmask 1043459   ;;  %vm2161_vm8 = vcmask 195584   ;;  %s3833_s0 = sld [smem:[#allocation21_spill]] }
  0x74   : > { %2830 = vmatprep.subr.bf16.mxu1 %v3117_v0  ;;  %v803_v35 = vunpack.c.0.s8 %v802_v30  ;;  %s3835_s19 = sld [smem:[#allocation24_spill]]  ;;  %vm2380_vm9 = vcmask 523264   ;;  %s2486_s14 = scalar_lea.sflag [#allocation9], %s3372_s30 }
  0x75   : > { %v3468_v36 = vsub.s32 %v771_v31, %v3465_v32 }
  0x76   : > { %2730 = vmatmul.mubr.msk.f32.vlgmr.msra.gmra.mrb[0].mxu1 %vm683_vm1, %v671_v10  ;;  %v3471_v42 = vsub.s32 %v803_v35, %v3465_v32 }
  0x77   : > { %2832 = vmatpush3.bf16.msra.mxu1 %v2831_v11  ;;  %2740 = vmatprep.mubr.msk.f32.mxu1 %vm3118_vm0, %v3119_v1 }
  0x78   : > { %2833 = vmatprep.subr.bf16.mxu1 %v3117_v0 }
  0x7b   : > { %2835 = vmatpush3.bf16.msra.mxu1 %v2834_v14 }
  0x7c   : > { %2748 = vmatprep.subr.mxu1 %v3119_v1 }
  0x7e   : > { %2741 = vmatmul.mubr.msk.f32.vlgmr.msra.gmra.mrb[2].mxu1 %vm683_vm1, %v3432_v15 }
  0x7f   : > { %2750 = vmatprep.mubr.msk.f32.mxu1 %vm3118_vm0, %v3119_v1 }
 0x149   : > { %v753_v17 = vpop.f32.mrb[0].mxu1 }
 0x14a   : > { %v754_v18 = vadd.f32 %v2640_v16, %v753_v17  ;;  %v2731_v19 = vpop.f32.mrb[1].mxu1 }
 0x14c   : > { %758 = vrot.lane.b32.xlu0 %v754_v18, %s3120_s24  ;;  %764 = vrot.lane.b32.xlu1 %v754_v18, %s3121_s10  ;;  %s3834_s10 = sld [smem:[#allocation22_spill]] }
 0x150   : > { %761 = vrot.lane.b32.xlu0 %v754_v18, %s3122_s21  ;;  %s3838_s21 = sld [smem:[#allocation27_spill]] }
 0x151   : > { %v996_v21 = vpop.f32.mrb[2].mxu1 }
 0x152   : > { %v3445_v22 = vadd.f32 %v2644_v20, %v996_v21  ;;  %v2742_v23 = vpop.f32.mrb[3].mxu1 }
 0x154   : > { %1004 = vrot.lane.b32.xlu0 %v3445_v22, %s3120_s24  ;;  %1001 = vrot.lane.b32.xlu1 %v3445_v22, %s3123_s17 }
 0x158   : > { %1007 = vrot.lane.b32.xlu1 %v3445_v22, %s3124_s12  ;;  %1171 = vperm.xlu0 %2950, %v1168_v25   ;;  %s3130_s12 = smov 8  }
 0x1be   : > { %v759_v33 = vpop.permute.xlu0 %758  ;;  %v765_v34 = vpop.permute.xlu1 %764 }
 0x1bf   : > { %v783_v37 = vcombine.low %v759_v33, %v765_v34  ;;  %v784_v38 = vcombine.high %v759_v33, %v765_v34 }
 0x1c1   : > { %v791_v43 = vrot.slane %v783_v37, %v3468_v36  ;;  %v798_v44 = vrot.slane %v784_v38, %v3468_v36 }
 0x1c2   : > { %v762_v39 = vpop.permute.xlu0 %761 }
 0x1c3   : > { %v767_v40 = vcombine.low %v754_v18, %v762_v39  ;;  %v768_v41 = vcombine.high %v754_v18, %v762_v39 }
 0x1c5   : > { %v775_v45 = vrot.slane %v767_v40, %v3468_v36  ;;  %v782_v46 = vrot.slane %v768_v41, %v3468_v36 }
 0x1c6   : > { %v1002_v47 = vpop.permute.xlu1 %1001  ;;  %v1005_v52 = vpop.permute.xlu0 %1004 }
 0x1c7   : > { %v799_v48 = vcombine.low %v775_v45, %v791_v43  ;;  %v800_v49 = vcombine.high %v775_v45, %v791_v43  ;;  %v815_v50 = vcombine.low %v782_v46, %v798_v44  ;;  %v816_v51 = vcombine.high %v782_v46, %v798_v44 }
 0x1c8   : > { %v1010_v57 = vcombine.low %v3445_v22, %v1005_v52  ;;  %v1011_v58 = vcombine.high %v3445_v22, %v1005_v52 }
 0x1c9   : > { %v807_v53 = vrot.slane %v799_v48, %v3471_v42  ;;  %v814_v54 = vrot.slane %v800_v49, %v3471_v42  ;;  %v823_v55 = vrot.slane %v815_v50, %v3471_v42  ;;  %v830_v56 = vrot.slane %v816_v51, %v3471_v42 }
 0x1ca   : > { %v1008_v59 = vpop.permute.xlu1 %1007  ;;  %v1018_v8 = vrot.slane %v1010_v57, %v3468_v36  ;;  %v1025_v9 = vrot.slane %v1011_v58, %v3468_v36 }
 0x1cb   : > { %v835_v60 = vcombine.low %v807_v53, %v814_v54  ;;  %v2642_v61 = vcombine.high %v807_v53, %v814_v54  ;;  %v851_v62 = vcombine.low %v823_v55, %v830_v56  ;;  %v2643_v63 = vcombine.high %v823_v55, %v830_v56 }
 0x1cc   : > { %v1026_v2 = vcombine.low %v1002_v47, %v1008_v59  ;;  %v1027_v3 = vcombine.high %v1002_v47, %v1008_v59 }
 0x1cd   : > { %v842_v4 = vrot.slane %v835_v60, %v3468_v36  ;;  %v850_v5 = vrot.slane %v2642_v61, %v3468_v36  ;;  %v858_v6 = vrot.slane %v851_v62, %v3468_v36  ;;  %v866_v7 = vrot.slane %v2643_v63, %v3468_v36 }
 0x1ce   : > { %v1034_v10 = vrot.slane %v1026_v2, %v3468_v36  ;;  %v1041_v11 = vrot.slane %v1027_v3, %v3468_v36  ;;  %v1174_v3 = vand.u32 127, %v772_v28 }
 0x1cf   : > { %v867_v12 = vcombine.low %v842_v4, %v850_v5  ;;  %v868_v13 = vcombine.high %v842_v4, %v850_v5  ;;  %v883_v14 = vcombine.low %v858_v6, %v866_v7  ;;  %v884_v16 = vcombine.high %v858_v6, %v866_v7 }
 0x1d0   : > { %v1042_v17 = vcombine.low %v1018_v8, %v1034_v10  ;;  %v1043_v18 = vcombine.high %v1018_v8, %v1034_v10  ;;  %v1058_v19 = vcombine.low %v1025_v9, %v1041_v11  ;;  %v1059_v20 = vcombine.high %v1025_v9, %v1041_v11 }
 0x1d1   : > { %v875_v21 = vrot.slane %v867_v12, %v3471_v42  ;;  %v882_v22 = vrot.slane %v868_v13, %v3471_v42  ;;  %v891_v23 = vrot.slane %v883_v14, %v3471_v42  ;;  %v898_v24 = vrot.slane %v884_v16, %v3471_v42 }
 0x1d2   : > { %v1050_v25 = vrot.slane %v1042_v17, %v3471_v42  ;;  %v1057_v26 = vrot.slane %v1043_v18, %v3471_v42  ;;  %v1066_v27 = vrot.slane %v1058_v19, %v3471_v42  ;;  %v1073_v29 = vrot.slane %v1059_v20, %v3471_v42 }
 0x1d3   : > { %v899_v30 = vcombine.low %v875_v21, %v891_v23  ;;  %v900_v31 = vcombine.high %v875_v21, %v891_v23  ;;  %v901_v33 = vcombine.low %v882_v22, %v898_v24  ;;  %v902_v34 = vcombine.high %v882_v22, %v898_v24 }
 0x1d4   : > { %v1078_v35 = vcombine.low %v1050_v25, %v1057_v26  ;;  %v2646_v37 = vcombine.high %v1050_v25, %v1057_v26  ;;  %v1094_v38 = vcombine.low %v1066_v27, %v1073_v29  ;;  %v2647_v39 = vcombine.high %v1066_v27, %v1073_v29 }
 0x1d5   : > { %906 = vst.msk [vmem:[#allocation2] sm:$0xff] %vm905_vm3, %v899_v30  ;;  %907 = vst.msk [vmem:[#allocation2 + $0x8] sm:$0xff] %vm905_vm3, %v900_v31  ;;  %v3549_v4 = vsub.s32 %v1174_v3, %v3465_v32  ;;  %v3128_v23 = vmov -1e+30  }
 0x1d6   : > { %908 = vst.msk [vmem:[#allocation2 + $0x10] sm:$0xff] %vm905_vm3, %v901_v33  ;;  %909 = vst.msk [vmem:[#allocation2 + $0x18] sm:$0xff] %vm905_vm3, %v902_v34  ;;  %v1085_v40 = vrot.slane %v1078_v35, %v3468_v36  ;;  %v1093_v41 = vrot.slane %v2646_v37, %v3468_v36  ;;  %v1101_v43 = vrot.slane %v1094_v38, %v3468_v36  ;;  %v3566_v38 = vsub.s32 1, %v3465_v32 }
 0x1d7   : > { %v1109_v44 = vrot.slane %v2647_v39, %v3468_v36  ;;  %v1172_v5 = vpop.permute.xlu0 %1171  ;;  %1152 = vst.msk [vmem:[#allocation4] sm:$0xf] %vm1151_vm4, %v3128_v23  ;;  %v3569_v39 = vsub.s32 0, %v3465_v32 }
 0x1d8   : > { %v1110_v45 = vcombine.low %v1085_v40, %v1093_v41  ;;  %v1111_v46 = vcombine.high %v1085_v40, %v1093_v41  ;;  %v1178_v6 = vrot.slane %v1172_v5, %v3549_v4 }
 0x1d9   : > { %v1126_v47 = vcombine.low %v1101_v43, %v1109_v44  ;;  %v1127_v48 = vcombine.high %v1101_v43, %v1109_v44 }
 0x1da   : > { %v1118_v49 = vrot.slane %v1110_v45, %v3471_v42  ;;  %v1125_v50 = vrot.slane %v1111_v46, %v3471_v42  ;;  %v3576_v46 = vsub.s32 2, %v3465_v32 }
 0x1db   : > { %v1134_v51 = vrot.slane %v1126_v47, %v3471_v42  ;;  %v1141_v52 = vrot.slane %v1127_v48, %v3471_v42  ;;  %v3580_v48 = vsub.s32 3, %v3465_v32 }
 0x1dc   : > { %v3511_v57 = vld [vmem:[#allocation2] sm:$0xff]  ;;  %v3513_v58 = vld [vmem:[#allocation2 + $0x8] sm:$0xff] }
 0x1dd   : > { %v1142_v53 = vcombine.low %v1118_v49, %v1134_v51  ;;  %v1143_v54 = vcombine.high %v1118_v49, %v1134_v51  ;;  %v1144_v55 = vcombine.low %v1125_v50, %v1141_v52  ;;  %v1145_v56 = vcombine.high %v1125_v50, %v1141_v52  ;;  %2744 = vmatpush3.xpose.msk.msra.mxu0 %vm1146_vm2, %v3511_v57  ;;  %v3527_v61 = vld [vmem:[#allocation2 + $0x10] sm:$0xff]  ;;  %v3529_v62 = vld [vmem:[#allocation2 + $0x18] sm:$0xff] }
 0x1de   : > { %2749 = vmatpush3.xpose.msk.msra.mxu1 %vm1146_vm2, %v3513_v58  ;;  %2753 = vmatprep.subr.mxu0 %v3119_v1  ;;  %v1498_v35 = vld [vmem:[#allocation4] sm:$0xf] }
 0x1df   : > { %1147 = vst.msk [vmem:[#allocation3] sm:$0xff] %vm1146_vm2, %v1142_v53  ;;  %1148 = vst.msk [vmem:[#allocation3 + $0x8] sm:$0xff] %vm1146_vm2, %v1143_v54  ;;  %2758 = vmatprep.subr.mxu1 %v3119_v1 }
 0x1e0   : > { %1149 = vst.msk [vmem:[#allocation3 + $0x10] sm:$0xff] %vm1146_vm2, %v1144_v55  ;;  %1150 = vst.msk [vmem:[#allocation3 + $0x18] sm:$0xff] %vm1146_vm2, %v1145_v56 }
 0x1e6   : > { %v1164_v59 = vld [vmem:[#allocation3] sm:$0xff]  ;;  %v1165_v60 = vld [vmem:[#allocation3 + $0x8] sm:$0xff] }
 0x1e7   : > { %2746 = vmatmul.mubr.msk.f32.vlgmr.msra.gmra.mrb[0].mxu0 %vm1146_vm2, %v1164_v59  ;;  %2751 = vmatmul.mubr.msk.f32.vlgmr.msra.gmra.mrb[4].mxu1 %vm1146_vm2, %v1165_v60  ;;  %v1166_v63 = vld [vmem:[#allocation3 + $0x10] sm:$0xff]  ;;  %v1167_v2 = vld [vmem:[#allocation3 + $0x18] sm:$0xff] }
 0x1e8   : > { %2754 = vmatpush3.xpose.msk.msra.mxu0 %vm1146_vm2, %v3527_v61  ;;  %2759 = vmatpush3.xpose.msk.msra.mxu1 %vm1146_vm2, %v3529_v62 }
 0x1e9   : > { %2755 = vmatprep.mubr.msk.f32.mxu0 %vm3118_vm0, %v3119_v1  ;;  %2760 = vmatprep.mubr.msk.f32.mxu1 %vm3118_vm0, %v3119_v1 }
 0x1ea   : > { %2763 = vmatprep.subr.mxu0 %v3119_v1  ;;  %2768 = vmatprep.subr.mxu1 %v3119_v1 }
 0x1eb   : > { %2756 = vmatmul.mubr.msk.f32.vlgmr.msra.gmra.mrb[2].mxu0 %vm1146_vm2, %v1166_v63  ;;  %2761 = vmatmul.mubr.msk.f32.vlgmr.msra.gmra.mrb[6].mxu1 %vm1146_vm2, %v1167_v2 }
 0x1ec   : > { %2765 = vmatprep.mubr.msk.f32.mxu0 %vm3118_vm0, %v3119_v1  ;;  %2770 = vmatprep.mubr.msk.f32.mxu1 %vm3118_vm0, %v3119_v1 }
 0x2ba   : > { %v1266_v7 = vpop.f32.mrb[0].mxu0  ;;  %v1342_v8 = vpop.f32.mrb[4].mxu1 }
 0x2bb   : > { %v1267_v9 = vadd.f32 %v1266_v7, %v1178_v6  ;;  %v1343_v10 = vadd.f32 %v1342_v8, %v1178_v6  ;;  %v2747_v11 = vpop.f32.mrb[1].mxu0  ;;  %v2752_v12 = vpop.f32.mrb[5].mxu1 }
 0x2bd   : > { %v1499_v13 = vsel %vm1146_vm2, %v1267_v9, -inf  ;;  %v1502_v14 = vsel %vm1146_vm2, %v1343_v10, -inf }
 0x2be   : > { %1500 = vmax.xlane.f32.xlu1 %v1499_v13  ;;  %v1418_v16 = vpop.f32.mrb[2].mxu0  ;;  %1503 = vmax.xlane.f32.xlu0 %v1502_v14  ;;  %v1494_v28 = vpop.f32.mrb[6].mxu1 }
 0x2bf   : > { %v1419_v17 = vadd.f32 %v1418_v16, %v1178_v6  ;;  %v1495_v18 = vadd.f32 %v1494_v28, %v1178_v6  ;;  %v2757_v19 = vpop.f32.mrb[3].mxu0  ;;  %v2762_v20 = vpop.f32.mrb[7].mxu1 }
 0x2c1   : > { %v1505_v21 = vsel %vm1146_vm2, %v1419_v17, -inf  ;;  %v1508_v22 = vsel %vm1146_vm2, %v1495_v18, -inf }
 0x2c2   : > { %1506 = vmax.xlane.f32.xlu1 %v1505_v21  ;;  %1509 = vmax.xlane.f32.xlu0 %v1508_v22 }
 0x34b   : > { %v1501_v24 = vpop.xlane.xlu1 %1500  ;;  %v1504_v25 = vpop.xlane.xlu0 %1503 }
 0x34c   : > { %v1518_v26 = vrot.slane %v1501_v24, %v3549_v4  ;;  %v1522_v27 = vrot.slane %v1504_v25, %v3549_v4  ;;  %v1579_v24 = vld [vmem:[#allocation5] sm:$0xf] }
 0x34e   : > { %v1531_v34 = vsel %vm1179_vm5, %v1522_v27, %v1518_v26 }
 0x34f   : > { %v1507_v29 = vpop.xlane.xlu1 %1506  ;;  %v1510_v30 = vpop.xlane.xlu0 %1509 }
 0x350   : > { %v1526_v31 = vrot.slane %v1507_v29, %v3549_v4  ;;  %v1530_v33 = vrot.slane %v1510_v30, %v3549_v4 }
 0x352   : > { %v1532_v37 = vsel %vm1180_vm6, %v1526_v31, %v1531_v34 }
 0x353   : > { %v1533_v40 = vsel %vm1182_vm7, %v1530_v33, %v1532_v37 }
 0x354   : > { %v1535_v41 = vmax.f32 %v1498_v35, %v1533_v40 }
 0x356   : > { %v1536_v43 = vsub.f32 %v1498_v35, %v1535_v41  ;;  %1968 = vst.msk [vmem:[#allocation4] sm:$0xf] %vm1151_vm4, %v1535_v41  ;;  %v1549_v44 = vrot.slane %v1535_v41, %v3566_v38  ;;  %v1542_v45 = vrot.slane %v1535_v41, %v3569_v39  ;;  %v1556_v47 = vrot.slane %v1535_v41, %v3576_v46 }
 0x357   : > { %v1563_v49 = vrot.slane %v1535_v41, %v3580_v48 }
 0x358   : > { %1551 = vbcast.lane.b32.xlu0 %v1549_v44, 256  ;;  %1544 = vbcast.lane.b32.xlu1 %v1542_v45, 256  ;;  %v1537_v2 = vmul.f32 1.442695, %v1536_v43  ;;  %v2163_v43 = vld [vmem:[%s3784_s7] sm:$0xff]  ;;  %v2164_v44 = vld [vmem:[%s3784_s7 + $0x8] sm:$0xff] }
 0x359   : > { %v2837_v45 = vpack.c.bf16 %v2164_v44, %v2163_v43 }
 0x35c   : > { %1620 = vrot.lane.b32.xlu0 %v3511_v57, %s3123_s17  ;;  %1558 = vbcast.lane.b32.xlu1 %v1556_v47, 256 }
 0x360   : > { %1772 = vrot.lane.b32.xlu0 %v3527_v61, %s3123_s17  ;;  %1565 = vbcast.lane.b32.xlu1 %v1563_v49, 256 }
 0x364   : > { %1696 = vrot.lane.b32.xlu1 %v3513_v58, %s3123_s17 }
 0x368   : > { %1848 = vrot.lane.b32.xlu1 %v3529_v62, %s3123_s17  ;;  %s3129_s17 = smov 16  }
 0x3ca   : > { %v1552_v50 = vpop.permute.xlu0 %1551  ;;  %v1545_v51 = vpop.permute.xlu1 %1544 }
 0x3cb   : > { %v1568_v32 = vsub.f32 %v1343_v10, %v1552_v50  ;;  %v1567_v52 = vsub.f32 %v1267_v9, %v1545_v51 }
 0x3cd   : > { %v1573_v53 = vmul.f32 1.442695, %v1568_v32  ;;  %v1571_v54 = vmul.f32 1.442695, %v1567_v52  ;;  %v1954_v32 = vld [vmem:[#allocation6 + $0x10] sm:$0xff] }
 0x3ce   : > { %v1621_v55 = vpop.permute.xlu0 %1620  ;;  %v1559_v56 = vpop.permute.xlu1 %1558 }
 0x3cf   : > { %2951 = vpow2.f32 %v1573_v53  ;;  %v1569_v57 = vsub.f32 %v1419_v17, %v1559_v56  ;;  %2764 = vmatpush3.msra.mxu0 %v1621_v55 }
 0x3d0   : > { %2953 = vpow2.f32 %v1571_v54  ;;  %2773 = vmatprep.subr.mxu0 %v3119_v1 }
 0x3d1   : > { %v1575_v59 = vmul.f32 1.442695, %v1569_v57 }
 0x3d2   : > { %v1566_v60 = vpop.permute.xlu1 %1565  ;;  %v1773_v7 = vpop.permute.xlu0 %1772 }
 0x3d3   : > { %2955 = vpow2.f32 %v1575_v59  ;;  %v1570_v58 = vsub.f32 %v1495_v18, %v1566_v60  ;;  %v1955_v59 = vld [vmem:[#allocation6 + $0x18] sm:$0xff] }
 0x3d5   : > { %v1577_v61 = vmul.f32 1.442695, %v1570_v58 }
 0x3d6   : > { %v1697_v62 = vpop.permute.xlu1 %1696 }
 0x3d7   : > { %2957 = vpow2.f32 %v1577_v61  ;;  %2769 = vmatpush3.msra.mxu1 %v1697_v62 }
 0x3d8   : > { %2778 = vmatprep.subr.mxu1 %v3119_v1  ;;  %2959 = vpow2.f32 %v1537_v2 }
 0x3d9   : > { %v2952_v63 = vpop.eup %2951 }
 0x3da   : > { %v2954_v3 = vpop.eup %2953  ;;  %2771 = vmatmul.mubr.msk.f32.vlgmr.msra.gmra.mrb[8].mxu1 %vm1146_vm2, %v2952_v63  ;;  %v1849_v5 = vpop.permute.xlu1 %1848  ;;  %v1584_v6 = vsel %vm1146_vm2, %v2952_v63, 0.0 }
 0x3db   : > { %2766 = vmatmul.mubr.msk.f32.vlgmr.msra.gmra.mrb[4].mxu0 %vm1146_vm2, %v2954_v3  ;;  %1585 = vadd.xlane.f32.xlu1 %v1584_v6  ;;  %v1581_v8 = vsel %vm1146_vm2, %v2954_v3, 0.0 }
 0x3dc   : > { %2774 = vmatpush3.msra.mxu0 %v1773_v7  ;;  %1582 = vadd.xlane.f32.xlu0 %v1581_v8 }
 0x3dd   : > { %v2956_v9 = vpop.eup %2955  ;;  %2779 = vmatpush3.msra.mxu1 %v1849_v5  ;;  %2775 = vmatprep.mubr.msk.f32.mxu0 %vm3118_vm0, %v3119_v1 }
 0x3de   : > { %v1587_v10 = vsel %vm1146_vm2, %v2956_v9, 0.0  ;;  %2780 = vmatprep.mubr.msk.f32.mxu1 %vm3118_vm0, %v3119_v1  ;;  %2836 = vmatprep.subr.bf16.mxu0 %v3117_v0 }
 0x3df   : > { %2776 = vmatmul.mubr.msk.f32.vlgmr.msra.gmra.mrb[6].mxu0 %vm1146_vm2, %v2956_v9  ;;  %2842 = vmatprep.subr.bf16.mxu1 %v3117_v0 }
 0x3e0   : > { %1588 = vadd.xlane.f32.xlu0 %v1587_v10  ;;  %2791 = vmatprep.mubr.msk.f32.mxu0 %vm3118_vm0, %v3119_v1 }
 0x3e1   : > { %v2958_v11 = vpop.eup %2957  ;;  %2838 = vmatpush3.bf16.msra.mxu0 %v2837_v45 }
 0x3e2   : > { %2781 = vmatmul.mubr.msk.f32.vlgmr.msra.gmra.mrb[10].mxu1 %vm1146_vm2, %v2958_v11  ;;  %v1590_v12 = vsel %vm1146_vm2, %v2958_v11, 0.0  ;;  %v2960_v13 = vpop.eup %2959  ;;  %2839 = vmatprep.subr.bf16.mxu0 %v3117_v0 }
 0x3e3   : > { %2802 = vmatprep.mubr.msk.f32.mxu1 %vm3118_vm0, %v3119_v1  ;;  %v1927_v14 = vrot.slane %v2960_v13, %v3569_v39  ;;  %v1941_v16 = vrot.slane %v2960_v13, %v3576_v46  ;;  %v1948_v28 = vrot.slane %v2960_v13, %v3580_v48  ;;  %v1934_v17 = vrot.slane %v2960_v13, %v3566_v38 }
 0x3e4   : > { %1591 = vadd.xlane.f32.xlu0 %v1590_v12  ;;  %v1580_v30 = vmul.f32 %v2960_v13, %v1579_v24 }
 0x3ec   : > { %1929 = vbcast.lane.b32.xlu1 %v1927_v14, 256 }
 0x3f0   : > { %1943 = vbcast.lane.b32.xlu1 %v1941_v16, 256 }
 0x3f4   : > { %1950 = vbcast.lane.b32.xlu1 %v1948_v28, 256 }
 0x3fa   : > { %1936 = vbcast.lane.b32.xlu0 %v1934_v17, 256 }
 0x468   : > { %v1586_v19 = vpop.xlane.xlu1 %1585 }
 0x469   : > { %v1583_v18 = vpop.xlane.xlu0 %1582  ;;  %v1604_v22 = vrot.slane %v1586_v19, %v3549_v4 }
 0x46a   : > { %v1600_v21 = vrot.slane %v1583_v18, %v3549_v4 }
 0x46c   : > { %v1613_v26 = vsel %vm1179_vm5, %v1604_v22, %v1600_v21 }
 0x46d   : > { %v1589_v20 = vpop.xlane.xlu0 %1588 }
 0x46e   : > { %v1608_v23 = vrot.slane %v1589_v20, %v3549_v4 }
 0x470   : > { %v1614_v29 = vsel %vm1180_vm6, %v1608_v23, %v1613_v26 }
 0x471   : > { %v1592_v25 = vpop.xlane.xlu0 %1591 }
 0x472   : > { %v1612_v27 = vrot.slane %v1592_v25, %v3549_v4 }
 0x474   : > { %v1615_v31 = vsel %vm1182_vm7, %v1612_v27, %v1614_v29 }
 0x475   : > { %v1617_v33 = vadd.f32 %v1615_v31, %v1580_v30  ;;  %v1937_v47 = vpop.permute.xlu0 %1936  ;;  %v2165_v31 = vld [vmem:[%s3784_s7 + $0x10] sm:$0xff] }
 0x477   : > { %1619 = vst.msk [vmem:[#allocation5] sm:$0xf] %vm1151_vm4, %v1617_v33  ;;  %v2166_v33 = vld [vmem:[%s3784_s7 + $0x18] sm:$0xff] }
 0x47e   : > { %v1972_v34 = vld [vmem:[#allocation5] sm:$0xf] }
 0x47f   : > { %2961 = vrcp.f32 %v1972_v34 }
 0x489   : > { %v2962_v35 = vpop.eup %2961 }
 0x48a   : > { %v1988_v37 = vrot.slane %v2962_v35, %v3566_v38  ;;  %v1981_v40 = vrot.slane %v2962_v35, %v3569_v39  ;;  %v2002_v41 = vrot.slane %v2962_v35, %v3580_v48  ;;  %v1995_v4 = vrot.slane %v2962_v35, %v3576_v46  ;;  %v1930_v38 = vpop.permute.xlu1 %1929  ;;  %v1953_v39 = vld [vmem:[#allocation6 + $0x8] sm:$0xff]  ;;  %v1952_v48 = vld [vmem:[#allocation6] sm:$0xff] }
 0x48b   : > { %v1957_v46 = vmul.f32 %v1953_v39, %v1937_v47  ;;  %v1956_v50 = vmul.f32 %v1952_v48, %v1930_v38 }
 0x48c   : > { %1990 = vbcast.lane.b32.xlu1 %v1988_v37, 256  ;;  %1983 = vbcast.lane.b32.xlu0 %v1981_v40, 256 }
 0x48e   : > { %v1944_v49 = vpop.permute.xlu1 %1943 }
 0x48f   : > { %v1958_v57 = vmul.f32 %v1954_v32, %v1944_v49 }
 0x490   : > { %2004 = vbcast.lane.b32.xlu1 %v2002_v41, 256  ;;  %1997 = vbcast.lane.b32.xlu0 %v1995_v4, 256  ;;  %v2840_v41 = vpack.c.bf16 %v2166_v33, %v2165_v31  ;;  %v2664_v31 = vld [vmem:[%s3833_s0] ss:$0 sm:$0xff]  ;;  %s3836_s0 = sld [smem:[#allocation25_spill]] }
 0x492   : > { %v1951_v60 = vpop.permute.xlu1 %1950  ;;  %2841 = vmatpush3.bf16.msra.mxu0 %v2840_v41 }
 0x493   : > { %v1959_v63 = vmul.f32 %v1955_v59, %v1951_v60  ;;  %2848 = vmatprep.subr.bf16.mxu0 %v3117_v0 }
 0x4ad   : > { %v1768_v51 = vpop.f32.mrb[8].mxu1 }
 0x4ae   : > { %v1692_v52 = vpop.f32.mrb[4].mxu0  ;;  %v1961_v53 = vadd.f32 %v1957_v46, %v1768_v51  ;;  %v2772_v54 = vpop.f32.mrb[9].mxu1 }
 0x4af   : > { %v1960_v55 = vadd.f32 %v1956_v50, %v1692_v52  ;;  %v2767_v56 = vpop.f32.mrb[5].mxu0 }
 0x4b0   : > { %1965 = vst.msk [vmem:[#allocation6 + $0x8] sm:$0xff] %vm1146_vm2, %v1961_v53 }
 0x4b1   : > { %1964 = vst.msk [vmem:[#allocation6] sm:$0xff] %vm1146_vm2, %v1960_v55 }
 0x4b2   : > { %v1844_v58 = vpop.f32.mrb[6].mxu0 }
 0x4b3   : > { %v1962_v61 = vadd.f32 %v1958_v57, %v1844_v58  ;;  %v2777_v62 = vpop.f32.mrb[7].mxu0 }
 0x4b5   : > { %1966 = vst.msk [vmem:[#allocation6 + $0x10] sm:$0xff] %vm1146_vm2, %v1962_v61  ;;  %v1920_v2 = vpop.f32.mrb[10].mxu1 }
 0x4b6   : > { %v1963_v3 = vadd.f32 %v1959_v63, %v1920_v2  ;;  %v2782_v5 = vpop.f32.mrb[11].mxu1 }
 0x4b7   : > { %v1975_v8 = vld [vmem:[#allocation6 + $0x8] sm:$0xff] }
 0x4b8   : > { %1967 = vst.msk [vmem:[#allocation6 + $0x18] sm:$0xff] %vm1146_vm2, %v1963_v3  ;;  %v1974_v9 = vld [vmem:[#allocation6] sm:$0xff] }
 0x4bc   : > { %v1976_v12 = vld [vmem:[#allocation6 + $0x10] sm:$0xff] }
 0x4bf   : > { %v1977_v11 = vld [vmem:[#allocation6 + $0x18] sm:$0xff] }
 0x4fe   : > { %v1991_v6 = vpop.permute.xlu1 %1990  ;;  %v1984_v7 = vpop.permute.xlu0 %1983 }
 0x4ff   : > { %v2007_v14 = vmul.f32 %v1991_v6, %v1975_v8  ;;  %v2006_v16 = vmul.f32 %v1984_v7, %v1974_v9 }
 0x502   : > { %v2005_v10 = vpop.permute.xlu1 %2004  ;;  %v1998_v13 = vpop.permute.xlu0 %1997 }
 0x503   : > { %v2009_v28 = vmul.f32 %v2005_v10, %v1977_v11  ;;  %v2008_v17 = vmul.f32 %v1998_v13, %v1976_v12  ;;  %v2281_v13 = vld [vmem:[#allocation10 + $0x8] sm:$0xff] }
 0x505   : > { %v2026_v18 = vcombine.low %v2007_v14, %v2009_v28  ;;  %v2027_v19 = vcombine.high %v2007_v14, %v2009_v28  ;;  %v2010_v20 = vcombine.low %v2006_v16, %v2008_v17  ;;  %v2011_v21 = vcombine.high %v2006_v16, %v2008_v17  ;;  %v2282_v16 = vld [vmem:[#allocation10 + $0x10] sm:$0xff]  ;;  %v2283_v28 = vld [vmem:[#allocation10 + $0x18] sm:$0xff] }
 0x506   : > { %v2846_v17 = vpack.c.bf16 %v2283_v28, %v2282_v16 }
 0x507   : > { %v2034_v22 = vrot.slane %v2026_v18, %v3468_v36  ;;  %v2041_v23 = vrot.slane %v2027_v19, %v3468_v36  ;;  %v2018_v24 = vrot.slane %v2010_v20, %v3468_v36  ;;  %v2025_v25 = vrot.slane %v2011_v21, %v3468_v36  ;;  %v2366_v18 = vld [vmem:[%s3790_s13 + $0x8] sm:$0xff]  ;;  %v2367_v19 = vld [vmem:[%s3790_s13 + $0x10] sm:$0xff]  ;;  %v2368_v21 = vld [vmem:[%s3790_s13 + $0x18] sm:$0xff] }
 0x509   : > { %v2042_v26 = vcombine.low %v2018_v24, %v2034_v22  ;;  %v2043_v27 = vcombine.high %v2018_v24, %v2034_v22  ;;  %v2058_v29 = vcombine.low %v2025_v25, %v2041_v23  ;;  %v2059_v30 = vcombine.high %v2025_v25, %v2041_v23  ;;  %v2369_v23 = vld [vmem:[%s3790_s13 + $0x20] sm:$0xff]  ;;  %v2370_v24 = vld [vmem:[%s3790_s13 + $0x28] sm:$0xff] }
 0x50a   : > { %v2852_v22 = vpack.c.bf16 %v2368_v21, %v2367_v19  ;;  %v2855_v25 = vpack.c.bf16 %v2370_v24, %v2369_v23 }
 0x50b   : > { %v2050_v34 = vrot.slane %v2042_v26, %v3471_v42  ;;  %v2057_v35 = vrot.slane %v2043_v27, %v3471_v42  ;;  %v2066_v37 = vrot.slane %v2058_v29, %v3471_v42  ;;  %v2073_v40 = vrot.slane %v2059_v30, %v3471_v42 }
 0x50d   : > { %v2078_v4 = vcombine.low %v2050_v34, %v2057_v35  ;;  %v2660_v43 = vcombine.high %v2050_v34, %v2057_v35  ;;  %v2094_v44 = vcombine.low %v2066_v37, %v2073_v40  ;;  %v2661_v45 = vcombine.high %v2066_v37, %v2073_v40  ;;  %v2665_v34 = vld [vmem:[%s3834_s10] ss:$0 sm:$0xff]  ;;  %v2372_v40 = vld [vmem:[%s3790_s13 + $0x38] sm:$0xff]  ;;  %s3837_s10 = sld [smem:[#allocation26_spill]] }
 0x50f   : > { %v2085_v38 = vrot.slane %v2078_v4, %v3468_v36  ;;  %v2093_v39 = vrot.slane %v2660_v43, %v3468_v36  ;;  %v2101_v47 = vrot.slane %v2094_v44, %v3468_v36  ;;  %v2109_v48 = vrot.slane %v2661_v45, %v3468_v36  ;;  %v2666_v4 = vld [vmem:[%s3835_s19] ss:$0 sm:$0xff] }
 0x511   : > { %v2111_v49 = vcombine.high %v2085_v38, %v2093_v39  ;;  %v2127_v46 = vcombine.high %v2101_v47, %v2109_v48  ;;  %v2110_v50 = vcombine.low %v2085_v38, %v2093_v39  ;;  %v2126_v51 = vcombine.low %v2101_v47, %v2109_v48  ;;  %v2668_v39 = vld [vmem:[%s3836_s0] ss:$0 sm:$0xff] }
 0x513   : > { %v2125_v32 = vrot.slane %v2111_v49, %v3471_v42  ;;  %v2141_v52 = vrot.slane %v2127_v46, %v3471_v42  ;;  %v2118_v53 = vrot.slane %v2110_v50, %v3471_v42  ;;  %v2134_v54 = vrot.slane %v2126_v51, %v3471_v42  ;;  %v2662_v42 = vld [vmem:[%s3785_s8] ss:$0 sm:$0xff] }
 0x515   : > { %v2144_v55 = vcombine.low %v2125_v32, %v2141_v52  ;;  %v2143_v56 = vcombine.high %v2118_v53, %v2134_v54  ;;  %v2142_v57 = vcombine.low %v2118_v53, %v2134_v54  ;;  %v2145_v36 = vcombine.high %v2125_v32, %v2141_v52 }
 0x517   : > { %2151 = vrot.lane.b32.xlu1 %v2144_v55, %s3129_s17  ;;  %2147 = vrot.lane.b32.xlu0 %v2143_v56, %s3130_s12  ;;  %s2673_s17 = sshll.u32 %s3103_s27, 7  ;;  %s650_s12 = scalar_lea.vmem [#allocation12], %s2635_s16 }
 0x518   : > { %s3727_s0 = scalar_lea.hbm %s3839_s9, %s2673_s17  ;;  %s3132_s27 = smov [#allocation12]  }
 0x519   : > { %s3029_s16 = sshll.u32 %s3132_s27, 4  ;;  %s3030_s16 = int_to_ptr.vmem [resolvable:$false] %s3029_s16 }
 0x51b   : > { %2155 = vrot.lane.b32.xlu0 %v2145_v36, %s3131_s23  ;;  %s2500_s23 = sshll.u32 %s650_s12, 4  ;;  %s3729_s23 = int_to_ptr.vmem [resolvable:$true] %s2500_s23 }
 0x51c   : > { %s3025_s24 = scalar_lea.vmem %s3729_s23, 128  ;;  %p3032_p11 = scmp.lt.s32.totalorder %s3729_s23, %s3030_s16 }
 0x51d   : > { %p3026_p6 = scmp.ne.s32.totalorder %s3729_s23, %s3025_s24 }
 0x51f   : > { %p3027_p8 = pnand %p3026_p6, %p3319_p10 }
 0x521   : > { %p3028_p12 = pneg %p3027_p8 }
 0x589   : > { %v2148_v59 = vpop.permute.xlu0 %2147  ;;  %v2152_v60 = vpop.permute.xlu1 %2151 }
 0x58a   : > { %v2158_v58 = vsel %vm1146_vm2, %v2142_v57, %v2148_v59  ;;  %v2670_v59 = vld [vmem:[%s3837_s10] ss:$0 sm:$0xff]  ;;  %s3031_s10 = scalar_lea.vmem %s3030_s16, 256 }
 0x58b   : > { %v2160_v62 = vsel %vm905_vm3, %v2158_v58, %v2152_v60  ;;  %v2671_v58 = vld [vmem:[%s3838_s21] ss:$0 sm:$0xff]  ;;  %p3033_p0 = scmp.lt.s32.totalorder %s3031_s10, %s3025_s24 }
 0x58d   : > { %v2156_v61 = vpop.permute.xlu0 %2155  ;;  %p3034_p5 = por %p3033_p0, %p3032_p11 }
 0x58e   : > { %v2162_v63 = vsel %vm2161_vm8, %v2160_v62, %v2156_v61 }
 0x58f   : > { %2792 = vmatmul.mubr.msk.f32.vlgmr.msra.gmra.mrb[8].mxu0 %vm683_vm1, %v2162_v63  ;;  %p3035_p9 = pnand %p3034_p5, %p3028_p12 }
 0x590   : > { %2821 = vmatprep.mubr.msk.f32.mxu0 %vm3118_vm0, %v3119_v1  ;;  %v2280_v1 = vld [vmem:[#allocation10] sm:$0xff] }
 0x591   : > { %v2843_v14 = vpack.c.bf16 %v2281_v13, %v2280_v1 }
 0x593   : > { %2844 = vmatpush3.bf16.msra.mxu1 %v2843_v14 }
 0x594   : > { %2845 = vmatprep.subr.bf16.mxu1 %v3117_v0 }
 0x597   : > { %2847 = vmatpush3.bf16.msra.mxu1 %v2846_v17 }
 0x662   : > { %v2244_v2 = vpop.f32.mrb[8].mxu0 }
 0x663   : > { %v2245_v3 = vadd.f32 %v2662_v42, %v2244_v2  ;;  %v2793_v5 = vpop.f32.mrb[9].mxu0 }
 0x665   : > { %v2249_v6 = vadd.f32 %v2245_v3, %v3432_v15  ;;  %v2365_v15 = vld [vmem:[%s3790_s13] sm:$0xff] }
 0x666   : > { %v2849_v20 = vpack.c.bf16 %v2366_v18, %v2365_v15 }
 0x667   : > { %v2252_v7 = vsel %vm683_vm1, %v2249_v6, 0.0 }
 0x668   : > { %2253 = vadd.xlane.f32.xlu1 %v2252_v7  ;;  %2850 = vmatpush3.bf16.msra.mxu0 %v2849_v20 }
 0x669   : > { %2851 = vmatprep.subr.bf16.mxu0 %v3117_v0 }
 0x66c   : > { %2853 = vmatpush3.bf16.msra.mxu0 %v2852_v22 }
 0x66d   : > { %2854 = vmatprep.subr.bf16.mxu0 %v3117_v0 }
 0x670   : > { %2856 = vmatpush3.bf16.msra.mxu0 %v2855_v25 }
 0x671   : > { %2857 = vmatprep.subr.bf16.mxu0 %v3117_v0  ;;  %v2371_v0 = vld [vmem:[%s3790_s13 + $0x30] sm:$0xff] }
 0x672   : > { %v2858_v41 = vpack.c.bf16 %v2372_v40, %v2371_v0 }
 0x674   : > { %2859 = vmatpush3.bf16.msra.mxu0 %v2858_v41 }
 0x6f5   : > { %v2254_v8 = vpop.xlane.xlu1 %2253 }
 0x6f6   : > { %v2256_v9 = vmul.f32 0.03125, %v2254_v8 }
 0x6f8   : > { %v2257_v10 = vsub.f32 %v2249_v6, %v2256_v9 }
 0x6fa   : > { %v2258_v11 = vmul.f32 %v2257_v10, %v2257_v10 }
 0x6fc   : > { %v2259_v12 = vsel %vm683_vm1, %v2258_v11, 0.0 }
 0x6fd   : > { %2260 = vadd.xlane.f32.xlu0 %v2259_v12 }
 0x78a   : > { %v2261_v26 = vpop.xlane.xlu0 %2260 }
 0x78b   : > { %v2262_v27 = vmul.f32 0.03125, %v2261_v26 }
 0x78d   : > { %v2263_v29 = vadd.f32 1e-05, %v2262_v27 }
 0x78f   : > { %2963 = vrsqrt.f32 %v2263_v29 }
 0x799   : > { %v2964_v30 = vpop.eup %2963 }
 0x79a   : > { %v2265_v33 = vmul.f32 %v2964_v30, %v2257_v10 }
 0x79c   : > { %v2272_v35 = vmul.f32 %v2664_v31, %v2265_v33 }
 0x79e   : > { %v2279_v37 = vadd.f32 %v2665_v34, %v2272_v35 }
 0x7a0   : > { %2803 = vmatmul.mubr.msk.f32.vlgmr.msra.gmra.mrb[12].mxu1 %vm683_vm1, %v2279_v37 }
 0x873   : > { %v2360_v43 = vpop.f32.mrb[12].mxu1 }
 0x874   : > { %v2361_v44 = vadd.f32 %v2666_v4, %v2360_v43  ;;  %v2804_v45 = vpop.f32.mrb[13].mxu1 }
 0x876   : > { %v2364_v38 = vmax.f32 %v2361_v44, 0.0 }
 0x878   : > { %2822 = vmatmul.mubr.msk.f32.vlgmr.msra.gmra.mrb[10].mxu0 %vm2380_vm9, %v2364_v38 }
 0x94b   : > { %v2450_v47 = vpop.f32.mrb[10].mxu0 }
 0x94c   : > { %v2451_v48 = vadd.f32 %v2668_v39, %v2450_v47  ;;  %v2823_v49 = vpop.f32.mrb[11].mxu0 }
 0x94e   : > { %v2454_v46 = vadd.f32 %v2451_v48, %v2279_v37 }
 0x950   : > { %v2457_v50 = vsel %vm683_vm1, %v2454_v46, 0.0 }
 0x951   : > { %2458 = vadd.xlane.f32.xlu0 %v2457_v50 }
 0x9de   : > { %v2459_v51 = vpop.xlane.xlu0 %2458 }
 0x9df   : > { %v2460_v32 = vmul.f32 0.03125, %v2459_v51 }
 0x9e1   : > { %v2461_v52 = vsub.f32 %v2454_v46, %v2460_v32 }
 0x9e3   : > { %v2462_v53 = vmul.f32 %v2461_v52, %v2461_v52 }
 0x9e5   : > { %v2463_v54 = vsel %vm683_vm1, %v2462_v53, 0.0 }
 0x9e6   : > { %2464 = vadd.xlane.f32.xlu1 %v2463_v54 }
 0xa73   : > { %v2465_v55 = vpop.xlane.xlu1 %2464 }
 0xa74   : > { %v2466_v56 = vmul.f32 0.03125, %v2465_v55 }
 0xa76   : > { %v2467_v57 = vadd.f32 1e-05, %v2466_v56 }
 0xa78   : > { %2965 = vrsqrt.f32 %v2467_v57 }
 0xa82   : > { %v2966_v36 = vpop.eup %2965 }
 0xa83   : > { %v2469_v60 = vmul.f32 %v2966_v36, %v2461_v52 }
 0xa85   : > { %v2476_v61 = vmul.f32 %v2670_v59, %v2469_v60 }
 0xa87   : > { %v2483_v62 = vadd.f32 %v2671_v58, %v2476_v61 }
 0xa89   : > { %2484 = vst.msk [vmem:[%s650_s12] sm:$0xff] %vm683_vm1, %v2483_v62 }
 0xa8a   : > { %3038 = shalt.err (!%p3035_p9)
}
 0xa8b   : > { %s3039_s30 = scalar_lea.hbm %s3727_s0, 128  ;;  %s3043_s21 = scalar_lea.hbm %s3839_s9, 256 }
 0xa8c   : > { %p3040_p1 = scmp.ne.s32.totalorder %s3727_s0, %s3039_s30  ;;  %p3044_p3 = scmp.lt.u32.totalorder %s3727_s0, %s3839_s9 }
 0xa8d   : > { %p3045_p13 = scmp.lt.u32.totalorder %s3043_s21, %s3039_s30  ;;  %p3047_p6 = scmp.lt.u32.totalorder %s3039_s30, %s3727_s0 }
 0xa8e   : > { %p3041_p2 = pnand %p3040_p1, %p3319_p10 }
 0xa8f   : > { %p3046_p4 = por %p3045_p13, %p3044_p3 }
 0xa90   : > { %p3042_p7 = pneg %p3041_p2 }
 0xa91   : > { %p3048_p8 = por %p3047_p6, %p3046_p4 }
 0xa93   : > { %p3049_p12 = pnand %p3048_p8, %p3042_p7 }
 0xa95   : > { %3052 = shalt.err (!%p3049_p12)
}
 0xa96   : > { %2866 = dma.vmem_to_hbm [thread:$0]  (%p3319_p10), %s3729_s23, 128, %s3727_s0, %s2486_s14  }
 0xa97 PF: > { %s3840_s19 = sld [smem:[#allocation16_spill]]  ;;  %s3841_s22 = sld [smem:[#allocation17_spill]] }
 0xa98   : > { %p3843_p0 = scmp.ge.s32.totalorder %s3111_s29, 2 }
 0xa9d   : > { %s2512_s24 = sand.u32 1, %s3840_s19   ;;  %p3842_p11 = scmp.ne.s32.totalorder %s3841_s22, 0 }
 0xa9e   : > { %s2513_s27 = scalar_lea.sflag [#allocation9], %s2512_s24 }
 0xa9f   : > { %p2877_p5 = pnand %p3843_p0, %p3842_p11 }
 0xaa1   : > { %3086 = dma.done.wait (!%p2877_p5), %s2513_s27, 128  }
 0xaa2   : > { %3088 = vsyncadd (!%p2877_p5), %s2513_s27, 4294967168  ;;  %s34_s29 = sadd.s32 1, %s3111_s29   ;;  %s3844_s20 = sld [smem:[#allocation18_spill]] }
 0xaa3   : > { %p31_p9 = scmp.ge.s32.totalorder %s34_s29, 4   ;;  %s3845_s24 = smov %s3095_s25 }
 0xaa4   : > { %s3846_s25 = smov %s3099_s26  ;;  %s3847_s26 = smov %s3328_s15 }
 0xaa5   : > { %s3848_s27 = smov %s3107_s28  ;;  %33 = sbr.rel (!%p31_p9) target bundleno = 18 (0x12), region = 157 }
 0xaa8   : > { %s3849_s28 = smov %s3844_s20 }
 0xaac   :  { %2518 = vsyncpa [#allocation8], 1 }
 0xaad   :  { %2520 = vsyncpa [#allocation8 + $0x1], 1 }
 0xaae   :  { %2521 = vsyncpa [#allocation11], 1 }
 0xaaf   :  { %2522 = vsyncpa [#allocation9], 1 }
 0xab0   :  { %2524 = vsyncpa [#allocation9 + $0x1], 1 }

</bundles_post_ra>
